<compile_context>
chip_gen: v7x
topology: tpu7x:2x2x1
jax: 0.10.0
libtpu: 0.0.40
codegen_flags: <defaults>
</compile_context>

<pallas_src>
import math
import random

import jax
import jax.numpy as jnp
from jax import lax
from jax.experimental import pallas as pl
from jax.experimental.pallas import tpu as pltpu

LANE = 128


def _make_kernel(B, S, H, W, Vp, Tm1, tf_flags):
    tf_flags = tuple(bool(int(f)) for f in tf_flags)
    assert len(tf_flags) == Tm1

    def kernel(tgt_emb_ref,         # (T-1, B, W) bf16 teacher-forced input embeddings
               attn_pre_ref,        # (B, S, H)  bf16 precomputed enc_out @ W1_enc + b1
               enc_out_ref,         # (B, S, H)  bf16
               enc_h_ref,           # (B, H)     f32  initial hidden state
               emb_ref,             # (Vp, W)    bf16 vocab-padded embedding table
               wh_ref,              # (H, 4H)    bf16 fused [attn W1_hid | GRU W_hh]
               w2_ref, b2_ref,      # (H, H) bf16 , (1, H) f32   attention layer 2
               w3_ref,              # (1, 1, H)  f32  attention layer 3 (VPU+XLU path)
               wih_ref, bih_ref,    # (W+H, 3H) bf16 , (1, 3H) f32  fused GRU input weights
               bhh_ref,             # (1, 3H)    f32  GRU hidden bias
               wout_ref, bout_ref,  # (H, Vp) bf16 , (1, Vp) f32 (-1e30 on vocab padding)
               out_ref):            # (T-1, B, Vp) f32 per-step logits
        # Only the small bias broadcasts are hoisted (JAX does not CSE broadcast_in_dim);
        # all large operands are loaded from VMEM at their use sites so nothing big stays
        # live in vregs across the unrolled loop (no spills on the dependent chain).
        bihb = jnp.broadcast_to(bih_ref[...], (B, 3 * H))
        bhhb = jnp.broadcast_to(bhh_ref[...], (B, 3 * H))
        boutb = jnp.broadcast_to(bout_ref[...], (B, Vp))

        h = enc_h_ref[...]                                            # (B, H) f32, value-carried

        # decoder_input = torch.ones(...).long() -> embedding row 1; only materialized if
        # the first decode step is not teacher-forced.
        prev_emb = None
        if Tm1 > 0 and not tf_flags[0]:
            prev_emb = jnp.broadcast_to(emb_ref[pl.ds(1, 1), :], (B, W))   # bf16

        # Fully unrolled decode loop; teacher-forcing decisions are static Python constants,
        # so dead paths are pruned at trace time (no runtime branches / basic-block splits).
        for step in range(Tm1):
            cur = tgt_emb_ref[step] if tf_flags[step] else prev_emb   # (B, W) bf16

            # --- fused matmul on the carried hidden state: [attn W1_hid | GRU W_hh] ---
            hp = jnp.dot(h.astype(jnp.bfloat16), wh_ref[...],
                         preferred_element_type=jnp.float32)          # (B, 4H) f32

            # --- attention: ReLU(pre + h-term) -> ReLU(@W2 + b2) -> .w3 -> softmax over S ---
            a1 = jnp.maximum(attn_pre_ref[...] + hp[:, None, :H], 0.0)    # (B, S, H) f32
            a2 = jnp.maximum(
                lax.dot_general(a1.astype(jnp.bfloat16), w2_ref[...],
                                (((2,), (0,)), ((), ())),
                                preferred_element_type=jnp.float32)
                + b2_ref[...], 0.0)                                    # (B, S, H) f32
            # N=1 projection on VPU multiply + XLU lane-reduce instead of an MXU push/drain
            scores = jnp.sum(a2 * w3_ref[...], axis=-1, keepdims=True)     # (B, S, 1)
            scores = scores - jnp.max(scores, axis=1, keepdims=True)
            e = jnp.exp(scores)
            attn = e / jnp.sum(e, axis=1, keepdims=True)               # softmax over S, f32
            context = jnp.sum(attn * enc_out_ref[...], axis=1)         # (B, H) f32

            # --- GRU cell (PyTorch gate order r, z, n); fused input matmul over [emb, ctx] ---
            gru_in = jnp.concatenate([cur, context.astype(jnp.bfloat16)], axis=1)  # (B, W+H)
            gi = jnp.dot(gru_in, wih_ref[...],
                         preferred_element_type=jnp.float32) + bihb    # (B, 3H)
            gh = hp[:, H:] + bhhb                                      # (B, 3H) from fused matmul
            r = jax.nn.sigmoid(gi[:, 0:H] + gh[:, 0:H])
            z = jax.nn.sigmoid(gi[:, H:2 * H] + gh[:, H:2 * H])
            n = jnp.tanh(gi[:, 2 * H:] + r * gh[:, 2 * H:])
            h = (1.0 - z) * n + z * h                                  # (B, H) f32 recurrence

            # --- output projection (the module applies no log_softmax) ---
            logits = jnp.dot(h.astype(jnp.bfloat16), wout_ref[...],
                             preferred_element_type=jnp.float32) + boutb    # (B, Vp)
            out_ref[step] = logits                                     # lane-dense store

            # --- greedy feedback embedding, only when the NEXT step actually consumes it ---
            # (skipped at the final step and before teacher-forced steps: dead work pruned)
            if step + 1 < Tm1 and not tf_flags[step + 1]:
                idx = jnp.argmax(logits, axis=1)                       # pad cols carry -1e30
                onehot = jnp.where(
                    lax.broadcasted_iota(jnp.int32, (B, Vp), 1) == idx[:, None],
                    1.0, 0.0).astype(jnp.bfloat16)
                prev_emb = jnp.dot(onehot, emb_ref[...],
                                   preferred_element_type=jnp.float32
                                   ).astype(jnp.bfloat16)              # exact row pick, (B, W)

    return kernel


def init_params(key, hidden, word_dim, vocab):
    ks = jax.random.split(key, 12)

    def rnd(k, shape, scale=0.1):
        return jax.random.normal(k, shape, dtype=jnp.float32) * scale

    return dict(
        embedding=rnd(ks[0], (vocab, word_dim)),
        attn_w1=rnd(ks[1], (hidden, 2 * hidden)),   # nn.Linear(2H, H).weight
        attn_b1=rnd(ks[2], (hidden,)),
        attn_w2=rnd(ks[3], (hidden, hidden)),       # nn.Linear(H, H).weight
        attn_b2=rnd(ks[4], (hidden,)),
        attn_w3=rnd(ks[5], (1, hidden)),            # nn.Linear(H, 1, bias=False).weight
        gru_w_ih=rnd(ks[6], (3 * hidden, word_dim + hidden)),
        gru_b_ih=rnd(ks[7], (3 * hidden,)),
        gru_w_hh=rnd(ks[8], (3 * hidden, hidden)),
        gru_b_hh=rnd(ks[9], (3 * hidden,)),
        out_w=rnd(ks[10], (vocab, hidden)),         # nn.Linear(H, V).weight
        out_b=rnd(ks[11], (vocab,)),
    )


def decoder_rnn_forward(params, encoder_hidden, encoder_outputs, targets, tf_flags):
    B, S, H = encoder_outputs.shape
    V, W = params["embedding"].shape
    Tm1 = targets.shape[1] - 1
    Vp = ((V + LANE - 1) // LANE) * LANE            # lane-pad vocab (dense stores / clean MXU)
    tf_flags = tuple(bool(int(f)) for f in tf_flags)    # STATIC: baked into the kernel
    assert len(tf_flags) == Tm1
    bf16 = jnp.bfloat16

    emb = params["embedding"]
    # glue: gather teacher-forced target embeddings, step-major (T-1, B, W), bf16 for DMA
    tgt_emb = jnp.transpose(emb[targets[:, :-1]], (1, 0, 2)).astype(bf16)
    enc_h = encoder_hidden.reshape(B, H)                              # f32 recurrence state

    # glue: transpose weights to (in, out) so the kernel does x @ W
    # attention layer-1 input order is cat(encoder_outputs, hidden) -> first H rows = enc part
    w1 = params["attn_w1"].T                                          # (2H, H)
    w1e, w1h = w1[:H], w1[H:]
    # step-invariant half of attention layer 1: computed ONCE here in f32 (plain XLA matmul)
    attn_pre = (jnp.einsum("bsh,hk->bsk", encoder_outputs, w1e)
                + params["attn_b1"][None, None, :]).astype(bf16)      # (B, S, H)
    # fused old-hidden weight: [attn W1 hidden part | GRU W_hh]  -> one (B,H)@(H,4H) per step
    wh_fused = jnp.concatenate([w1h, params["gru_w_hh"].T], axis=1).astype(bf16)   # (H, 4H)
    w2 = params["attn_w2"].T.astype(bf16)
    b2 = params["attn_b2"].reshape(1, H)                              # f32
    w3 = params["attn_w3"].reshape(1, 1, H)                           # f32, used on the VPU
    wih = params["gru_w_ih"].T.astype(bf16)                           # (W+H, 3H), fused matmul
    bih = params["gru_b_ih"].reshape(1, 3 * H)                        # f32
    bhh = params["gru_b_hh"].reshape(1, 3 * H)                        # f32

    # vocab padding: zero weight columns + -1e30 bias so in-kernel argmax never picks a pad
    wout = jnp.zeros((H, Vp), bf16).at[:, :V].set(params["out_w"].T.astype(bf16))
    bout = jnp.full((1, Vp), -1e30, jnp.float32).at[:, :V].set(params["out_b"].reshape(1, V))
    emb_pad = jnp.zeros((Vp, W), bf16).at[:V, :].set(emb.astype(bf16))

    kernel = _make_kernel(B, S, H, W, Vp, Tm1, tf_flags)

    # Gridless call: single invocation, whole arrays resident in VMEM (~0.5 MiB total with
    # bf16 weights), no pipeline -> no redundant double-buffering of the weight inputs.
    out_padded = pl.pallas_call(
        kernel,
        out_shape=jax.ShapeDtypeStruct((Tm1, B, Vp), jnp.float32),
    )(tgt_emb, attn_pre, encoder_outputs.astype(bf16), enc_h, emb_pad,
      wh_fused, w2, b2, w3, wih, bih, bhh, wout, bout)

    log_probs = jnp.transpose(out_padded, (1, 0, 2))[:, :, :V]        # (B, T-1, V)
    preds = jnp.argmax(log_probs, axis=2)                             # (B, T-1)
    return log_probs, preds


if __name__ == "__main__":
    # small shapes consistent with the module (hidden_size == word_dim, batch-first decode);
    # H = W = 128 keeps concat offsets / gate slices lane-aligned.
    B, S, H, W, V, T = 8, 8, 128, 128, 40, 6
    key = jax.random.PRNGKey(0)
    kp, k1, k2, k3 = jax.random.split(key, 4)
    params = init_params(kp, H, W, V)
    encoder_hidden = jax.random.normal(k1, (1, B, H), dtype=jnp.float32)
    encoder_outputs = jax.random.normal(k2, (B, S, H), dtype=jnp.float32)
    targets = jax.random.randint(k3, (B, T), 0, V)

    # deterministic teacher-forcing decisions (training=True, outer training step=0):
    # random.random() < expit(step/20 + 0.85), with a fixed host RNG seed.
    step = 0
    ratio = 1.0 / (1.0 + math.exp(-(step / 20.0 + 0.85)))
    rng = random.Random(0)
    tf_flags = [1 if rng.random() < ratio else 0 for _ in range(T - 1)]

    log_probs, preds = decoder_rnn_forward(params, encoder_hidden, encoder_outputs,
                                           targets, tf_flags)
    jax.block_until_ready((log_probs, preds))
    assert log_probs.shape == (B, T - 1, V)
    assert preds.shape == (B, T - 1)
    print("KERNEL_OK")
</pallas_src>

<mosaic_0001>
module attributes {stable_mosaic.version = 11 : i64} {
  func.func @kernel(%arg0: memref<5x8x128xbf16, #tpu.memory_space<vmem>>, %arg1: memref<8x8x128xbf16, #tpu.memory_space<vmem>>, %arg2: memref<8x8x128xbf16, #tpu.memory_space<vmem>>, %arg3: memref<8x128xf32, #tpu.memory_space<vmem>>, %arg4: memref<128x128xbf16, #tpu.memory_space<vmem>>, %arg5: memref<128x512xbf16, #tpu.memory_space<vmem>>, %arg6: memref<128x128xbf16, #tpu.memory_space<vmem>>, %arg7: memref<1x128xf32, #tpu.memory_space<vmem>>, %arg8: memref<1x1x128xf32, #tpu.memory_space<vmem>>, %arg9: memref<256x384xbf16, #tpu.memory_space<vmem>>, %arg10: memref<1x384xf32, #tpu.memory_space<vmem>>, %arg11: memref<1x384xf32, #tpu.memory_space<vmem>>, %arg12: memref<128x128xbf16, #tpu.memory_space<vmem>>, %arg13: memref<1x128xf32, #tpu.memory_space<vmem>>, %arg14: memref<5x8x128xf32, #tpu.memory_space<vmem>>) attributes {dimension_semantics = [], scalar_prefetch = 0 : i64, scratch_operands = 0 : i64, tpu.core_type = #tpu.core_type<tc>} {
    %c0 = arith.constant 0 : index
    %c0_0 = arith.constant 0 : index
    %0 = vector.load %arg10[%c0, %c0_0] : memref<1x384xf32, #tpu.memory_space<vmem>>, vector<1x384xf32>
    %1 = vector.shape_cast %0 : vector<1x384xf32> to vector<1x384xf32>
    %2 = vector.broadcast %1 : vector<1x384xf32> to vector<8x384xf32>
    %c0_1 = arith.constant 0 : index
    %c0_2 = arith.constant 0 : index
    %3 = vector.load %arg11[%c0_1, %c0_2] : memref<1x384xf32, #tpu.memory_space<vmem>>, vector<1x384xf32>
    %4 = vector.shape_cast %3 : vector<1x384xf32> to vector<1x384xf32>
    %5 = vector.broadcast %4 : vector<1x384xf32> to vector<8x384xf32>
    %c0_3 = arith.constant 0 : index
    %c0_4 = arith.constant 0 : index
    %6 = vector.load %arg13[%c0_3, %c0_4] : memref<1x128xf32, #tpu.memory_space<vmem>>, vector<1x128xf32>
    %7 = vector.shape_cast %6 : vector<1x128xf32> to vector<1x128xf32>
    %8 = vector.broadcast %7 : vector<1x128xf32> to vector<8x128xf32>
    %c0_5 = arith.constant 0 : index
    %c0_6 = arith.constant 0 : index
    %9 = vector.load %arg3[%c0_5, %c0_6] : memref<8x128xf32, #tpu.memory_space<vmem>>, vector<8x128xf32>
    %c1 = arith.constant 1 : index
    %c0_7 = arith.constant 0 : index
    %10 = vector.load %arg4[%c1, %c0_7] : memref<128x128xbf16, #tpu.memory_space<vmem>>, vector<1x128xbf16>
    %11 = vector.shape_cast %10 : vector<1x128xbf16> to vector<1x128xbf16>
    %12 = vector.broadcast %11 : vector<1x128xbf16> to vector<8x128xbf16>
    %13 = arith.truncf %9 : vector<8x128xf32> to vector<8x128xbf16>
    %c0_8 = arith.constant 0 : index
    %c0_9 = arith.constant 0 : index
    %14 = vector.load %arg5[%c0_8, %c0_9] : memref<128x512xbf16, #tpu.memory_space<vmem>>, vector<128x512xbf16>
    %cst = arith.constant dense<0.000000e+00> : vector<8x512xf32>
    %15 = tpu.matmul %13, %14, %cst {dimension_numbers = #tpu.dot_dimension_numbers<[1], [0], [0], [1], [0, 0, 1, 1], [], []>} : vector<8x128xbf16>, vector<128x512xbf16>, vector<8x512xf32> -> vector<8x512xf32>
    %c0_10 = arith.constant 0 : index
    %c0_11 = arith.constant 0 : index
    %c0_12 = arith.constant 0 : index
    %16 = vector.load %arg1[%c0_10, %c0_11, %c0_12] : memref<8x8x128xbf16, #tpu.memory_space<vmem>>, vector<8x8x128xbf16>
    %17 = vector.extract_strided_slice %15 {offsets = [0, 0], sizes = [8, 128], strides = [1, 1]} : vector<8x512xf32> to vector<8x128xf32>
    %18 = vector.shape_cast %17 : vector<8x128xf32> to vector<8x1x128xf32>
    %19 = arith.extf %16 : vector<8x8x128xbf16> to vector<8x8x128xf32>
    %20 = vector.broadcast %18 : vector<8x1x128xf32> to vector<8x8x128xf32>
    %21 = arith.addf %19, %20 : vector<8x8x128xf32>
    %cst_13 = arith.constant 0.000000e+00 : f32
    %22 = vector.broadcast %cst_13 : f32 to vector<8x8x128xf32>
    %23 = arith.maximumf %21, %22 : vector<8x8x128xf32>
    %24 = arith.truncf %23 : vector<8x8x128xf32> to vector<8x8x128xbf16>
    %c0_14 = arith.constant 0 : index
    %c0_15 = arith.constant 0 : index
    %25 = vector.load %arg6[%c0_14, %c0_15] : memref<128x128xbf16, #tpu.memory_space<vmem>>, vector<128x128xbf16>
    %cst_16 = arith.constant dense<0.000000e+00> : vector<8x8x128xf32>
    %26 = tpu.matmul %24, %25, %cst_16 {dimension_numbers = #tpu.dot_dimension_numbers<[2], [0], [0, 1], [1], [0, 0, 0, 1, 1, 1], [], []>} : vector<8x8x128xbf16>, vector<128x128xbf16>, vector<8x8x128xf32> -> vector<8x8x128xf32>
    %c0_17 = arith.constant 0 : index
    %c0_18 = arith.constant 0 : index
    %27 = vector.load %arg7[%c0_17, %c0_18] : memref<1x128xf32, #tpu.memory_space<vmem>>, vector<1x128xf32>
    %28 = vector.shape_cast %27 : vector<1x128xf32> to vector<1x1x128xf32>
    %29 = vector.broadcast %28 : vector<1x1x128xf32> to vector<8x8x128xf32>
    %30 = arith.addf %26, %29 : vector<8x8x128xf32>
    %cst_19 = arith.constant 0.000000e+00 : f32
    %31 = vector.broadcast %cst_19 : f32 to vector<8x8x128xf32>
    %32 = arith.maximumf %30, %31 : vector<8x8x128xf32>
    %c0_20 = arith.constant 0 : index
    %c0_21 = arith.constant 0 : index
    %c0_22 = arith.constant 0 : index
    %33 = vector.load %arg8[%c0_20, %c0_21, %c0_22] : memref<1x1x128xf32, #tpu.memory_space<vmem>>, vector<1x1x128xf32>
    %34 = vector.broadcast %33 : vector<1x1x128xf32> to vector<8x8x128xf32>
    %35 = arith.mulf %32, %34 : vector<8x8x128xf32>
    %cst_23 = arith.constant dense<0.000000e+00> : vector<8x8xf32>
    %36 = vector.multi_reduction <add>, %35, %cst_23 [2] : vector<8x8x128xf32> to vector<8x8xf32>
    %37 = vector.shape_cast %36 : vector<8x8xf32> to vector<8x8x1xf32>
    %cst_24 = arith.constant dense<0xFF800000> : vector<8x1xf32>
    %38 = vector.multi_reduction <maximumf>, %37, %cst_24 [1] : vector<8x8x1xf32> to vector<8x1xf32>
    %39 = vector.shape_cast %38 : vector<8x1xf32> to vector<8x1x1xf32>
    %40 = vector.broadcast %39 : vector<8x1x1xf32> to vector<8x8x1xf32>
    %41 = arith.subf %37, %40 : vector<8x8x1xf32>
    %42 = math.exp %41 : vector<8x8x1xf32>
    %cst_25 = arith.constant dense<0.000000e+00> : vector<8x1xf32>
    %43 = vector.multi_reduction <add>, %42, %cst_25 [1] : vector<8x8x1xf32> to vector<8x1xf32>
    %44 = vector.shape_cast %43 : vector<8x1xf32> to vector<8x1x1xf32>
    %45 = vector.broadcast %44 : vector<8x1x1xf32> to vector<8x8x1xf32>
    %46 = arith.divf %42, %45 : vector<8x8x1xf32>
    %c0_26 = arith.constant 0 : index
    %c0_27 = arith.constant 0 : index
    %c0_28 = arith.constant 0 : index
    %47 = vector.load %arg2[%c0_26, %c0_27, %c0_28] : memref<8x8x128xbf16, #tpu.memory_space<vmem>>, vector<8x8x128xbf16>
    %48 = arith.extf %47 : vector<8x8x128xbf16> to vector<8x8x128xf32>
    %49 = vector.broadcast %46 : vector<8x8x1xf32> to vector<8x8x128xf32>
    %50 = arith.mulf %49, %48 : vector<8x8x128xf32>
    %cst_29 = arith.constant dense<0.000000e+00> : vector<8x128xf32>
    %51 = vector.multi_reduction <add>, %50, %cst_29 [1] : vector<8x8x128xf32> to vector<8x128xf32>
    %52 = arith.truncf %51 : vector<8x128xf32> to vector<8x128xbf16>
    %53 = tpu.concatenate %12, %52 in 1 : vector<8x128xbf16>, vector<8x128xbf16> -> vector<8x256xbf16>
    %c0_30 = arith.constant 0 : index
    %c0_31 = arith.constant 0 : index
    %54 = vector.load %arg9[%c0_30, %c0_31] : memref<256x384xbf16, #tpu.memory_space<vmem>>, vector<256x384xbf16>
    %cst_32 = arith.constant dense<0.000000e+00> : vector<8x384xf32>
    %55 = tpu.matmul %53, %54, %cst_32 {dimension_numbers = #tpu.dot_dimension_numbers<[1], [0], [0], [1], [0, 0, 1, 1], [], []>} : vector<8x256xbf16>, vector<256x384xbf16>, vector<8x384xf32> -> vector<8x384xf32>
    %56 = arith.addf %55, %2 : vector<8x384xf32>
    %57 = vector.extract_strided_slice %15 {offsets = [0, 128], sizes = [8, 384], strides = [1, 1]} : vector<8x512xf32> to vector<8x384xf32>
    %58 = arith.addf %57, %5 : vector<8x384xf32>
    %59 = vector.extract_strided_slice %56 {offsets = [0, 0], sizes = [8, 128], strides = [1, 1]} : vector<8x384xf32> to vector<8x128xf32>
    %60 = vector.extract_strided_slice %58 {offsets = [0, 0], sizes = [8, 128], strides = [1, 1]} : vector<8x384xf32> to vector<8x128xf32>
    %61 = arith.addf %59, %60 : vector<8x128xf32>
    %62 = arith.negf %61 : vector<8x128xf32>
    %63 = math.exp %62 : vector<8x128xf32>
    %cst_33 = arith.constant 1.000000e+00 : f32
    %64 = vector.broadcast %cst_33 : f32 to vector<8x128xf32>
    %65 = arith.addf %64, %63 : vector<8x128xf32>
    %66 = arith.divf %64, %65 : vector<8x128xf32>
    %67 = vector.extract_strided_slice %56 {offsets = [0, 128], sizes = [8, 128], strides = [1, 1]} : vector<8x384xf32> to vector<8x128xf32>
    %68 = vector.extract_strided_slice %58 {offsets = [0, 128], sizes = [8, 128], strides = [1, 1]} : vector<8x384xf32> to vector<8x128xf32>
    %69 = arith.addf %67, %68 : vector<8x128xf32>
    %70 = arith.negf %69 : vector<8x128xf32>
    %71 = math.exp %70 : vector<8x128xf32>
    %cst_34 = arith.constant 1.000000e+00 : f32
    %72 = vector.broadcast %cst_34 : f32 to vector<8x128xf32>
    %73 = arith.addf %72, %71 : vector<8x128xf32>
    %74 = arith.divf %72, %73 : vector<8x128xf32>
    %75 = vector.extract_strided_slice %56 {offsets = [0, 256], sizes = [8, 128], strides = [1, 1]} : vector<8x384xf32> to vector<8x128xf32>
    %76 = vector.extract_strided_slice %58 {offsets = [0, 256], sizes = [8, 128], strides = [1, 1]} : vector<8x384xf32> to vector<8x128xf32>
    %77 = arith.mulf %66, %76 : vector<8x128xf32>
    %78 = arith.addf %75, %77 : vector<8x128xf32>
    %79 = math.tanh %78 : vector<8x128xf32>
    %cst_35 = arith.constant 1.000000e+00 : f32
    %80 = vector.broadcast %cst_35 : f32 to vector<8x128xf32>
    %81 = arith.subf %80, %74 : vector<8x128xf32>
    %82 = arith.mulf %81, %79 : vector<8x128xf32>
    %83 = arith.mulf %74, %9 : vector<8x128xf32>
    %84 = arith.addf %82, %83 : vector<8x128xf32>
    %85 = arith.truncf %84 : vector<8x128xf32> to vector<8x128xbf16>
    %c0_36 = arith.constant 0 : index
    %c0_37 = arith.constant 0 : index
    %86 = vector.load %arg12[%c0_36, %c0_37] : memref<128x128xbf16, #tpu.memory_space<vmem>>, vector<128x128xbf16>
    %cst_38 = arith.constant dense<0.000000e+00> : vector<8x128xf32>
    %87 = tpu.matmul %85, %86, %cst_38 {dimension_numbers = #tpu.dot_dimension_numbers<[1], [0], [0], [1], [0, 0, 1, 1], [], []>} : vector<8x128xbf16>, vector<128x128xbf16>, vector<8x128xf32> -> vector<8x128xf32>
    %88 = arith.addf %87, %8 : vector<8x128xf32>
    %c0_39 = arith.constant 0 : index
    %c0_40 = arith.constant 0 : index
    %c0_41 = arith.constant 0 : index
    %89 = vector.load %arg14[%c0_39, %c0_40, %c0_41] : memref<5x8x128xf32, #tpu.memory_space<vmem>>, vector<1x8x128xf32>
    %90 = vector.shape_cast %89 : vector<1x8x128xf32> to vector<8x128xf32>
    %91 = vector.shape_cast %88 : vector<8x128xf32> to vector<1x8x128xf32>
    tpu.vector_store %arg14[%c0_39, %c0_40, %c0_41], %91 {strides = array<i32>} : memref<5x8x128xf32, #tpu.memory_space<vmem>>, vector<1x8x128xf32>,
    %92 = tpu.reduce_index %88 {axis = 1 : i32, kind = #tpu.reduction_kind<arg_max>} : vector<8x128xf32> -> vector<8xi32>
    %93 = tpu.iota {dimensions = array<i32: 1>} : vector<8x128xi32>
    %94 = vector.shape_cast %92 : vector<8xi32> to vector<8x1xi32>
    %95 = vector.broadcast %94 : vector<8x1xi32> to vector<8x128xi32>
    %96 = arith.cmpi eq, %93, %95 : vector<8x128xi32>
    %cst_42 = arith.constant 1.000000e+00 : f32
    %cst_43 = arith.constant 0.000000e+00 : f32
    %97 = vector.broadcast %cst_42 : f32 to vector<8x128xf32>
    %98 = vector.broadcast %cst_43 : f32 to vector<8x128xf32>
    %99 = arith.select %96, %97, %98 : vector<8x128xi1>, vector<8x128xf32>
    %100 = arith.truncf %99 : vector<8x128xf32> to vector<8x128xbf16>
    %c0_44 = arith.constant 0 : index
    %c0_45 = arith.constant 0 : index
    %101 = vector.load %arg4[%c0_44, %c0_45] : memref<128x128xbf16, #tpu.memory_space<vmem>>, vector<128x128xbf16>
    %cst_46 = arith.constant dense<0.000000e+00> : vector<8x128xf32>
    %102 = tpu.matmul %100, %101, %cst_46 {dimension_numbers = #tpu.dot_dimension_numbers<[1], [0], [0], [1], [0, 0, 1, 1], [], []>} : vector<8x128xbf16>, vector<128x128xbf16>, vector<8x128xf32> -> vector<8x128xf32>
    %103 = arith.truncf %102 : vector<8x128xf32> to vector<8x128xbf16>
    %104 = arith.truncf %84 : vector<8x128xf32> to vector<8x128xbf16>
    %c0_47 = arith.constant 0 : index
    %c0_48 = arith.constant 0 : index
    %105 = vector.load %arg5[%c0_47, %c0_48] : memref<128x512xbf16, #tpu.memory_space<vmem>>, vector<128x512xbf16>
    %cst_49 = arith.constant dense<0.000000e+00> : vector<8x512xf32>
    %106 = tpu.matmul %104, %105, %cst_49 {dimension_numbers = #tpu.dot_dimension_numbers<[1], [0], [0], [1], [0, 0, 1, 1], [], []>} : vector<8x128xbf16>, vector<128x512xbf16>, vector<8x512xf32> -> vector<8x512xf32>
    %c0_50 = arith.constant 0 : index
    %c0_51 = arith.constant 0 : index
    %c0_52 = arith.constant 0 : index
    %107 = vector.load %arg1[%c0_50, %c0_51, %c0_52] : memref<8x8x128xbf16, #tpu.memory_space<vmem>>, vector<8x8x128xbf16>
    %108 = vector.extract_strided_slice %106 {offsets = [0, 0], sizes = [8, 128], strides = [1, 1]} : vector<8x512xf32> to vector<8x128xf32>
    %109 = vector.shape_cast %108 : vector<8x128xf32> to vector<8x1x128xf32>
    %110 = arith.extf %107 : vector<8x8x128xbf16> to vector<8x8x128xf32>
    %111 = vector.broadcast %109 : vector<8x1x128xf32> to vector<8x8x128xf32>
    %112 = arith.addf %110, %111 : vector<8x8x128xf32>
    %cst_53 = arith.constant 0.000000e+00 : f32
    %113 = vector.broadcast %cst_53 : f32 to vector<8x8x128xf32>
    %114 = arith.maximumf %112, %113 : vector<8x8x128xf32>
    %115 = arith.truncf %114 : vector<8x8x128xf32> to vector<8x8x128xbf16>
    %c0_54 = arith.constant 0 : index
    %c0_55 = arith.constant 0 : index
    %116 = vector.load %arg6[%c0_54, %c0_55] : memref<128x128xbf16, #tpu.memory_space<vmem>>, vector<128x128xbf16>
    %cst_56 = arith.constant dense<0.000000e+00> : vector<8x8x128xf32>
    %117 = tpu.matmul %115, %116, %cst_56 {dimension_numbers = #tpu.dot_dimension_numbers<[2], [0], [0, 1], [1], [0, 0, 0, 1, 1, 1], [], []>} : vector<8x8x128xbf16>, vector<128x128xbf16>, vector<8x8x128xf32> -> vector<8x8x128xf32>
    %c0_57 = arith.constant 0 : index
    %c0_58 = arith.constant 0 : index
    %118 = vector.load %arg7[%c0_57, %c0_58] : memref<1x128xf32, #tpu.memory_space<vmem>>, vector<1x128xf32>
    %119 = vector.shape_cast %118 : vector<1x128xf32> to vector<1x1x128xf32>
    %120 = vector.broadcast %119 : vector<1x1x128xf32> to vector<8x8x128xf32>
    %121 = arith.addf %117, %120 : vector<8x8x128xf32>
    %cst_59 = arith.constant 0.000000e+00 : f32
    %122 = vector.broadcast %cst_59 : f32 to vector<8x8x128xf32>
    %123 = arith.maximumf %121, %122 : vector<8x8x128xf32>
    %c0_60 = arith.constant 0 : index
    %c0_61 = arith.constant 0 : index
    %c0_62 = arith.constant 0 : index
    %124 = vector.load %arg8[%c0_60, %c0_61, %c0_62] : memref<1x1x128xf32, #tpu.memory_space<vmem>>, vector<1x1x128xf32>
    %125 = vector.broadcast %124 : vector<1x1x128xf32> to vector<8x8x128xf32>
    %126 = arith.mulf %123, %125 : vector<8x8x128xf32>
    %cst_63 = arith.constant dense<0.000000e+00> : vector<8x8xf32>
    %127 = vector.multi_reduction <add>, %126, %cst_63 [2] : vector<8x8x128xf32> to vector<8x8xf32>
    %128 = vector.shape_cast %127 : vector<8x8xf32> to vector<8x8x1xf32>
    %cst_64 = arith.constant dense<0xFF800000> : vector<8x1xf32>
    %129 = vector.multi_reduction <maximumf>, %128, %cst_64 [1] : vector<8x8x1xf32> to vector<8x1xf32>
    %130 = vector.shape_cast %129 : vector<8x1xf32> to vector<8x1x1xf32>
    %131 = vector.broadcast %130 : vector<8x1x1xf32> to vector<8x8x1xf32>
    %132 = arith.subf %128, %131 : vector<8x8x1xf32>
    %133 = math.exp %132 : vector<8x8x1xf32>
    %cst_65 = arith.constant dense<0.000000e+00> : vector<8x1xf32>
    %134 = vector.multi_reduction <add>, %133, %cst_65 [1] : vector<8x8x1xf32> to vector<8x1xf32>
    %135 = vector.shape_cast %134 : vector<8x1xf32> to vector<8x1x1xf32>
    %136 = vector.broadcast %135 : vector<8x1x1xf32> to vector<8x8x1xf32>
    %137 = arith.divf %133, %136 : vector<8x8x1xf32>
    %c0_66 = arith.constant 0 : index
    %c0_67 = arith.constant 0 : index
    %c0_68 = arith.constant 0 : index
    %138 = vector.load %arg2[%c0_66, %c0_67, %c0_68] : memref<8x8x128xbf16, #tpu.memory_space<vmem>>, vector<8x8x128xbf16>
    %139 = arith.extf %138 : vector<8x8x128xbf16> to vector<8x8x128xf32>
    %140 = vector.broadcast %137 : vector<8x8x1xf32> to vector<8x8x128xf32>
    %141 = arith.mulf %140, %139 : vector<8x8x128xf32>
    %cst_69 = arith.constant dense<0.000000e+00> : vector<8x128xf32>
    %142 = vector.multi_reduction <add>, %141, %cst_69 [1] : vector<8x8x128xf32> to vector<8x128xf32>
    %143 = arith.truncf %142 : vector<8x128xf32> to vector<8x128xbf16>
    %144 = tpu.concatenate %103, %143 in 1 : vector<8x128xbf16>, vector<8x128xbf16> -> vector<8x256xbf16>
    %c0_70 = arith.constant 0 : index
    %c0_71 = arith.constant 0 : index
    %145 = vector.load %arg9[%c0_70, %c0_71] : memref<256x384xbf16, #tpu.memory_space<vmem>>, vector<256x384xbf16>
    %cst_72 = arith.constant dense<0.000000e+00> : vector<8x384xf32>
    %146 = tpu.matmul %144, %145, %cst_72 {dimension_numbers = #tpu.dot_dimension_numbers<[1], [0], [0], [1], [0, 0, 1, 1], [], []>} : vector<8x256xbf16>, vector<256x384xbf16>, vector<8x384xf32> -> vector<8x384xf32>
    %147 = arith.addf %146, %2 : vector<8x384xf32>
    %148 = vector.extract_strided_slice %106 {offsets = [0, 128], sizes = [8, 384], strides = [1, 1]} : vector<8x512xf32> to vector<8x384xf32>
    %149 = arith.addf %148, %5 : vector<8x384xf32>
    %150 = vector.extract_strided_slice %147 {offsets = [0, 0], sizes = [8, 128], strides = [1, 1]} : vector<8x384xf32> to vector<8x128xf32>
    %151 = vector.extract_strided_slice %149 {offsets = [0, 0], sizes = [8, 128], strides = [1, 1]} : vector<8x384xf32> to vector<8x128xf32>
    %152 = arith.addf %150, %151 : vector<8x128xf32>
    %153 = arith.negf %152 : vector<8x128xf32>
    %154 = math.exp %153 : vector<8x128xf32>
    %cst_73 = arith.constant 1.000000e+00 : f32
    %155 = vector.broadcast %cst_73 : f32 to vector<8x128xf32>
    %156 = arith.addf %155, %154 : vector<8x128xf32>
    %157 = arith.divf %155, %156 : vector<8x128xf32>
    %158 = vector.extract_strided_slice %147 {offsets = [0, 128], sizes = [8, 128], strides = [1, 1]} : vector<8x384xf32> to vector<8x128xf32>
    %159 = vector.extract_strided_slice %149 {offsets = [0, 128], sizes = [8, 128], strides = [1, 1]} : vector<8x384xf32> to vector<8x128xf32>
    %160 = arith.addf %158, %159 : vector<8x128xf32>
    %161 = arith.negf %160 : vector<8x128xf32>
    %162 = math.exp %161 : vector<8x128xf32>
    %cst_74 = arith.constant 1.000000e+00 : f32
    %163 = vector.broadcast %cst_74 : f32 to vector<8x128xf32>
    %164 = arith.addf %163, %162 : vector<8x128xf32>
    %165 = arith.divf %163, %164 : vector<8x128xf32>
    %166 = vector.extract_strided_slice %147 {offsets = [0, 256], sizes = [8, 128], strides = [1, 1]} : vector<8x384xf32> to vector<8x128xf32>
    %167 = vector.extract_strided_slice %149 {offsets = [0, 256], sizes = [8, 128], strides = [1, 1]} : vector<8x384xf32> to vector<8x128xf32>
    %168 = arith.mulf %157, %167 : vector<8x128xf32>
    %169 = arith.addf %166, %168 : vector<8x128xf32>
    %170 = math.tanh %169 : vector<8x128xf32>
    %cst_75 = arith.constant 1.000000e+00 : f32
    %171 = vector.broadcast %cst_75 : f32 to vector<8x128xf32>
    %172 = arith.subf %171, %165 : vector<8x128xf32>
    %173 = arith.mulf %172, %170 : vector<8x128xf32>
    %174 = arith.mulf %165, %84 : vector<8x128xf32>
    %175 = arith.addf %173, %174 : vector<8x128xf32>
    %176 = arith.truncf %175 : vector<8x128xf32> to vector<8x128xbf16>
    %c0_76 = arith.constant 0 : index
    %c0_77 = arith.constant 0 : index
    %177 = vector.load %arg12[%c0_76, %c0_77] : memref<128x128xbf16, #tpu.memory_space<vmem>>, vector<128x128xbf16>
    %cst_78 = arith.constant dense<0.000000e+00> : vector<8x128xf32>
    %178 = tpu.matmul %176, %177, %cst_78 {dimension_numbers = #tpu.dot_dimension_numbers<[1], [0], [0], [1], [0, 0, 1, 1], [], []>} : vector<8x128xbf16>, vector<128x128xbf16>, vector<8x128xf32> -> vector<8x128xf32>
    %179 = arith.addf %178, %8 : vector<8x128xf32>
    %c1_79 = arith.constant 1 : index
    %c0_80 = arith.constant 0 : index
    %c0_81 = arith.constant 0 : index
    %180 = vector.load %arg14[%c1_79, %c0_80, %c0_81] : memref<5x8x128xf32, #tpu.memory_space<vmem>>, vector<1x8x128xf32>
    %181 = vector.shape_cast %180 : vector<1x8x128xf32> to vector<8x128xf32>
    %182 = vector.shape_cast %179 : vector<8x128xf32> to vector<1x8x128xf32>
    tpu.vector_store %arg14[%c1_79, %c0_80, %c0_81], %182 {strides = array<i32>} : memref<5x8x128xf32, #tpu.memory_space<vmem>>, vector<1x8x128xf32>,
    %c2 = arith.constant 2 : index
    %c0_82 = arith.constant 0 : index
    %c0_83 = arith.constant 0 : index
    %183 = vector.load %arg0[%c2, %c0_82, %c0_83] : memref<5x8x128xbf16, #tpu.memory_space<vmem>>, vector<1x8x128xbf16>
    %184 = vector.shape_cast %183 : vector<1x8x128xbf16> to vector<8x128xbf16>
    %185 = arith.truncf %175 : vector<8x128xf32> to vector<8x128xbf16>
    %c0_84 = arith.constant 0 : index
    %c0_85 = arith.constant 0 : index
    %186 = vector.load %arg5[%c0_84, %c0_85] : memref<128x512xbf16, #tpu.memory_space<vmem>>, vector<128x512xbf16>
    %cst_86 = arith.constant dense<0.000000e+00> : vector<8x512xf32>
    %187 = tpu.matmul %185, %186, %cst_86 {dimension_numbers = #tpu.dot_dimension_numbers<[1], [0], [0], [1], [0, 0, 1, 1], [], []>} : vector<8x128xbf16>, vector<128x512xbf16>, vector<8x512xf32> -> vector<8x512xf32>
    %c0_87 = arith.constant 0 : index
    %c0_88 = arith.constant 0 : index
    %c0_89 = arith.constant 0 : index
    %188 = vector.load %arg1[%c0_87, %c0_88, %c0_89] : memref<8x8x128xbf16, #tpu.memory_space<vmem>>, vector<8x8x128xbf16>
    %189 = vector.extract_strided_slice %187 {offsets = [0, 0], sizes = [8, 128], strides = [1, 1]} : vector<8x512xf32> to vector<8x128xf32>
    %190 = vector.shape_cast %189 : vector<8x128xf32> to vector<8x1x128xf32>
    %191 = arith.extf %188 : vector<8x8x128xbf16> to vector<8x8x128xf32>
    %192 = vector.broadcast %190 : vector<8x1x128xf32> to vector<8x8x128xf32>
    %193 = arith.addf %191, %192 : vector<8x8x128xf32>
    %cst_90 = arith.constant 0.000000e+00 : f32
    %194 = vector.broadcast %cst_90 : f32 to vector<8x8x128xf32>
    %195 = arith.maximumf %193, %194 : vector<8x8x128xf32>
    %196 = arith.truncf %195 : vector<8x8x128xf32> to vector<8x8x128xbf16>
    %c0_91 = arith.constant 0 : index
    %c0_92 = arith.constant 0 : index
    %197 = vector.load %arg6[%c0_91, %c0_92] : memref<128x128xbf16, #tpu.memory_space<vmem>>, vector<128x128xbf16>
    %cst_93 = arith.constant dense<0.000000e+00> : vector<8x8x128xf32>
    %198 = tpu.matmul %196, %197, %cst_93 {dimension_numbers = #tpu.dot_dimension_numbers<[2], [0], [0, 1], [1], [0, 0, 0, 1, 1, 1], [], []>} : vector<8x8x128xbf16>, vector<128x128xbf16>, vector<8x8x128xf32> -> vector<8x8x128xf32>
    %c0_94 = arith.constant 0 : index
    %c0_95 = arith.constant 0 : index
    %199 = vector.load %arg7[%c0_94, %c0_95] : memref<1x128xf32, #tpu.memory_space<vmem>>, vector<1x128xf32>
    %200 = vector.shape_cast %199 : vector<1x128xf32> to vector<1x1x128xf32>
    %201 = vector.broadcast %200 : vector<1x1x128xf32> to vector<8x8x128xf32>
    %202 = arith.addf %198, %201 : vector<8x8x128xf32>
    %cst_96 = arith.constant 0.000000e+00 : f32
    %203 = vector.broadcast %cst_96 : f32 to vector<8x8x128xf32>
    %204 = arith.maximumf %202, %203 : vector<8x8x128xf32>
    %c0_97 = arith.constant 0 : index
    %c0_98 = arith.constant 0 : index
    %c0_99 = arith.constant 0 : index
    %205 = vector.load %arg8[%c0_97, %c0_98, %c0_99] : memref<1x1x128xf32, #tpu.memory_space<vmem>>, vector<1x1x128xf32>
    %206 = vector.broadcast %205 : vector<1x1x128xf32> to vector<8x8x128xf32>
    %207 = arith.mulf %204, %206 : vector<8x8x128xf32>
    %cst_100 = arith.constant dense<0.000000e+00> : vector<8x8xf32>
    %208 = vector.multi_reduction <add>, %207, %cst_100 [2] : vector<8x8x128xf32> to vector<8x8xf32>
    %209 = vector.shape_cast %208 : vector<8x8xf32> to vector<8x8x1xf32>
    %cst_101 = arith.constant dense<0xFF800000> : vector<8x1xf32>
    %210 = vector.multi_reduction <maximumf>, %209, %cst_101 [1] : vector<8x8x1xf32> to vector<8x1xf32>
    %211 = vector.shape_cast %210 : vector<8x1xf32> to vector<8x1x1xf32>
    %212 = vector.broadcast %211 : vector<8x1x1xf32> to vector<8x8x1xf32>
    %213 = arith.subf %209, %212 : vector<8x8x1xf32>
    %214 = math.exp %213 : vector<8x8x1xf32>
    %cst_102 = arith.constant dense<0.000000e+00> : vector<8x1xf32>
    %215 = vector.multi_reduction <add>, %214, %cst_102 [1] : vector<8x8x1xf32> to vector<8x1xf32>
    %216 = vector.shape_cast %215 : vector<8x1xf32> to vector<8x1x1xf32>
    %217 = vector.broadcast %216 : vector<8x1x1xf32> to vector<8x8x1xf32>
    %218 = arith.divf %214, %217 : vector<8x8x1xf32>
    %c0_103 = arith.constant 0 : index
    %c0_104 = arith.constant 0 : index
    %c0_105 = arith.constant 0 : index
    %219 = vector.load %arg2[%c0_103, %c0_104, %c0_105] : memref<8x8x128xbf16, #tpu.memory_space<vmem>>, vector<8x8x128xbf16>
    %220 = arith.extf %219 : vector<8x8x128xbf16> to vector<8x8x128xf32>
    %221 = vector.broadcast %218 : vector<8x8x1xf32> to vector<8x8x128xf32>
    %222 = arith.mulf %221, %220 : vector<8x8x128xf32>
    %cst_106 = arith.constant dense<0.000000e+00> : vector<8x128xf32>
    %223 = vector.multi_reduction <add>, %222, %cst_106 [1] : vector<8x8x128xf32> to vector<8x128xf32>
    %224 = arith.truncf %223 : vector<8x128xf32> to vector<8x128xbf16>
    %225 = tpu.concatenate %184, %224 in 1 : vector<8x128xbf16>, vector<8x128xbf16> -> vector<8x256xbf16>
    %c0_107 = arith.constant 0 : index
    %c0_108 = arith.constant 0 : index
    %226 = vector.load %arg9[%c0_107, %c0_108] : memref<256x384xbf16, #tpu.memory_space<vmem>>, vector<256x384xbf16>
    %cst_109 = arith.constant dense<0.000000e+00> : vector<8x384xf32>
    %227 = tpu.matmul %225, %226, %cst_109 {dimension_numbers = #tpu.dot_dimension_numbers<[1], [0], [0], [1], [0, 0, 1, 1], [], []>} : vector<8x256xbf16>, vector<256x384xbf16>, vector<8x384xf32> -> vector<8x384xf32>
    %228 = arith.addf %227, %2 : vector<8x384xf32>
    %229 = vector.extract_strided_slice %187 {offsets = [0, 128], sizes = [8, 384], strides = [1, 1]} : vector<8x512xf32> to vector<8x384xf32>
    %230 = arith.addf %229, %5 : vector<8x384xf32>
    %231 = vector.extract_strided_slice %228 {offsets = [0, 0], sizes = [8, 128], strides = [1, 1]} : vector<8x384xf32> to vector<8x128xf32>
    %232 = vector.extract_strided_slice %230 {offsets = [0, 0], sizes = [8, 128], strides = [1, 1]} : vector<8x384xf32> to vector<8x128xf32>
    %233 = arith.addf %231, %232 : vector<8x128xf32>
    %234 = arith.negf %233 : vector<8x128xf32>
    %235 = math.exp %234 : vector<8x128xf32>
    %cst_110 = arith.constant 1.000000e+00 : f32
    %236 = vector.broadcast %cst_110 : f32 to vector<8x128xf32>
    %237 = arith.addf %236, %235 : vector<8x128xf32>
    %238 = arith.divf %236, %237 : vector<8x128xf32>
    %239 = vector.extract_strided_slice %228 {offsets = [0, 128], sizes = [8, 128], strides = [1, 1]} : vector<8x384xf32> to vector<8x128xf32>
    %240 = vector.extract_strided_slice %230 {offsets = [0, 128], sizes = [8, 128], strides = [1, 1]} : vector<8x384xf32> to vector<8x128xf32>
    %241 = arith.addf %239, %240 : vector<8x128xf32>
    %242 = arith.negf %241 : vector<8x128xf32>
    %243 = math.exp %242 : vector<8x128xf32>
    %cst_111 = arith.constant 1.000000e+00 : f32
    %244 = vector.broadcast %cst_111 : f32 to vector<8x128xf32>
    %245 = arith.addf %244, %243 : vector<8x128xf32>
    %246 = arith.divf %244, %245 : vector<8x128xf32>
    %247 = vector.extract_strided_slice %228 {offsets = [0, 256], sizes = [8, 128], strides = [1, 1]} : vector<8x384xf32> to vector<8x128xf32>
    %248 = vector.extract_strided_slice %230 {offsets = [0, 256], sizes = [8, 128], strides = [1, 1]} : vector<8x384xf32> to vector<8x128xf32>
    %249 = arith.mulf %238, %248 : vector<8x128xf32>
    %250 = arith.addf %247, %249 : vector<8x128xf32>
    %251 = math.tanh %250 : vector<8x128xf32>
    %cst_112 = arith.constant 1.000000e+00 : f32
    %252 = vector.broadcast %cst_112 : f32 to vector<8x128xf32>
    %253 = arith.subf %252, %246 : vector<8x128xf32>
    %254 = arith.mulf %253, %251 : vector<8x128xf32>
    %255 = arith.mulf %246, %175 : vector<8x128xf32>
    %256 = arith.addf %254, %255 : vector<8x128xf32>
    %257 = arith.truncf %256 : vector<8x128xf32> to vector<8x128xbf16>
    %c0_113 = arith.constant 0 : index
    %c0_114 = arith.constant 0 : index
    %258 = vector.load %arg12[%c0_113, %c0_114] : memref<128x128xbf16, #tpu.memory_space<vmem>>, vector<128x128xbf16>
    %cst_115 = arith.constant dense<0.000000e+00> : vector<8x128xf32>
    %259 = tpu.matmul %257, %258, %cst_115 {dimension_numbers = #tpu.dot_dimension_numbers<[1], [0], [0], [1], [0, 0, 1, 1], [], []>} : vector<8x128xbf16>, vector<128x128xbf16>, vector<8x128xf32> -> vector<8x128xf32>
    %260 = arith.addf %259, %8 : vector<8x128xf32>
    %c2_116 = arith.constant 2 : index
    %c0_117 = arith.constant 0 : index
    %c0_118 = arith.constant 0 : index
    %261 = vector.load %arg14[%c2_116, %c0_117, %c0_118] : memref<5x8x128xf32, #tpu.memory_space<vmem>>, vector<1x8x128xf32>
    %262 = vector.shape_cast %261 : vector<1x8x128xf32> to vector<8x128xf32>
    %263 = vector.shape_cast %260 : vector<8x128xf32> to vector<1x8x128xf32>
    tpu.vector_store %arg14[%c2_116, %c0_117, %c0_118], %263 {strides = array<i32>} : memref<5x8x128xf32, #tpu.memory_space<vmem>>, vector<1x8x128xf32>,
    %c3 = arith.constant 3 : index
    %c0_119 = arith.constant 0 : index
    %c0_120 = arith.constant 0 : index
    %264 = vector.load %arg0[%c3, %c0_119, %c0_120] : memref<5x8x128xbf16, #tpu.memory_space<vmem>>, vector<1x8x128xbf16>
    %265 = vector.shape_cast %264 : vector<1x8x128xbf16> to vector<8x128xbf16>
    %266 = arith.truncf %256 : vector<8x128xf32> to vector<8x128xbf16>
    %c0_121 = arith.constant 0 : index
    %c0_122 = arith.constant 0 : index
    %267 = vector.load %arg5[%c0_121, %c0_122] : memref<128x512xbf16, #tpu.memory_space<vmem>>, vector<128x512xbf16>
    %cst_123 = arith.constant dense<0.000000e+00> : vector<8x512xf32>
    %268 = tpu.matmul %266, %267, %cst_123 {dimension_numbers = #tpu.dot_dimension_numbers<[1], [0], [0], [1], [0, 0, 1, 1], [], []>} : vector<8x128xbf16>, vector<128x512xbf16>, vector<8x512xf32> -> vector<8x512xf32>
    %c0_124 = arith.constant 0 : index
    %c0_125 = arith.constant 0 : index
    %c0_126 = arith.constant 0 : index
    %269 = vector.load %arg1[%c0_124, %c0_125, %c0_126] : memref<8x8x128xbf16, #tpu.memory_space<vmem>>, vector<8x8x128xbf16>
    %270 = vector.extract_strided_slice %268 {offsets = [0, 0], sizes = [8, 128], strides = [1, 1]} : vector<8x512xf32> to vector<8x128xf32>
    %271 = vector.shape_cast %270 : vector<8x128xf32> to vector<8x1x128xf32>
    %272 = arith.extf %269 : vector<8x8x128xbf16> to vector<8x8x128xf32>
    %273 = vector.broadcast %271 : vector<8x1x128xf32> to vector<8x8x128xf32>
    %274 = arith.addf %272, %273 : vector<8x8x128xf32>
    %cst_127 = arith.constant 0.000000e+00 : f32
    %275 = vector.broadcast %cst_127 : f32 to vector<8x8x128xf32>
    %276 = arith.maximumf %274, %275 : vector<8x8x128xf32>
    %277 = arith.truncf %276 : vector<8x8x128xf32> to vector<8x8x128xbf16>
    %c0_128 = arith.constant 0 : index
    %c0_129 = arith.constant 0 : index
    %278 = vector.load %arg6[%c0_128, %c0_129] : memref<128x128xbf16, #tpu.memory_space<vmem>>, vector<128x128xbf16>
    %cst_130 = arith.constant dense<0.000000e+00> : vector<8x8x128xf32>
    %279 = tpu.matmul %277, %278, %cst_130 {dimension_numbers = #tpu.dot_dimension_numbers<[2], [0], [0, 1], [1], [0, 0, 0, 1, 1, 1], [], []>} : vector<8x8x128xbf16>, vector<128x128xbf16>, vector<8x8x128xf32> -> vector<8x8x128xf32>
    %c0_131 = arith.constant 0 : index
    %c0_132 = arith.constant 0 : index
    %280 = vector.load %arg7[%c0_131, %c0_132] : memref<1x128xf32, #tpu.memory_space<vmem>>, vector<1x128xf32>
    %281 = vector.shape_cast %280 : vector<1x128xf32> to vector<1x1x128xf32>
    %282 = vector.broadcast %281 : vector<1x1x128xf32> to vector<8x8x128xf32>
    %283 = arith.addf %279, %282 : vector<8x8x128xf32>
    %cst_133 = arith.constant 0.000000e+00 : f32
    %284 = vector.broadcast %cst_133 : f32 to vector<8x8x128xf32>
    %285 = arith.maximumf %283, %284 : vector<8x8x128xf32>
    %c0_134 = arith.constant 0 : index
    %c0_135 = arith.constant 0 : index
    %c0_136 = arith.constant 0 : index
    %286 = vector.load %arg8[%c0_134, %c0_135, %c0_136] : memref<1x1x128xf32, #tpu.memory_space<vmem>>, vector<1x1x128xf32>
    %287 = vector.broadcast %286 : vector<1x1x128xf32> to vector<8x8x128xf32>
    %288 = arith.mulf %285, %287 : vector<8x8x128xf32>
    %cst_137 = arith.constant dense<0.000000e+00> : vector<8x8xf32>
    %289 = vector.multi_reduction <add>, %288, %cst_137 [2] : vector<8x8x128xf32> to vector<8x8xf32>
    %290 = vector.shape_cast %289 : vector<8x8xf32> to vector<8x8x1xf32>
    %cst_138 = arith.constant dense<0xFF800000> : vector<8x1xf32>
    %291 = vector.multi_reduction <maximumf>, %290, %cst_138 [1] : vector<8x8x1xf32> to vector<8x1xf32>
    %292 = vector.shape_cast %291 : vector<8x1xf32> to vector<8x1x1xf32>
    %293 = vector.broadcast %292 : vector<8x1x1xf32> to vector<8x8x1xf32>
    %294 = arith.subf %290, %293 : vector<8x8x1xf32>
    %295 = math.exp %294 : vector<8x8x1xf32>
    %cst_139 = arith.constant dense<0.000000e+00> : vector<8x1xf32>
    %296 = vector.multi_reduction <add>, %295, %cst_139 [1] : vector<8x8x1xf32> to vector<8x1xf32>
    %297 = vector.shape_cast %296 : vector<8x1xf32> to vector<8x1x1xf32>
    %298 = vector.broadcast %297 : vector<8x1x1xf32> to vector<8x8x1xf32>
    %299 = arith.divf %295, %298 : vector<8x8x1xf32>
    %c0_140 = arith.constant 0 : index
    %c0_141 = arith.constant 0 : index
    %c0_142 = arith.constant 0 : index
    %300 = vector.load %arg2[%c0_140, %c0_141, %c0_142] : memref<8x8x128xbf16, #tpu.memory_space<vmem>>, vector<8x8x128xbf16>
    %301 = arith.extf %300 : vector<8x8x128xbf16> to vector<8x8x128xf32>
    %302 = vector.broadcast %299 : vector<8x8x1xf32> to vector<8x8x128xf32>
    %303 = arith.mulf %302, %301 : vector<8x8x128xf32>
    %cst_143 = arith.constant dense<0.000000e+00> : vector<8x128xf32>
    %304 = vector.multi_reduction <add>, %303, %cst_143 [1] : vector<8x8x128xf32> to vector<8x128xf32>
    %305 = arith.truncf %304 : vector<8x128xf32> to vector<8x128xbf16>
    %306 = tpu.concatenate %265, %305 in 1 : vector<8x128xbf16>, vector<8x128xbf16> -> vector<8x256xbf16>
    %c0_144 = arith.constant 0 : index
    %c0_145 = arith.constant 0 : index
    %307 = vector.load %arg9[%c0_144, %c0_145] : memref<256x384xbf16, #tpu.memory_space<vmem>>, vector<256x384xbf16>
    %cst_146 = arith.constant dense<0.000000e+00> : vector<8x384xf32>
    %308 = tpu.matmul %306, %307, %cst_146 {dimension_numbers = #tpu.dot_dimension_numbers<[1], [0], [0], [1], [0, 0, 1, 1], [], []>} : vector<8x256xbf16>, vector<256x384xbf16>, vector<8x384xf32> -> vector<8x384xf32>
    %309 = arith.addf %308, %2 : vector<8x384xf32>
    %310 = vector.extract_strided_slice %268 {offsets = [0, 128], sizes = [8, 384], strides = [1, 1]} : vector<8x512xf32> to vector<8x384xf32>
    %311 = arith.addf %310, %5 : vector<8x384xf32>
    %312 = vector.extract_strided_slice %309 {offsets = [0, 0], sizes = [8, 128], strides = [1, 1]} : vector<8x384xf32> to vector<8x128xf32>
    %313 = vector.extract_strided_slice %311 {offsets = [0, 0], sizes = [8, 128], strides = [1, 1]} : vector<8x384xf32> to vector<8x128xf32>
    %314 = arith.addf %312, %313 : vector<8x128xf32>
    %315 = arith.negf %314 : vector<8x128xf32>
    %316 = math.exp %315 : vector<8x128xf32>
    %cst_147 = arith.constant 1.000000e+00 : f32
    %317 = vector.broadcast %cst_147 : f32 to vector<8x128xf32>
    %318 = arith.addf %317, %316 : vector<8x128xf32>
    %319 = arith.divf %317, %318 : vector<8x128xf32>
    %320 = vector.extract_strided_slice %309 {offsets = [0, 128], sizes = [8, 128], strides = [1, 1]} : vector<8x384xf32> to vector<8x128xf32>
    %321 = vector.extract_strided_slice %311 {offsets = [0, 128], sizes = [8, 128], strides = [1, 1]} : vector<8x384xf32> to vector<8x128xf32>
    %322 = arith.addf %320, %321 : vector<8x128xf32>
    %323 = arith.negf %322 : vector<8x128xf32>
    %324 = math.exp %323 : vector<8x128xf32>
    %cst_148 = arith.constant 1.000000e+00 : f32
    %325 = vector.broadcast %cst_148 : f32 to vector<8x128xf32>
    %326 = arith.addf %325, %324 : vector<8x128xf32>
    %327 = arith.divf %325, %326 : vector<8x128xf32>
    %328 = vector.extract_strided_slice %309 {offsets = [0, 256], sizes = [8, 128], strides = [1, 1]} : vector<8x384xf32> to vector<8x128xf32>
    %329 = vector.extract_strided_slice %311 {offsets = [0, 256], sizes = [8, 128], strides = [1, 1]} : vector<8x384xf32> to vector<8x128xf32>
    %330 = arith.mulf %319, %329 : vector<8x128xf32>
    %331 = arith.addf %328, %330 : vector<8x128xf32>
    %332 = math.tanh %331 : vector<8x128xf32>
    %cst_149 = arith.constant 1.000000e+00 : f32
    %333 = vector.broadcast %cst_149 : f32 to vector<8x128xf32>
    %334 = arith.subf %333, %327 : vector<8x128xf32>
    %335 = arith.mulf %334, %332 : vector<8x128xf32>
    %336 = arith.mulf %327, %256 : vector<8x128xf32>
    %337 = arith.addf %335, %336 : vector<8x128xf32>
    %338 = arith.truncf %337 : vector<8x128xf32> to vector<8x128xbf16>
    %c0_150 = arith.constant 0 : index
    %c0_151 = arith.constant 0 : index
    %339 = vector.load %arg12[%c0_150, %c0_151] : memref<128x128xbf16, #tpu.memory_space<vmem>>, vector<128x128xbf16>
    %cst_152 = arith.constant dense<0.000000e+00> : vector<8x128xf32>
    %340 = tpu.matmul %338, %339, %cst_152 {dimension_numbers = #tpu.dot_dimension_numbers<[1], [0], [0], [1], [0, 0, 1, 1], [], []>} : vector<8x128xbf16>, vector<128x128xbf16>, vector<8x128xf32> -> vector<8x128xf32>
    %341 = arith.addf %340, %8 : vector<8x128xf32>
    %c3_153 = arith.constant 3 : index
    %c0_154 = arith.constant 0 : index
    %c0_155 = arith.constant 0 : index
    %342 = vector.load %arg14[%c3_153, %c0_154, %c0_155] : memref<5x8x128xf32, #tpu.memory_space<vmem>>, vector<1x8x128xf32>
    %343 = vector.shape_cast %342 : vector<1x8x128xf32> to vector<8x128xf32>
    %344 = vector.shape_cast %341 : vector<8x128xf32> to vector<1x8x128xf32>
    tpu.vector_store %arg14[%c3_153, %c0_154, %c0_155], %344 {strides = array<i32>} : memref<5x8x128xf32, #tpu.memory_space<vmem>>, vector<1x8x128xf32>,
    %c4 = arith.constant 4 : index
    %c0_156 = arith.constant 0 : index
    %c0_157 = arith.constant 0 : index
    %345 = vector.load %arg0[%c4, %c0_156, %c0_157] : memref<5x8x128xbf16, #tpu.memory_space<vmem>>, vector<1x8x128xbf16>
    %346 = vector.shape_cast %345 : vector<1x8x128xbf16> to vector<8x128xbf16>
    %347 = arith.truncf %337 : vector<8x128xf32> to vector<8x128xbf16>
    %c0_158 = arith.constant 0 : index
    %c0_159 = arith.constant 0 : index
    %348 = vector.load %arg5[%c0_158, %c0_159] : memref<128x512xbf16, #tpu.memory_space<vmem>>, vector<128x512xbf16>
    %cst_160 = arith.constant dense<0.000000e+00> : vector<8x512xf32>
    %349 = tpu.matmul %347, %348, %cst_160 {dimension_numbers = #tpu.dot_dimension_numbers<[1], [0], [0], [1], [0, 0, 1, 1], [], []>} : vector<8x128xbf16>, vector<128x512xbf16>, vector<8x512xf32> -> vector<8x512xf32>
    %c0_161 = arith.constant 0 : index
    %c0_162 = arith.constant 0 : index
    %c0_163 = arith.constant 0 : index
    %350 = vector.load %arg1[%c0_161, %c0_162, %c0_163] : memref<8x8x128xbf16, #tpu.memory_space<vmem>>, vector<8x8x128xbf16>
    %351 = vector.extract_strided_slice %349 {offsets = [0, 0], sizes = [8, 128], strides = [1, 1]} : vector<8x512xf32> to vector<8x128xf32>
    %352 = vector.shape_cast %351 : vector<8x128xf32> to vector<8x1x128xf32>
    %353 = arith.extf %350 : vector<8x8x128xbf16> to vector<8x8x128xf32>
    %354 = vector.broadcast %352 : vector<8x1x128xf32> to vector<8x8x128xf32>
    %355 = arith.addf %353, %354 : vector<8x8x128xf32>
    %cst_164 = arith.constant 0.000000e+00 : f32
    %356 = vector.broadcast %cst_164 : f32 to vector<8x8x128xf32>
    %357 = arith.maximumf %355, %356 : vector<8x8x128xf32>
    %358 = arith.truncf %357 : vector<8x8x128xf32> to vector<8x8x128xbf16>
    %c0_165 = arith.constant 0 : index
    %c0_166 = arith.constant 0 : index
    %359 = vector.load %arg6[%c0_165, %c0_166] : memref<128x128xbf16, #tpu.memory_space<vmem>>, vector<128x128xbf16>
    %cst_167 = arith.constant dense<0.000000e+00> : vector<8x8x128xf32>
    %360 = tpu.matmul %358, %359, %cst_167 {dimension_numbers = #tpu.dot_dimension_numbers<[2], [0], [0, 1], [1], [0, 0, 0, 1, 1, 1], [], []>} : vector<8x8x128xbf16>, vector<128x128xbf16>, vector<8x8x128xf32> -> vector<8x8x128xf32>
    %c0_168 = arith.constant 0 : index
    %c0_169 = arith.constant 0 : index
    %361 = vector.load %arg7[%c0_168, %c0_169] : memref<1x128xf32, #tpu.memory_space<vmem>>, vector<1x128xf32>
    %362 = vector.shape_cast %361 : vector<1x128xf32> to vector<1x1x128xf32>
    %363 = vector.broadcast %362 : vector<1x1x128xf32> to vector<8x8x128xf32>
    %364 = arith.addf %360, %363 : vector<8x8x128xf32>
    %cst_170 = arith.constant 0.000000e+00 : f32
    %365 = vector.broadcast %cst_170 : f32 to vector<8x8x128xf32>
    %366 = arith.maximumf %364, %365 : vector<8x8x128xf32>
    %c0_171 = arith.constant 0 : index
    %c0_172 = arith.constant 0 : index
    %c0_173 = arith.constant 0 : index
    %367 = vector.load %arg8[%c0_171, %c0_172, %c0_173] : memref<1x1x128xf32, #tpu.memory_space<vmem>>, vector<1x1x128xf32>
    %368 = vector.broadcast %367 : vector<1x1x128xf32> to vector<8x8x128xf32>
    %369 = arith.mulf %366, %368 : vector<8x8x128xf32>
    %cst_174 = arith.constant dense<0.000000e+00> : vector<8x8xf32>
    %370 = vector.multi_reduction <add>, %369, %cst_174 [2] : vector<8x8x128xf32> to vector<8x8xf32>
    %371 = vector.shape_cast %370 : vector<8x8xf32> to vector<8x8x1xf32>
    %cst_175 = arith.constant dense<0xFF800000> : vector<8x1xf32>
    %372 = vector.multi_reduction <maximumf>, %371, %cst_175 [1] : vector<8x8x1xf32> to vector<8x1xf32>
    %373 = vector.shape_cast %372 : vector<8x1xf32> to vector<8x1x1xf32>
    %374 = vector.broadcast %373 : vector<8x1x1xf32> to vector<8x8x1xf32>
    %375 = arith.subf %371, %374 : vector<8x8x1xf32>
    %376 = math.exp %375 : vector<8x8x1xf32>
    %cst_176 = arith.constant dense<0.000000e+00> : vector<8x1xf32>
    %377 = vector.multi_reduction <add>, %376, %cst_176 [1] : vector<8x8x1xf32> to vector<8x1xf32>
    %378 = vector.shape_cast %377 : vector<8x1xf32> to vector<8x1x1xf32>
    %379 = vector.broadcast %378 : vector<8x1x1xf32> to vector<8x8x1xf32>
    %380 = arith.divf %376, %379 : vector<8x8x1xf32>
    %c0_177 = arith.constant 0 : index
    %c0_178 = arith.constant 0 : index
    %c0_179 = arith.constant 0 : index
    %381 = vector.load %arg2[%c0_177, %c0_178, %c0_179] : memref<8x8x128xbf16, #tpu.memory_space<vmem>>, vector<8x8x128xbf16>
    %382 = arith.extf %381 : vector<8x8x128xbf16> to vector<8x8x128xf32>
    %383 = vector.broadcast %380 : vector<8x8x1xf32> to vector<8x8x128xf32>
    %384 = arith.mulf %383, %382 : vector<8x8x128xf32>
    %cst_180 = arith.constant dense<0.000000e+00> : vector<8x128xf32>
    %385 = vector.multi_reduction <add>, %384, %cst_180 [1] : vector<8x8x128xf32> to vector<8x128xf32>
    %386 = arith.truncf %385 : vector<8x128xf32> to vector<8x128xbf16>
    %387 = tpu.concatenate %346, %386 in 1 : vector<8x128xbf16>, vector<8x128xbf16> -> vector<8x256xbf16>
    %c0_181 = arith.constant 0 : index
    %c0_182 = arith.constant 0 : index
    %388 = vector.load %arg9[%c0_181, %c0_182] : memref<256x384xbf16, #tpu.memory_space<vmem>>, vector<256x384xbf16>
    %cst_183 = arith.constant dense<0.000000e+00> : vector<8x384xf32>
    %389 = tpu.matmul %387, %388, %cst_183 {dimension_numbers = #tpu.dot_dimension_numbers<[1], [0], [0], [1], [0, 0, 1, 1], [], []>} : vector<8x256xbf16>, vector<256x384xbf16>, vector<8x384xf32> -> vector<8x384xf32>
    %390 = arith.addf %389, %2 : vector<8x384xf32>
    %391 = vector.extract_strided_slice %349 {offsets = [0, 128], sizes = [8, 384], strides = [1, 1]} : vector<8x512xf32> to vector<8x384xf32>
    %392 = arith.addf %391, %5 : vector<8x384xf32>
    %393 = vector.extract_strided_slice %390 {offsets = [0, 0], sizes = [8, 128], strides = [1, 1]} : vector<8x384xf32> to vector<8x128xf32>
    %394 = vector.extract_strided_slice %392 {offsets = [0, 0], sizes = [8, 128], strides = [1, 1]} : vector<8x384xf32> to vector<8x128xf32>
    %395 = arith.addf %393, %394 : vector<8x128xf32>
    %396 = arith.negf %395 : vector<8x128xf32>
    %397 = math.exp %396 : vector<8x128xf32>
    %cst_184 = arith.constant 1.000000e+00 : f32
    %398 = vector.broadcast %cst_184 : f32 to vector<8x128xf32>
    %399 = arith.addf %398, %397 : vector<8x128xf32>
    %400 = arith.divf %398, %399 : vector<8x128xf32>
    %401 = vector.extract_strided_slice %390 {offsets = [0, 128], sizes = [8, 128], strides = [1, 1]} : vector<8x384xf32> to vector<8x128xf32>
    %402 = vector.extract_strided_slice %392 {offsets = [0, 128], sizes = [8, 128], strides = [1, 1]} : vector<8x384xf32> to vector<8x128xf32>
    %403 = arith.addf %401, %402 : vector<8x128xf32>
    %404 = arith.negf %403 : vector<8x128xf32>
    %405 = math.exp %404 : vector<8x128xf32>
    %cst_185 = arith.constant 1.000000e+00 : f32
    %406 = vector.broadcast %cst_185 : f32 to vector<8x128xf32>
    %407 = arith.addf %406, %405 : vector<8x128xf32>
    %408 = arith.divf %406, %407 : vector<8x128xf32>
    %409 = vector.extract_strided_slice %390 {offsets = [0, 256], sizes = [8, 128], strides = [1, 1]} : vector<8x384xf32> to vector<8x128xf32>
    %410 = vector.extract_strided_slice %392 {offsets = [0, 256], sizes = [8, 128], strides = [1, 1]} : vector<8x384xf32> to vector<8x128xf32>
    %411 = arith.mulf %400, %410 : vector<8x128xf32>
    %412 = arith.addf %409, %411 : vector<8x128xf32>
    %413 = math.tanh %412 : vector<8x128xf32>
    %cst_186 = arith.constant 1.000000e+00 : f32
    %414 = vector.broadcast %cst_186 : f32 to vector<8x128xf32>
    %415 = arith.subf %414, %408 : vector<8x128xf32>
    %416 = arith.mulf %415, %413 : vector<8x128xf32>
    %417 = arith.mulf %408, %337 : vector<8x128xf32>
    %418 = arith.addf %416, %417 : vector<8x128xf32>
    %419 = arith.truncf %418 : vector<8x128xf32> to vector<8x128xbf16>
    %c0_187 = arith.constant 0 : index
    %c0_188 = arith.constant 0 : index
    %420 = vector.load %arg12[%c0_187, %c0_188] : memref<128x128xbf16, #tpu.memory_space<vmem>>, vector<128x128xbf16>
    %cst_189 = arith.constant dense<0.000000e+00> : vector<8x128xf32>
    %421 = tpu.matmul %419, %420, %cst_189 {dimension_numbers = #tpu.dot_dimension_numbers<[1], [0], [0], [1], [0, 0, 1, 1], [], []>} : vector<8x128xbf16>, vector<128x128xbf16>, vector<8x128xf32> -> vector<8x128xf32>
    %422 = arith.addf %421, %8 : vector<8x128xf32>
    %c4_190 = arith.constant 4 : index
    %c0_191 = arith.constant 0 : index
    %c0_192 = arith.constant 0 : index
    %423 = vector.load %arg14[%c4_190, %c0_191, %c0_192] : memref<5x8x128xf32, #tpu.memory_space<vmem>>, vector<1x8x128xf32>
    %424 = vector.shape_cast %423 : vector<1x8x128xf32> to vector<8x128xf32>
    %425 = vector.shape_cast %422 : vector<8x128xf32> to vector<1x8x128xf32>
    tpu.vector_store %arg14[%c4_190, %c0_191, %c0_192], %425 {strides = array<i32>} : memref<5x8x128xf32, #tpu.memory_space<vmem>>, vector<1x8x128xf32>,
    return
  }
}

</mosaic_0001>

<bundles_post_ra>
// kernel: tpu_custom_call.1
= control target key start
LH: loop header
LB: loop body
LE: loop exit
PB: predicated region body
PF: predicated region fallthrough
CT: control target
= control target key end

     0   :  { %19 = vsyncpa [#allocation3], 0  ;;  %s10343_s0 = inlined_call_operand.hbm [shape: bf16[5,8,128], index: 0, kind: input, shape index: {}]   ;;  %s10344_s1 = inlined_call_operand.hbm [shape: bf16[8,8,128], index: 1, kind: input, shape index: {}]   ;;  %s10345_s2 = inlined_call_operand.hbm [shape: bf16[8,8,128], index: 2, kind: input, shape index: {}]   ;;  %s10346_s3 = inlined_call_operand.vmem [shape: f32[8,128], index: 3, kind: input, shape index: {}]   ;;  %s10347_s4 = inlined_call_operand.hbm [shape: bf16[128,128], index: 4, kind: input, shape index: {}]   ;;  %s10348_s5 = inlined_call_operand.hbm [shape: bf16[128,512], index: 5, kind: input, shape index: {}]   ;;  %s10349_s6 = inlined_call_operand.hbm [shape: bf16[128,128], index: 6, kind: input, shape index: {}]   ;;  %s10350_s7 = inlined_call_operand.vmem [shape: f32[1,128], index: 7, kind: input, shape index: {}]   ;;  %s10351_s8 = inlined_call_operand.vmem [shape: f32[1,1,128], index: 8, kind: input, shape index: {}]   ;;  %s10352_s9 = inlined_call_operand.hbm [shape: bf16[256,384], index: 9, kind: input, shape index: {}]   ;;  %s10353_s10 = inlined_call_operand.vmem [shape: f32[1,384], index: 10, kind: input, shape index: {}]   ;;  %s10354_s11 = inlined_call_operand.vmem [shape: f32[1,384], index: 11, kind: input, shape index: {}]   ;;  %s10355_s12 = inlined_call_operand.hbm [shape: bf16[128,128], index: 12, kind: input, shape index: {}]   ;;  %s10356_s13 = inlined_call_operand.vmem [shape: f32[1,128], index: 13, kind: input, shape index: {}]   ;;  %s10357_s14 = inlined_call_operand.hbm [shape: f32[5,8,128], index: 14, kind: output, shape index: {}]  }
   0x1   :  { %20 = vsyncpa [#allocation6], 0 }
   0x2   :  { %21 = vsyncpa [#allocation9], 0 }
   0x3   :  { %22 = vsyncpa [#allocation12], 0 }
   0x4   :  { %23 = vsyncpa [#allocation15], 0 }
   0x5   :  { %24 = vsyncpa [#allocation4], 0  ;;  %s9535_s29 = smov [#allocation5]   ;;  %s9536_s15 = smov [#allocation8]  }
   0x6   :  { %s42_s30 = sshll.u32 %s9535_s29, 4  ;;  %s68_s16 = sshll.u32 %s9536_s15, 4  ;;  %s43_s30 = int_to_ptr.vmem [resolvable:$true] %s42_s30  ;;  %s9632_s16 = int_to_ptr.vmem [resolvable:$true] %s68_s16 }
   0x7   :  { %s9325_s19 = scalar_lea.hbm %s10344_s1, 512 }
   0x8   :  { %p9326_p0 = scmp.ne.s32.totalorder %s10344_s1, %s9325_s19  ;;  %p9329_p1 = scmp.lt.u32.totalorder %s9325_s19, %s10344_s1 }
   0xa   :  { %p9331_p2 = pnand %p9329_p1, %p9326_p0 }
   0xc   :  { %9334 = shalt.err (!%p9331_p2)
}
   0xd   :  { %s9335_s24 = scalar_lea.vmem %s43_s30, 512  ;;  %p9340_p4 = scmp.lt.s32.totalorder %s43_s30, %s43_s30 }
   0xe   :  { %p9336_p3 = scmp.ne.s32.totalorder %s43_s30, %s9335_s24  ;;  %p9341_p5 = scmp.lt.s32.totalorder %s9335_s24, %s9335_s24 }
  0x10   :  { %p9342_p6 = por %p9341_p5, %p9340_p4 }
  0x12   :  { %p9343_p7 = pnand %p9342_p6, %p9336_p3 }
  0x14   :  { %9346 = shalt.err (!%p9343_p7)
}
  0x15   :  { %s9537_s25 = smov 64   ;;  %s9538_s26 = smov 4  }
  0x16   :  { %48 = dma.hbm_to_vmem [thread:$0]  %s10344_s1, 512, %s43_s30, [#allocation6], %s9537_s25, %s9537_s25, %s9538_s26  }
  0x17   :  { %s9347_s17 = scalar_lea.hbm %s10347_s4, 1024 }
  0x18   :  { %p9348_p8 = scmp.ne.s32.totalorder %s10347_s4, %s9347_s17  ;;  %p9351_p9 = scmp.lt.u32.totalorder %s9347_s17, %s10347_s4 }
  0x1a   :  { %p9353_p10 = pnand %p9351_p9, %p9348_p8 }
  0x1c   :  { %9356 = shalt.err (!%p9353_p10)
}
  0x1d   :  { %s9357_s22 = scalar_lea.vmem %s9632_s16, 1024  ;;  %p9362_p12 = scmp.lt.s32.totalorder %s9632_s16, %s9632_s16 }
  0x1e   :  { %p9358_p11 = scmp.ne.s32.totalorder %s9632_s16, %s9357_s22  ;;  %p9363_p13 = scmp.lt.s32.totalorder %s9357_s22, %s9357_s22 }
  0x20   :  { %p9364_p0 = por %p9363_p13, %p9362_p12 }
  0x22   :  { %p9365_p1 = pnand %p9364_p0, %p9358_p11 }
  0x24   :  { %9368 = shalt.err (!%p9365_p1)
}
  0x25   :  { %74 = dma.hbm_to_vmem [thread:$0]  %s10347_s4, 1024, %s9632_s16, [#allocation9], %s9537_s25, %s9537_s25, %s9538_s26  }
  0x26   :  { %s9539_s23 = smov [#allocation11]   ;;  %s9540_s27 = smov [#allocation2]  }
  0x27   :  { %s92_s24 = sshll.u32 %s9539_s23, 4  ;;  %s30_s28 = sshll.u32 %s9540_s27, 4  ;;  %s93_s24 = int_to_ptr.vmem [resolvable:$true] %s92_s24  ;;  %s9669_s28 = int_to_ptr.vmem [resolvable:$true] %s30_s28 }
  0x28   :  { %s9369_s17 = scalar_lea.hbm %s10349_s6, 1024 }
  0x29   :  { %p9370_p2 = scmp.ne.s32.totalorder %s10349_s6, %s9369_s17  ;;  %p9373_p3 = scmp.lt.u32.totalorder %s9369_s17, %s10349_s6 }
  0x2b   :  { %p9375_p4 = pnand %p9373_p3, %p9370_p2 }
  0x2d   :  { %9378 = shalt.err (!%p9375_p4)
}
  0x2e   :  { %s9379_s4 = scalar_lea.vmem %s93_s24, 1024  ;;  %p9384_p6 = scmp.lt.s32.totalorder %s93_s24, %s93_s24 }
  0x2f   :  { %p9380_p5 = scmp.ne.s32.totalorder %s93_s24, %s9379_s4  ;;  %p9385_p7 = scmp.lt.s32.totalorder %s9379_s4, %s9379_s4 }
  0x31   :  { %p9386_p8 = por %p9385_p7, %p9384_p6 }
  0x33   :  { %p9387_p9 = pnand %p9386_p8, %p9380_p5 }
  0x35   :  { %9390 = shalt.err (!%p9387_p9)
}
  0x36   :  { %98 = dma.hbm_to_vmem [thread:$0]  %s10349_s6, 1024, %s93_s24, [#allocation12], %s9537_s25, %s9537_s25, %s9538_s26  }
  0x37   :  { %s9391_s23 = scalar_lea.hbm %s10343_s0, 320 }
  0x38   :  { %p9392_p10 = scmp.ne.s32.totalorder %s10343_s0, %s9391_s23  ;;  %p9395_p11 = scmp.lt.u32.totalorder %s9391_s23, %s10343_s0 }
  0x3a   :  { %p9397_p12 = pnand %p9395_p11, %p9392_p10 }
  0x3c   :  { %9400 = shalt.err (!%p9397_p12)
}
  0x3d   :  { %s9401_s18 = scalar_lea.vmem %s9669_s28, 320  ;;  %p9406_p0 = scmp.lt.s32.totalorder %s9669_s28, %s9669_s28 }
  0x3e   :  { %p9402_p13 = scmp.ne.s32.totalorder %s9669_s28, %s9401_s18  ;;  %p9407_p1 = scmp.lt.s32.totalorder %s9401_s18, %s9401_s18 }
  0x40   :  { %p9408_p2 = por %p9407_p1, %p9406_p0 }
  0x42   :  { %p9409_p3 = pnand %p9408_p2, %p9402_p13 }
  0x44   :  { %9412 = shalt.err (!%p9409_p3)
}
  0x45   :  { %36 = dma.hbm_to_vmem [thread:$0]  %s10343_s0, 320, %s9669_s28, [#allocation3], %s9537_s25, %s9537_s25, %s9538_s26  }
  0x46   :  { %s9541_s19 = smov [#allocation7]   ;;  %s9542_s21 = smov [#allocation10]  }
  0x47   :  { %s54_s20 = sshll.u32 %s9541_s19, 4  ;;  %s80_s4 = sshll.u32 %s9542_s21, 4  ;;  %s55_s20 = int_to_ptr.vmem [resolvable:$true] %s54_s20  ;;  %s9706_s4 = int_to_ptr.vmem [resolvable:$true] %s80_s4 }
  0x48   :  { %s9413_s1 = scalar_lea.hbm %s10345_s2, 512 }
  0x49   :  { %p9414_p4 = scmp.ne.s32.totalorder %s10345_s2, %s9413_s1  ;;  %p9417_p5 = scmp.lt.u32.totalorder %s9413_s1, %s10345_s2 }
  0x4b   :  { %p9419_p6 = pnand %p9417_p5, %p9414_p4 }
  0x4d   :  { %9422 = shalt.err (!%p9419_p6)
}
  0x4e   :  { %s9423_s0 = scalar_lea.vmem %s55_s20, 512  ;;  %p9428_p8 = scmp.lt.s32.totalorder %s55_s20, %s55_s20 }
  0x4f   :  { %p9424_p7 = scmp.ne.s32.totalorder %s55_s20, %s9423_s0  ;;  %p9429_p9 = scmp.lt.s32.totalorder %s9423_s0, %s9423_s0 }
  0x51   :  { %p9430_p10 = por %p9429_p9, %p9428_p8 }
  0x53   :  { %p9431_p11 = pnand %p9430_p10, %p9424_p7 }
  0x55   :  { %9434 = shalt.err (!%p9431_p11)
}
  0x56   :  { %60 = dma.hbm_to_vmem [thread:$0]  %s10345_s2, 512, %s55_s20, [#allocation6], %s9537_s25, %s9537_s25, %s9538_s26  }
  0x57   :  { %s9435_s6 = scalar_lea.hbm %s10348_s5, 4096 }
  0x58   :  { %p9436_p12 = scmp.ne.s32.totalorder %s10348_s5, %s9435_s6  ;;  %p9439_p13 = scmp.lt.u32.totalorder %s9435_s6, %s10348_s5 }
  0x5a   :  { %p9441_p0 = pnand %p9439_p13, %p9436_p12 }
  0x5c   :  { %9444 = shalt.err (!%p9441_p0)
}
  0x5d   :  { %s9445_s22 = scalar_lea.vmem %s9706_s4, 4096  ;;  %p9450_p2 = scmp.lt.s32.totalorder %s9706_s4, %s9706_s4 }
  0x5e   :  { %p9446_p1 = scmp.ne.s32.totalorder %s9706_s4, %s9445_s22  ;;  %p9451_p3 = scmp.lt.s32.totalorder %s9445_s22, %s9445_s22 }
  0x60   :  { %p9452_p4 = por %p9451_p3, %p9450_p2 }
  0x62   :  { %p9453_p5 = pnand %p9452_p4, %p9446_p1 }
  0x64   :  { %9456 = shalt.err (!%p9453_p5)
}
  0x65   :  { %s9543_s2 = smov 256   ;;  %s9544_s20 = smov 16  }
  0x66   :  { %86 = dma.hbm_to_vmem [thread:$0]  %s10348_s5, 4096, %s9706_s4, [#allocation9], %s9543_s2, %s9543_s2, %s9544_s20  }
  0x67   :  { %s9545_s23 = smov [#allocation13]   ;;  %s9457_s28 = scalar_lea.hbm %s10352_s9, 6144 }
  0x68   :  { %s108_s27 = sshll.u32 %s9545_s23, 4  ;;  %p9458_p6 = scmp.ne.s32.totalorder %s10352_s9, %s9457_s28  ;;  %s109_s27 = int_to_ptr.vmem [resolvable:$true] %s108_s27 }
  0x69   :  { %p9461_p7 = scmp.lt.u32.totalorder %s9457_s28, %s10352_s9 }
  0x6b   :  { %p9463_p8 = pnand %p9461_p7, %p9458_p6 }
  0x6d   :  { %9466 = shalt.err (!%p9463_p8)
}
  0x6e   :  { %s9467_s24 = scalar_lea.vmem %s109_s27, 6144  ;;  %p9472_p10 = scmp.lt.s32.totalorder %s109_s27, %s109_s27 }
  0x6f   :  { %p9468_p9 = scmp.ne.s32.totalorder %s109_s27, %s9467_s24  ;;  %p9473_p11 = scmp.lt.s32.totalorder %s9467_s24, %s9467_s24 }
  0x71   :  { %p9474_p12 = por %p9473_p11, %p9472_p10 }
  0x73   :  { %p9475_p13 = pnand %p9474_p12, %p9468_p9 }
  0x75   :  { %9478 = shalt.err (!%p9475_p13)
}
  0x76   :  { %s9546_s5 = smov 192   ;;  %s9547_s4 = smov 12  }
  0x77   :  { %114 = dma.hbm_to_vmem [thread:$0]  %s10352_s9, 6144, %s109_s27, [#allocation12], %s9546_s5, %s9546_s5, %s9547_s4  }
  0x78   :  { %s9548_s16 = smov [#allocation14]   ;;  %s9479_s1 = scalar_lea.hbm %s10355_s12, 1024 }
  0x79   :  { %s124_s22 = sshll.u32 %s9548_s16, 4  ;;  %p9480_p0 = scmp.ne.s32.totalorder %s10355_s12, %s9479_s1  ;;  %s125_s22 = int_to_ptr.vmem [resolvable:$true] %s124_s22 }
  0x7a   :  { %p9483_p1 = scmp.lt.u32.totalorder %s9479_s1, %s10355_s12 }
  0x7c   :  { %p9485_p2 = pnand %p9483_p1, %p9480_p0 }
  0x7e   :  { %9488 = shalt.err (!%p9485_p2)
}
  0x7f   :  { %s9489_s28 = scalar_lea.vmem %s125_s22, 1024  ;;  %p9494_p4 = scmp.lt.s32.totalorder %s125_s22, %s125_s22 }
  0x80   :  { %p9490_p3 = scmp.ne.s32.totalorder %s125_s22, %s9489_s28  ;;  %p9495_p5 = scmp.lt.s32.totalorder %s9489_s28, %s9489_s28 }
  0x82   :  { %p9496_p6 = por %p9495_p5, %p9494_p4 }
  0x84   :  { %p9497_p7 = pnand %p9496_p6, %p9490_p3 }
  0x86   :  { %9500 = shalt.err (!%p9497_p7)
}
  0x87   :  { %130 = dma.hbm_to_vmem [thread:$0]  %s10355_s12, 1024, %s125_s22, [#allocation15], %s9537_s25, %s9537_s25, %s9538_s26  }
  0x88   :  { %9523 = dma.done.wait [#allocation3], 320  }
  0x89   :  { %9524 = vsyncadd [#allocation3], 4294966976 }
  0x8a   :  { %9525 = dma.done.wait [#allocation6], 1024  }
  0x8b   :  { %9526 = vsyncadd [#allocation6], 4294966272 }
  0x8c   :  { %9527 = dma.done.wait [#allocation9], 5120  }
  0x8d   :  { %9528 = vsyncadd [#allocation9], 4294962176 }
  0x8e   :  { %9529 = dma.done.wait [#allocation12], 7168  }
  0x8f   :  { %9530 = vsyncadd [#allocation12], 4294960128 }
  0x90   :  { %9531 = dma.done.wait [#allocation15], 1024  }
  0x91   :  { %9532 = vsyncadd [#allocation15], 4294966272  ;;  %v9549_v0 = vmov 0   ;;  %v8462_v1 = vld [vmem:[#allocation10 + $0x4] ss:$16 sps:$4 sm:$0xff]   ;;  %v199_v17 = vld [vmem:[%s10346_s3] sm:$0xff]  ;;  %v160_v27 = vlaneseq }
  0x92   :  { %434 = vmatprep.mubr.bf16.mxu0 %v9549_v0  ;;  %475 = vmatprep.mubr.bf16.mxu1 %v9549_v0  ;;  %v8464_v2 = vld [vmem:[#allocation10] ss:$16 sps:$4 sm:$0xff]   ;;  %v8465_v3 = vld [vmem:[#allocation10 + $0x24] ss:$16 sps:$4 sm:$0xff]   ;;  %v9772_v19 = vpack.c.bf16 %v199_v17, %v199_v17  ;;  %v8487_v20 = vld [vmem:[#allocation11 + $0x8] sm:$0xff]   ;;  %vm1045_vm0 = vcmask 1041409  }
  0x93   :  { %402 = vmatprep.subr.bf16.mxu0 %v8462_v1  ;;  %v8467_v4 = vld [vmem:[#allocation10 + $0x20] ss:$16 sps:$4 sm:$0xff]   ;;  %v8468_v5 = vld [vmem:[#allocation10 + $0x44] ss:$16 sps:$4 sm:$0xff]   ;;  %v8489_v22 = vld [vmem:[#allocation11 + $0x18] sm:$0xff]   ;;  %v9776_v30 = vshrl.u32 %v160_v27, 7 }
  0x94   :  { %403 = vmatpush1.bf16.msra.mxu0 %v8464_v2  ;;  %v8470_v6 = vld [vmem:[#allocation10 + $0x40] ss:$16 sps:$4 sm:$0xff]   ;;  %v8471_v7 = vld [vmem:[#allocation10 + $0x64] ss:$16 sps:$4 sm:$0xff]   ;;  %v8491_v24 = vld [vmem:[#allocation11 + $0x28] sm:$0xff]   ;;  %vm1047_vm1 = vcmask 1042434  }
  0x95   :  { %404 = vmatprep.subr.bf16.mxu0 %v8465_v3  ;;  %v8473_v8 = vld [vmem:[#allocation10 + $0x60] ss:$16 sps:$4 sm:$0xff]   ;;  %v8474_v9 = vld [vmem:[#allocation10 + $0x84] ss:$16 sps:$4 sm:$0xff]   ;;  %v8493_v26 = vld [vmem:[#allocation11 + $0x38] sm:$0xff]   ;;  %v9787_v45 = vsub.s32 0, %v9776_v30 }
  0x96   :  { %v8476_v10 = vld [vmem:[#allocation10 + $0x80] ss:$16 sps:$4 sm:$0xff]   ;;  %v8477_v11 = vld [vmem:[#allocation10 + $0xa4] ss:$16 sps:$4 sm:$0xff]   ;;  %v9550_v28 = vmov 1966171168  }
  0x97   :  { %v8479_v12 = vld [vmem:[#allocation10 + $0xa0] ss:$16 sps:$4 sm:$0xff]   ;;  %v8480_v13 = vld [vmem:[#allocation10 + $0xc4] ss:$16 sps:$4 sm:$0xff]   ;;  %v495_v29 = vunpack.c.l.s4 %v9550_v28  ;;  %v7946_v39 = vld [vmem:[#allocation5 + $0x8] sm:$0xff]   ;;  %vm1049_vm2 = vcmask 1043459  }
  0x98   :  { %405 = vmatpush1.bf16.msra.mxu0 %v8467_v4  ;;  %v8482_v14 = vld [vmem:[#allocation10 + $0xc0] ss:$16 sps:$4 sm:$0xff]   ;;  %v8483_v15 = vld [vmem:[#allocation10 + $0xe4] ss:$16 sps:$4 sm:$0xff]   ;;  %v7792_v52 = vunpack.c.l.bf16 %v7946_v39  ;;  %v7793_v54 = vunpack.c.h.bf16 %v7946_v39  ;;  %vm1051_vm3 = vcmask 1044484   ;;  %vm1053_vm4 = vcmask 1045509  }
  0x99   :  { %406 = vmatprep.subr.bf16.mxu0 %v8468_v5  ;;  %v8485_v16 = vld [vmem:[#allocation10 + $0xe0] ss:$16 sps:$4 sm:$0xff]   ;;  %v496_v31 = vunpack.c.0.s8 %v495_v29  ;;  %v7948_v5 = vld [vmem:[#allocation5 + $0x18] sm:$0xff]   ;;  %vm1055_vm5 = vcmask 1046534   ;;  %vm1057_vm6 = vcmask 1047559   ;;  %vm9552_vm7 = vmmov 0  }
  0x9a   :  { %v8486_v18 = vld [vmem:[#allocation11] sm:$0xff]   ;;  %v8488_v21 = vld [vmem:[#allocation11 + $0x10] sm:$0xff]  }
  0x9b   :  { %v8490_v23 = vld [vmem:[#allocation11 + $0x20] sm:$0xff]   ;;  %v8492_v25 = vld [vmem:[#allocation11 + $0x30] sm:$0xff]   ;;  %v9779_v32 = vsub.s32 %v496_v31, %v9776_v30  ;;  %v8494_v31 = vld [vmem:[#allocation10 + $0xc] ss:$16 sps:$4 sm:$0xff]  }
  0x9c   :  { %407 = vmatpush1.bf16.msra.mxu0 %v8470_v6  ;;  %v7787_v37 = vld [vmem:[#allocation5] sm:$0xff]   ;;  %v7947_v44 = vld [vmem:[#allocation5 + $0x10] sm:$0xff]   ;;  %443 = vmatprep.subr.bf16.mxu1 %v8494_v31 }
  0x9d   :  { %408 = vmatprep.subr.bf16.mxu0 %v8471_v7  ;;  %v7788_v46 = vunpack.c.l.bf16 %v7787_v37  ;;  %v7789_v47 = vunpack.c.h.bf16 %v7787_v37  ;;  %v7796_v55 = vunpack.c.l.bf16 %v7947_v44  ;;  %v7797_v59 = vunpack.c.h.bf16 %v7947_v44  ;;  %v8500_v37 = vld [vmem:[#allocation10 + $0x4c] ss:$16 sps:$4 sm:$0xff]   ;;  %v8527_v31 = vld [vmem:[#allocation13 + $0x48] ss:$12 sps:$4 sm:$0xff]  }
  0x9e   :  { %v7281_v44 = vld [vmem:[%s10351_s8] ss:$0 sm:$0xff] }
  0xa0   :  { %409 = vmatpush1.bf16.msra.mxu0 %v8473_v8 }
  0xa1   :  { %410 = vmatprep.subr.bf16.mxu0 %v8474_v9  ;;  %v7801_v9 = vunpack.c.h.bf16 %v7948_v5 }
  0xa4   :  { %411 = vmatpush1.bf16.msra.mxu0 %v8476_v10 }
  0xa5   :  { %412 = vmatprep.subr.bf16.mxu0 %v8477_v11 }
  0xa8   :  { %413 = vmatpush1.bf16.msra.mxu0 %v8479_v12 }
  0xa9   :  { %414 = vmatprep.subr.bf16.mxu0 %v8480_v13 }
  0xac   :  { %415 = vmatpush1.bf16.msra.mxu0 %v8482_v14 }
  0xad   :  { %416 = vmatprep.subr.bf16.mxu0 %v8483_v15  ;;  %v7800_v15 = vunpack.c.l.bf16 %v7948_v5 }
  0xb0   :  { %417 = vmatpush1.bf16.msra.mxu0 %v8485_v16 }
  0xb1   :  { %8200 = vmatprep.subr.bf16.mxu0 %v8486_v18 }
  0xb3   :  { %435 = vmatmul.mubr.bf16.vlgmr.msra.gmra.mrb[0].mxu0 %v9772_v19 }
  0xb4   :  { %8201 = vmatpush3.bf16.msra.mxu0 %v8486_v18 }
  0xb5   :  { %8202 = vmatprep.subr.bf16.mxu0 %v8487_v20 }
  0xb8   :  { %8203 = vmatpush3.bf16.msra.mxu0 %v8487_v20 }
  0xb9   :  { %8204 = vmatprep.subr.bf16.mxu0 %v8488_v21 }
  0xbc   :  { %8205 = vmatpush3.bf16.msra.mxu0 %v8488_v21 }
  0xbd   :  { %8206 = vmatprep.subr.bf16.mxu0 %v8489_v22 }
  0xc0   :  { %8207 = vmatpush3.bf16.msra.mxu0 %v8489_v22 }
  0xc1   :  { %8208 = vmatprep.subr.bf16.mxu0 %v8490_v23 }
  0xc4   :  { %8209 = vmatpush3.bf16.msra.mxu0 %v8490_v23 }
  0xc5   :  { %8210 = vmatprep.subr.bf16.mxu0 %v8491_v24 }
  0xc8   :  { %8211 = vmatpush3.bf16.msra.mxu0 %v8491_v24 }
  0xc9   :  { %8212 = vmatprep.subr.bf16.mxu0 %v8492_v25 }
  0xcc   :  { %8213 = vmatpush3.bf16.msra.mxu0 %v8492_v25 }
  0xcd   :  { %8214 = vmatprep.subr.bf16.mxu0 %v8493_v26 }
  0xd0   :  { %8215 = vmatpush3.bf16.msra.mxu0 %v8493_v26 }
 0x186   :  { %v436_v33 = vpop.f32.mrb[0].mxu0 }
 0x187   :  { %v493_v34 = vcombine.high %v436_v33, %v436_v33  ;;  %v500_v35 = vrot.slane %v436_v33, %v9779_v32  ;;  %v9782_v36 = vpop.f32.mrb[1].mxu0  ;;  %v8496_v33 = vld [vmem:[#allocation10 + $0x8] ss:$16 sps:$4 sm:$0xff]  }
 0x188   :  { %v440_v38 = vpop.f32.mrb[2].mxu0  ;;  %444 = vmatpush1.bf16.msra.mxu1 %v8496_v33  ;;  %v8532_v33 = vld [vmem:[#allocation13 + $0x64] ss:$12 sps:$4 sm:$0xff]  }
 0x189   :  { %v507_v40 = vrot.slane %v493_v34, %v9779_v32  ;;  %v508_v41 = vcombine.high %v500_v35, %v500_v35  ;;  %v516_v42 = vrot.slane %v500_v35, %v9779_v32  ;;  %v441_v43 = vpop.f32.mrb[3].mxu0  ;;  %v8497_v34 = vld [vmem:[#allocation10 + $0x2c] ss:$16 sps:$4 sm:$0xff]   ;;  %v8499_v35 = vld [vmem:[#allocation10 + $0x28] ss:$16 sps:$4 sm:$0xff]  }
 0x18a   :  { %445 = vmatprep.subr.bf16.mxu1 %v8497_v34  ;;  %v7268_v38 = vld [vmem:[%s10350_s7] ss:$0 sm:$0xff] }
 0x18b   :  { %v509_v48 = vcombine.high %v507_v40, %v507_v40  ;;  %v523_v49 = vrot.slane %v507_v40, %v9779_v32  ;;  %v530_v50 = vrot.slane %v508_v41, %v9779_v32  ;;  %v538_v51 = vcombine.high %v516_v42, %v516_v42  ;;  %v8530_v34 = vld [vmem:[#allocation13 + $0x60] ss:$12 sps:$4 sm:$0xff]  }
 0x18c   :  { %v553_v53 = vrot.slane %v516_v42, %v9787_v45  ;;  %446 = vmatpush1.bf16.msra.mxu1 %v8499_v35  ;;  %v8533_v35 = vld [vmem:[#allocation13 + $0x78] ss:$12 sps:$4 sm:$0xff]  }
 0x18d   :  { %v537_v56 = vrot.slane %v509_v48, %v9779_v32  ;;  %v540_v57 = vcombine.high %v530_v50, %v530_v50  ;;  %v557_v58 = vrot.slane %v530_v50, %v9787_v45  ;;  %v539_v60 = vcombine.high %v523_v49, %v523_v49  ;;  %447 = vmatprep.subr.bf16.mxu1 %v8500_v37  ;;  %v8538_v37 = vld [vmem:[#allocation13 + $0x94] ss:$12 sps:$4 sm:$0xff]  }
 0x18e   :  { %v561_v61 = vrot.slane %v538_v51, %v9787_v45  ;;  %v569_v62 = vrot.slane %v523_v49, %v9787_v45  ;;  %v590_v63 = vadd.f32 %v7788_v46, %v553_v53 }
 0x18f   :  { %v541_v1 = vcombine.high %v537_v56, %v537_v56  ;;  %v565_v2 = vrot.slane %v540_v57, %v9787_v45  ;;  %v591_v3 = vadd.f32 %v7789_v47, %v557_v58  ;;  %v573_v4 = vrot.slane %v537_v56, %v9787_v45 }
 0x190   :  { %v592_v6 = vadd.f32 %v7792_v52, %v561_v61  ;;  %v598_v7 = vmax.f32 %v590_v63, 0.0  ;;  %v594_v8 = vadd.f32 %v7796_v55, %v569_v62  ;;  %v577_v16 = vrot.slane %v539_v60, %v9787_v45 }
 0x191   :  { %v599_v10 = vmax.f32 %v591_v3, 0.0  ;;  %v593_v11 = vadd.f32 %v7793_v54, %v565_v2  ;;  %v595_v12 = vadd.f32 %v7797_v59, %v573_v4  ;;  %v581_v13 = vrot.slane %v541_v1, %v9787_v45 }
 0x192   :  { %v600_v14 = vmax.f32 %v592_v6, 0.0  ;;  %v602_v20 = vmax.f32 %v594_v8, 0.0  ;;  %v596_v25 = vadd.f32 %v7800_v15, %v577_v16  ;;  %v8509_v15 = vld [vmem:[#allocation10 + $0xac] ss:$16 sps:$4 sm:$0xff]   ;;  %v8511_v16 = vld [vmem:[#allocation10 + $0xa8] ss:$16 sps:$4 sm:$0xff]  }
 0x193   :  { %v7766_v17 = vpack.c.bf16 %v599_v10, %v598_v7  ;;  %v601_v18 = vmax.f32 %v593_v11, 0.0  ;;  %v603_v21 = vmax.f32 %v595_v12, 0.0  ;;  %v597_v24 = vadd.f32 %v7801_v9, %v581_v13  ;;  %v8502_v10 = vld [vmem:[#allocation10 + $0x48] ss:$16 sps:$4 sm:$0xff]   ;;  %v8503_v11 = vld [vmem:[#allocation10 + $0x6c] ss:$16 sps:$4 sm:$0xff]  }
 0x194   :  { %v604_v28 = vmax.f32 %v596_v25, 0.0  ;;  %448 = vmatpush1.bf16.msra.mxu1 %v8502_v10  ;;  %v8505_v12 = vld [vmem:[#allocation10 + $0x68] ss:$16 sps:$4 sm:$0xff]   ;;  %v8506_v13 = vld [vmem:[#allocation10 + $0x8c] ss:$16 sps:$4 sm:$0xff]  }
 0x195   :  { %8216 = vmatprep.mubr.bf16.mxu0 %v7766_v17  ;;  %v7767_v22 = vpack.c.bf16 %v601_v18, %v600_v14  ;;  %v7768_v23 = vpack.c.bf16 %v603_v21, %v602_v20  ;;  %v605_v26 = vmax.f32 %v597_v24, 0.0  ;;  %449 = vmatprep.subr.bf16.mxu1 %v8503_v11  ;;  %v8508_v14 = vld [vmem:[#allocation10 + $0x88] ss:$16 sps:$4 sm:$0xff]   ;;  %v8512_v17 = vld [vmem:[#allocation10 + $0xcc] ss:$16 sps:$4 sm:$0xff]  }
 0x196   :  { %v8514_v18 = vld [vmem:[#allocation10 + $0xc8] ss:$16 sps:$4 sm:$0xff]   ;;  %v8515_v20 = vld [vmem:[#allocation10 + $0xec] ss:$16 sps:$4 sm:$0xff]  }
 0x197   :  { %8217 = vmatmul.mubr.bf16.vlgmr.msra.gmra.mrb[4].mxu0 %v7767_v22  ;;  %v7769_v29 = vpack.c.bf16 %v605_v26, %v604_v28  ;;  %v8517_v21 = vld [vmem:[#allocation10 + $0xe8] ss:$16 sps:$4 sm:$0xff]   ;;  %v8520_v22 = vld [vmem:[#allocation13 + $0x4] ss:$12 sps:$4 sm:$0xff]   ;;  %v8526_v26 = vld [vmem:[#allocation13 + $0x34] ss:$12 sps:$4 sm:$0xff]  }
 0x198   :  { %8220 = vmatprep.mubr.bf16.mxu0 %v7768_v23  ;;  %450 = vmatpush1.bf16.msra.mxu1 %v8505_v12  ;;  %v8518_v23 = vld [vmem:[#allocation13] ss:$12 sps:$4 sm:$0xff]   ;;  %v8523_v24 = vld [vmem:[#allocation13 + $0x1c] ss:$12 sps:$4 sm:$0xff]   ;;  %v8521_v25 = vld [vmem:[#allocation13 + $0x18] ss:$12 sps:$4 sm:$0xff]  }
 0x199   :  { %451 = vmatprep.subr.bf16.mxu1 %v8506_v13  ;;  %v8524_v28 = vld [vmem:[#allocation13 + $0x30] ss:$12 sps:$4 sm:$0xff]  }
 0x19a   :  { %v8581_v10 = vld [vmem:[#allocation13 + $0xb0] ss:$12 sps:$4 sm:$0xff]  }
 0x19c   :  { %452 = vmatpush1.bf16.msra.mxu1 %v8508_v14 }
 0x19d   :  { %453 = vmatprep.subr.bf16.mxu1 %v8509_v15 }
 0x19f   :  { %8221 = vmatmul.mubr.bf16.gmra.mrb[8].mxu0 %v7769_v29  ;;  %v8529_v29 = vld [vmem:[#allocation13 + $0x4c] ss:$12 sps:$4 sm:$0xff]  }
 0x1a0   :  { %454 = vmatpush1.bf16.msra.mxu1 %v8511_v16 }
 0x1a1   :  { %455 = vmatprep.subr.bf16.mxu1 %v8512_v17 }
 0x1a4   :  { %456 = vmatpush1.bf16.msra.mxu1 %v8514_v18 }
 0x1a5   :  { %457 = vmatprep.subr.bf16.mxu1 %v8515_v20 }
 0x1a8   :  { %458 = vmatpush1.bf16.msra.mxu1 %v8517_v21 }
 0x1a9   :  { %1381 = vmatprep.subr.bf16.mxu1 %v8520_v22 }
 0x1ab   :  { %476 = vmatmul.mubr.bf16.vlgmr.msra.gmra.mrb[0].mxu1 %v9772_v19  ;;  %v8535_v19 = vld [vmem:[#allocation13 + $0x7c] ss:$12 sps:$4 sm:$0xff]  }
 0x1ac   :  { %1382 = vmatpush1.bf16.msra.mxu1 %v8518_v23 }
 0x1ad   :  { %1383 = vmatprep.subr.bf16.mxu1 %v8523_v24 }
 0x1b0   :  { %1384 = vmatpush1.bf16.msra.mxu1 %v8521_v25 }
 0x1b1   :  { %1385 = vmatprep.subr.bf16.mxu1 %v8526_v26 }
 0x1b4   :  { %1386 = vmatpush1.bf16.msra.mxu1 %v8524_v28 }
 0x1b5   :  { %1387 = vmatprep.subr.bf16.mxu1 %v8529_v29 }
 0x1b8   :  { %1388 = vmatpush1.bf16.msra.mxu1 %v8527_v31 }
 0x1b9   :  { %1389 = vmatprep.subr.bf16.mxu1 %v8532_v33 }
 0x1bc   :  { %1390 = vmatpush1.bf16.msra.mxu1 %v8530_v34 }
 0x1bd   :  { %1391 = vmatprep.subr.bf16.mxu1 %v8535_v19 }
 0x1c0   :  { %1392 = vmatpush1.bf16.msra.mxu1 %v8533_v35 }
 0x1c1   :  { %1393 = vmatprep.subr.bf16.mxu1 %v8538_v37 }
 0x26a   :  { %v8218_v39 = vpop.f32.mrb[4].mxu0 }
 0x26b   :  { %v752_v40 = vadd.f32 %v8218_v39, %v7268_v38  ;;  %v743_v41 = vpop.f32.mrb[5].mxu0  ;;  %v8541_v39 = vld [vmem:[#allocation13 + $0xac] ss:$12 sps:$4 sm:$0xff]  }
 0x26c   :  { %v744_v42 = vadd.f32 %v7268_v38, %v743_v41  ;;  %v8219_v43 = vpop.f32.mrb[6].mxu0  ;;  %v8542_v41 = vld [vmem:[#allocation13 + $0xc0] ss:$12 sps:$4 sm:$0xff]  }
 0x26d   :  { %v776_v46 = vmax.f32 %v752_v40, 0.0  ;;  %v755_v47 = vadd.f32 %v8219_v43, %v7268_v38  ;;  %v746_v48 = vpop.f32.mrb[7].mxu0  ;;  %v8539_v40 = vld [vmem:[#allocation13 + $0xa8] ss:$12 sps:$4 sm:$0xff]  }
 0x26e   :  { %v774_v49 = vmax.f32 %v744_v42, 0.0  ;;  %v747_v50 = vadd.f32 %v7268_v38, %v746_v48  ;;  %v8544_v42 = vld [vmem:[#allocation13 + $0xc4] ss:$12 sps:$4 sm:$0xff]   ;;  %v8547_v43 = vld [vmem:[#allocation13 + $0xdc] ss:$12 sps:$4 sm:$0xff]  }
 0x26f   :  { %v777_v51 = vmax.f32 %v755_v47, 0.0  ;;  %v791_v52 = vmul.f32 %v7281_v44, %v776_v46  ;;  %v8563_v46 = vld [vmem:[#allocation13 + $0xc8] ss:$12 sps:$4 sm:$0xff]  }
 0x270   :  { %v775_v53 = vmax.f32 %v747_v50, 0.0  ;;  %v789_v54 = vmul.f32 %v7281_v44, %v774_v49  ;;  %v8550_v47 = vld [vmem:[#allocation13 + $0xf4] ss:$12 sps:$4 sm:$0xff]   ;;  %7988 = vmatprep.subr.bf16.mxu0 %v8563_v46 }
 0x271   :  { %801 = vadd.xlane.f32.xlu1 %v791_v52  ;;  %v792_v57 = vmul.f32 %v7281_v44, %v777_v51  ;;  %v8564_v48 = vld [vmem:[#allocation13 + $0x8] ss:$12 sps:$4 sm:$0xff]   ;;  %v8568_v49 = vld [vmem:[#allocation13 + $0xe0] ss:$12 sps:$4 sm:$0xff]   ;;  %v8548_v51 = vld [vmem:[#allocation13 + $0xf0] ss:$12 sps:$4 sm:$0xff]  }
 0x272   :  { %v8222_v55 = vpop.f32.mrb[8].mxu0  ;;  %797 = vadd.xlane.f32.xlu0 %v789_v54  ;;  %v790_v61 = vmul.f32 %v7281_v44, %v775_v53  ;;  %7989 = vmatpush3.bf16.msra.mxu0 %v8564_v48  ;;  %v8569_v50 = vld [vmem:[#allocation13 + $0x20] ss:$12 sps:$4 sm:$0xff]   ;;  %v8551_v53 = vld [vmem:[#allocation13 + $0x108] ss:$12 sps:$4 sm:$0xff]  }
 0x273   :  { %v759_v56 = vpop.f32.mrb[9].mxu0  ;;  %v768_v58 = vadd.f32 %v8222_v55, %v7268_v38  ;;  %7990 = vmatprep.subr.bf16.mxu0 %v8568_v49  ;;  %v8553_v52 = vld [vmem:[#allocation13 + $0x10c] ss:$12 sps:$4 sm:$0xff]   ;;  %v8556_v54 = vld [vmem:[#allocation13 + $0x124] ss:$12 sps:$4 sm:$0xff]  }
 0x274   :  { %v760_v59 = vadd.f32 %v7268_v38, %v759_v56  ;;  %v8223_v60 = vpop.f32.mrb[10].mxu0  ;;  %v8554_v55 = vld [vmem:[#allocation13 + $0x120] ss:$12 sps:$4 sm:$0xff]   ;;  %v8559_v56 = vld [vmem:[#allocation13 + $0x13c] ss:$12 sps:$4 sm:$0xff]  }
 0x275   :  { %803 = vadd.xlane.f32.xlu1 %v792_v57  ;;  %v762_v62 = vpop.f32.mrb[11].mxu0  ;;  %v771_v1 = vadd.f32 %v8223_v60, %v7268_v38  ;;  %v780_v3 = vmax.f32 %v768_v58, 0.0  ;;  %v8557_v57 = vld [vmem:[#allocation13 + $0x138] ss:$12 sps:$4 sm:$0xff]   ;;  %v8562_v58 = vld [vmem:[#allocation13 + $0x154] ss:$12 sps:$4 sm:$0xff]  }
 0x276   :  { %v778_v63 = vmax.f32 %v760_v59, 0.0  ;;  %v763_v2 = vadd.f32 %v7268_v38, %v762_v62  ;;  %799 = vadd.xlane.f32.xlu0 %v790_v61  ;;  %v8536_v38 = vld [vmem:[#allocation13 + $0x90] ss:$12 sps:$4 sm:$0xff]   ;;  %7991 = vmatpush3.bf16.msra.mxu0 %v8569_v50  ;;  %v8567_v60 = vld [vmem:[#allocation13 + $0x16c] ss:$12 sps:$4 sm:$0xff]  }
 0x277   :  { %v781_v6 = vmax.f32 %v771_v1, 0.0  ;;  %v795_v8 = vmul.f32 %v7281_v44, %v780_v3  ;;  %1394 = vmatpush1.bf16.msra.mxu1 %v8536_v38  ;;  %v8560_v59 = vld [vmem:[#allocation13 + $0x150] ss:$12 sps:$4 sm:$0xff]   ;;  %v8565_v61 = vld [vmem:[#allocation13 + $0x168] ss:$12 sps:$4 sm:$0xff]  }
 0x278   :  { %v779_v4 = vmax.f32 %v763_v2, 0.0  ;;  %v793_v5 = vmul.f32 %v7281_v44, %v778_v63  ;;  %1395 = vmatprep.subr.bf16.mxu1 %v8541_v39  ;;  %v8570_v62 = vld [vmem:[#allocation13 + $0xf8] ss:$12 sps:$4 sm:$0xff]   ;;  %v8572_v1 = vld [vmem:[#allocation13 + $0x110] ss:$12 sps:$4 sm:$0xff]  }
 0x279   :  { %v796_v9 = vmul.f32 %v7281_v44, %v781_v6  ;;  %v8571_v63 = vld [vmem:[#allocation13 + $0x38] ss:$12 sps:$4 sm:$0xff]   ;;  %7992 = vmatprep.subr.bf16.mxu0 %v8570_v62  ;;  %v8573_v2 = vld [vmem:[#allocation13 + $0x50] ss:$12 sps:$4 sm:$0xff]   ;;  %v8574_v3 = vld [vmem:[#allocation13 + $0x128] ss:$12 sps:$4 sm:$0xff]  }
 0x27a   :  { %805 = vadd.xlane.f32.xlu0 %v793_v5  ;;  %v794_v7 = vmul.f32 %v7281_v44, %v779_v4  ;;  %v8545_v44 = vld [vmem:[#allocation13 + $0xd8] ss:$12 sps:$4 sm:$0xff]   ;;  %7993 = vmatpush3.bf16.msra.mxu0 %v8571_v63  ;;  %v8575_v4 = vld [vmem:[#allocation13 + $0x68] ss:$12 sps:$4 sm:$0xff]   ;;  %v8576_v5 = vld [vmem:[#allocation13 + $0x140] ss:$12 sps:$4 sm:$0xff]  }
 0x27b   :  { %1396 = vmatpush1.bf16.msra.mxu1 %v8539_v40  ;;  %7994 = vmatprep.subr.bf16.mxu0 %v8572_v1  ;;  %v8577_v6 = vld [vmem:[#allocation13 + $0x80] ss:$12 sps:$4 sm:$0xff]  }
 0x27c   :  { %807 = vadd.xlane.f32.xlu1 %v794_v7  ;;  %1397 = vmatprep.subr.bf16.mxu1 %v8544_v42  ;;  %v8578_v7 = vld [vmem:[#allocation13 + $0x158] ss:$12 sps:$4 sm:$0xff]  }
 0x27e   :  { %809 = vadd.xlane.f32.xlu0 %v795_v8  ;;  %7995 = vmatpush3.bf16.msra.mxu0 %v8573_v2  ;;  %v8579_v8 = vld [vmem:[#allocation13 + $0x98] ss:$12 sps:$4 sm:$0xff]  }
 0x27f   :  { %1398 = vmatpush1.bf16.msra.mxu1 %v8542_v41  ;;  %7996 = vmatprep.subr.bf16.mxu0 %v8574_v3 }
 0x280   :  { %811 = vadd.xlane.f32.xlu1 %v796_v9  ;;  %1399 = vmatprep.subr.bf16.mxu1 %v8547_v43  ;;  %v8580_v9 = vld [vmem:[#allocation13 + $0x170] ss:$12 sps:$4 sm:$0xff]  }
 0x282   :  { %7997 = vmatpush3.bf16.msra.mxu0 %v8575_v4 }
 0x283   :  { %1400 = vmatpush1.bf16.msra.mxu1 %v8545_v44  ;;  %7998 = vmatprep.subr.bf16.mxu0 %v8576_v5 }
 0x284   :  { %1401 = vmatprep.subr.bf16.mxu1 %v8550_v47 }
 0x286   :  { %7999 = vmatpush3.bf16.msra.mxu0 %v8577_v6 }
 0x287   :  { %1402 = vmatpush1.bf16.msra.mxu1 %v8548_v51  ;;  %8000 = vmatprep.subr.bf16.mxu0 %v8578_v7 }
 0x288   :  { %1403 = vmatprep.subr.bf16.mxu1 %v8553_v52 }
 0x28a   :  { %8001 = vmatpush3.bf16.msra.mxu0 %v8579_v8 }
 0x28b   :  { %1404 = vmatpush1.bf16.msra.mxu1 %v8551_v53  ;;  %8002 = vmatprep.subr.bf16.mxu0 %v8580_v9 }
 0x28c   :  { %1405 = vmatprep.subr.bf16.mxu1 %v8556_v54 }
 0x28e   :  { %8003 = vmatpush3.bf16.msra.mxu0 %v8581_v10 }
 0x28f   :  { %1406 = vmatpush1.bf16.msra.mxu1 %v8554_v55 }
 0x290   :  { %1407 = vmatprep.subr.bf16.mxu1 %v8559_v56 }
 0x293   :  { %1408 = vmatpush1.bf16.msra.mxu1 %v8557_v57 }
 0x294   :  { %1409 = vmatprep.subr.bf16.mxu1 %v8562_v58 }
 0x297   :  { %1410 = vmatpush1.bf16.msra.mxu1 %v8560_v59 }
 0x298   :  { %1411 = vmatprep.subr.bf16.mxu1 %v8567_v60 }
 0x29b   :  { %1412 = vmatpush1.bf16.msra.mxu1 %v8565_v61 }
 0x2fe   :  { %v802_v11 = vpop.xlane.xlu1 %801 }
 0x2ff   :  { %v825_v12 = vrot.slane %v802_v11, 4  ;;  %v798_v13 = vpop.xlane.xlu0 %797 }
 0x300   :  { %v813_v14 = vrot.slane %v798_v13, 4 }
 0x301   :  { %v826_v15 = vmax.f32 %v802_v11, %v825_v12 }
 0x302   :  { %v814_v16 = vmax.f32 %v798_v13, %v813_v14  ;;  %v804_v17 = vpop.xlane.xlu1 %803 }
 0x303   :  { %v827_v18 = vrot.slane %v826_v15, 2  ;;  %v831_v20 = vrot.slane %v804_v17, 4  ;;  %v800_v21 = vpop.xlane.xlu0 %799 }
 0x304   :  { %v815_v22 = vrot.slane %v814_v16, 2  ;;  %v819_v23 = vrot.slane %v800_v21, 4 }
 0x305   :  { %v828_v24 = vmax.f32 %v826_v15, %v827_v18  ;;  %v832_v25 = vmax.f32 %v804_v17, %v831_v20 }
 0x306   :  { %v816_v26 = vmax.f32 %v814_v16, %v815_v22  ;;  %v820_v28 = vmax.f32 %v800_v21, %v819_v23 }
 0x307   :  { %v829_v29 = vrot.slane %v828_v24, 1  ;;  %v833_v31 = vrot.slane %v832_v25, 2  ;;  %v806_v33 = vpop.xlane.xlu0 %805 }
 0x308   :  { %v817_v34 = vrot.slane %v816_v26, 1  ;;  %v821_v19 = vrot.slane %v820_v28, 2  ;;  %v837_v35 = vrot.slane %v806_v33, 4 }
 0x309   :  { %v830_v37 = vmax.f32 %v828_v24, %v829_v29  ;;  %v834_v38 = vmax.f32 %v832_v25, %v833_v31  ;;  %v808_v39 = vpop.xlane.xlu1 %807 }
 0x30a   :  { %v818_v40 = vmax.f32 %v816_v26, %v817_v34  ;;  %v822_v41 = vmax.f32 %v820_v28, %v821_v19  ;;  %v838_v42 = vmax.f32 %v806_v33, %v837_v35  ;;  %v843_v43 = vrot.slane %v808_v39, 4 }
 0x30b   :  { %v863_v44 = vsub.f32 %v802_v11, %v830_v37  ;;  %v835_v46 = vrot.slane %v834_v38, 1  ;;  %v810_v47 = vpop.xlane.xlu0 %809 }
 0x30c   :  { %v861_v48 = vsub.f32 %v798_v13, %v818_v40  ;;  %v823_v49 = vrot.slane %v822_v41, 1  ;;  %v839_v50 = vrot.slane %v838_v42, 2  ;;  %v844_v51 = vmax.f32 %v808_v39, %v843_v43 }
 0x30d   :  { %v873_v52 = vmul.f32 1.442695, %v863_v44  ;;  %v836_v53 = vmax.f32 %v834_v38, %v835_v46  ;;  %v849_v54 = vrot.slane %v810_v47, 4  ;;  %v812_v55 = vpop.xlane.xlu1 %811 }
 0x30e   :  { %v869_v56 = vmul.f32 1.442695, %v861_v48  ;;  %v824_v57 = vmax.f32 %v822_v41, %v823_v49  ;;  %v840_v58 = vmax.f32 %v838_v42, %v839_v50  ;;  %v845_v59 = vrot.slane %v844_v51, 2 }
 0x30f   :  { %9110 = vpow2.f32 %v873_v52  ;;  %v864_v60 = vsub.f32 %v804_v17, %v836_v53  ;;  %v850_v61 = vmax.f32 %v810_v47, %v849_v54  ;;  %v855_v62 = vrot.slane %v812_v55, 4 }
 0x310   :  { %9112 = vpow2.f32 %v869_v56  ;;  %v862_v63 = vsub.f32 %v800_v21, %v824_v57  ;;  %v841_v1 = vrot.slane %v840_v58, 1  ;;  %v846_v2 = vmax.f32 %v844_v51, %v845_v59 }
 0x311   :  { %v875_v3 = vmul.f32 1.442695, %v864_v60  ;;  %v851_v4 = vrot.slane %v850_v61, 2  ;;  %v856_v5 = vmax.f32 %v812_v55, %v855_v62 }
 0x312   :  { %v871_v6 = vmul.f32 1.442695, %v862_v63  ;;  %v842_v7 = vmax.f32 %v840_v58, %v841_v1  ;;  %v847_v8 = vrot.slane %v846_v2, 1 }
 0x313   :  { %9114 = vpow2.f32 %v875_v3  ;;  %v852_v9 = vmax.f32 %v850_v61, %v851_v4  ;;  %v857_v10 = vrot.slane %v856_v5, 2 }
 0x314   :  { %9116 = vpow2.f32 %v871_v6  ;;  %v865_v11 = vsub.f32 %v806_v33, %v842_v7  ;;  %v848_v12 = vmax.f32 %v846_v2, %v847_v8 }
 0x315   :  { %v853_v13 = vrot.slane %v852_v9, 1  ;;  %v858_v14 = vmax.f32 %v856_v5, %v857_v10 }
 0x316   :  { %v877_v15 = vmul.f32 1.442695, %v865_v11  ;;  %v866_v16 = vsub.f32 %v808_v39, %v848_v12 }
 0x317   :  { %v854_v17 = vmax.f32 %v852_v9, %v853_v13  ;;  %v859_v18 = vrot.slane %v858_v14, 1  ;;  %v7949_v13 = vld [vmem:[#allocation7 + $0x8] sm:$0xff]  }
 0x318   :  { %9118 = vpow2.f32 %v877_v15  ;;  %v879_v20 = vmul.f32 1.442695, %v866_v16  ;;  %v7803_v16 = vld [vmem:[#allocation7] sm:$0xff]  }
 0x319   :  { %v9807_v21 = vpop.eup %9110  ;;  %v867_v22 = vsub.f32 %v810_v47, %v854_v17  ;;  %v860_v23 = vmax.f32 %v858_v14, %v859_v18 }
 0x31a   :  { %v9809_v24 = vpop.eup %9112  ;;  %v897_v25 = vrot.slane %v9807_v21, 4  ;;  %9120 = vpow2.f32 %v879_v20 }
 0x31b   :  { %v885_v26 = vrot.slane %v9809_v24, 4  ;;  %v881_v28 = vmul.f32 1.442695, %v867_v22  ;;  %v868_v29 = vsub.f32 %v812_v55, %v860_v23  ;;  %v7808_v22 = vunpack.c.l.bf16 %v7949_v13 }
 0x31c   :  { %v898_v31 = vadd.f32 %v9807_v21, %v897_v25 }
 0x31d   :  { %v9814_v33 = vpop.eup %9114  ;;  %v886_v34 = vadd.f32 %v9809_v24, %v885_v26  ;;  %9122 = vpow2.f32 %v881_v28  ;;  %v883_v19 = vmul.f32 1.442695, %v868_v29  ;;  %v7804_v28 = vunpack.c.l.bf16 %v7803_v16 }
 0x31e   :  { %v9817_v35 = vpop.eup %9116  ;;  %v899_v37 = vrot.slane %v898_v31, 2  ;;  %v903_v38 = vrot.slane %v9814_v33, 4 }
 0x31f   :  { %v887_v39 = vrot.slane %v886_v34, 2  ;;  %v891_v40 = vrot.slane %v9817_v35, 4  ;;  %9124 = vpow2.f32 %v883_v19 }
 0x320   :  { %v900_v41 = vadd.f32 %v899_v37, %v898_v31  ;;  %v904_v42 = vadd.f32 %v9814_v33, %v903_v38  ;;  %v7809_v38 = vunpack.c.h.bf16 %v7949_v13 }
 0x321   :  { %v888_v43 = vadd.f32 %v887_v39, %v886_v34  ;;  %v892_v44 = vadd.f32 %v9817_v35, %v891_v40 }
 0x322   :  { %v9823_v46 = vpop.eup %9118  ;;  %v901_v47 = vrot.slane %v900_v41, 1  ;;  %v905_v48 = vrot.slane %v904_v42, 2 }
 0x323   :  { %v889_v49 = vrot.slane %v888_v43, 1  ;;  %v893_v50 = vrot.slane %v892_v44, 2  ;;  %v909_v51 = vrot.slane %v9823_v46, 4 }
 0x324   :  { %v9826_v52 = vpop.eup %9120  ;;  %v902_v53 = vadd.f32 %v901_v47, %v900_v41  ;;  %v906_v54 = vadd.f32 %v905_v48, %v904_v42  ;;  %v7805_v42 = vunpack.c.h.bf16 %v7803_v16  ;;  %v7950_v48 = vld [vmem:[#allocation7 + $0x10] sm:$0xff]  }
 0x325   :  { %v890_v55 = vadd.f32 %v889_v49, %v888_v43  ;;  %v894_v56 = vadd.f32 %v893_v50, %v892_v44  ;;  %v910_v57 = vadd.f32 %v9823_v46, %v909_v51  ;;  %v915_v58 = vrot.slane %v9826_v52, 4 }
 0x326   :  { %9126 = vrcp.f32 %v902_v53  ;;  %v907_v59 = vrot.slane %v906_v54, 1  ;;  %v7812_v53 = vunpack.c.l.bf16 %v7950_v48 }
 0x327   :  { %v9830_v60 = vpop.eup %9122  ;;  %9128 = vrcp.f32 %v890_v55  ;;  %v895_v61 = vrot.slane %v894_v56, 1  ;;  %v911_v62 = vrot.slane %v910_v57, 2  ;;  %v916_v63 = vadd.f32 %v9826_v52, %v915_v58 }
 0x328   :  { %v908_v1 = vadd.f32 %v907_v59, %v906_v54  ;;  %v921_v2 = vrot.slane %v9830_v60, 4 }
 0x329   :  { %v9834_v3 = vpop.eup %9124  ;;  %v896_v4 = vadd.f32 %v895_v61, %v894_v56  ;;  %v912_v5 = vadd.f32 %v911_v62, %v910_v57  ;;  %v917_v6 = vrot.slane %v916_v63, 2  ;;  %v7813_v61 = vunpack.c.h.bf16 %v7950_v48  ;;  %v7951_v62 = vld [vmem:[#allocation7 + $0x18] sm:$0xff]  }
 0x32a   :  { %9130 = vrcp.f32 %v908_v1  ;;  %v922_v7 = vadd.f32 %v9830_v60, %v921_v2  ;;  %v927_v8 = vrot.slane %v9834_v3, 4  ;;  %v7817_v16 = vunpack.c.h.bf16 %v7951_v62 }
 0x32b   :  { %9132 = vrcp.f32 %v896_v4  ;;  %v913_v9 = vrot.slane %v912_v5, 1  ;;  %v918_v10 = vadd.f32 %v917_v6, %v916_v63 }
 0x32c   :  { %v923_v11 = vrot.slane %v922_v7, 2  ;;  %v928_v12 = vadd.f32 %v9834_v3, %v927_v8  ;;  %v7816_v8 = vunpack.c.l.bf16 %v7951_v62 }
 0x32d   :  { %v914_v14 = vadd.f32 %v913_v9, %v912_v5  ;;  %v919_v15 = vrot.slane %v918_v10, 1 }
 0x32e   :  { %v924_v17 = vadd.f32 %v923_v11, %v922_v7  ;;  %v929_v18 = vrot.slane %v928_v12, 2 }
 0x32f   :  { %9134 = vrcp.f32 %v914_v14  ;;  %v920_v20 = vadd.f32 %v919_v15, %v918_v10 }
 0x330   :  { %v9127_v23 = vpop.eup %9126  ;;  %v925_v25 = vrot.slane %v924_v17, 1  ;;  %v930_v26 = vadd.f32 %v929_v18, %v928_v12 }
 0x331   :  { %v9129_v29 = vpop.eup %9128  ;;  %v938_v31 = vmul.f32 %v9127_v23, %v9807_v21  ;;  %9136 = vrcp.f32 %v920_v20 }
 0x332   :  { %v934_v34 = vmul.f32 %v9129_v29, %v9809_v24  ;;  %v926_v19 = vadd.f32 %v925_v25, %v924_v17  ;;  %v931_v37 = vrot.slane %v930_v26, 1 }
 0x333   :  { %v967_v39 = vmul.f32 %v7808_v22, %v938_v31 }
 0x334   :  { %v9131_v40 = vpop.eup %9130  ;;  %v932_v41 = vadd.f32 %v931_v37, %v930_v26  ;;  %9138 = vrcp.f32 %v926_v19  ;;  %v965_v43 = vmul.f32 %v7804_v28, %v934_v34 }
 0x335   :  { %v9133_v44 = vpop.eup %9132  ;;  %v940_v47 = vmul.f32 %v9131_v40, %v9814_v33  ;;  %v985_v49 = vrot.slane %v967_v39, 4 }
 0x336   :  { %v936_v50 = vmul.f32 %v9133_v44, %v9817_v35  ;;  %9140 = vrcp.f32 %v932_v41  ;;  %v973_v21 = vrot.slane %v965_v43, 4 }
 0x337   :  { %v968_v51 = vmul.f32 %v7809_v38, %v940_v47  ;;  %v986_v24 = vadd.f32 %v985_v49, %v967_v39 }
 0x338   :  { %v966_v54 = vmul.f32 %v7805_v42, %v936_v50  ;;  %v974_v55 = vadd.f32 %v973_v21, %v965_v43 }
 0x339   :  { %v9135_v56 = vpop.eup %9134  ;;  %v987_v57 = vrot.slane %v986_v24, 2  ;;  %v991_v58 = vrot.slane %v968_v51, 4 }
 0x33a   :  { %v942_v59 = vmul.f32 %v9135_v56, %v9823_v46  ;;  %v975_v63 = vrot.slane %v974_v55, 2  ;;  %v979_v33 = vrot.slane %v966_v54, 4 }
 0x33b   :  { %v9137_v1 = vpop.eup %9136  ;;  %v988_v2 = vadd.f32 %v987_v57, %v986_v24  ;;  %v992_v4 = vadd.f32 %v991_v58, %v968_v51 }
 0x33c   :  { %v944_v35 = vmul.f32 %v9137_v1, %v9826_v52  ;;  %v969_v5 = vmul.f32 %v7812_v53, %v942_v59  ;;  %v976_v6 = vadd.f32 %v975_v63, %v974_v55  ;;  %v980_v7 = vadd.f32 %v979_v33, %v966_v54  ;;  %v200_v33 = vld [vmem:[#allocation8] sm:$0x1] }
 0x33d   :  { %v989_v9 = vrot.slane %v988_v2, 1  ;;  %v993_v10 = vrot.slane %v992_v4, 2 }
 0x33e   :  { %v9139_v11 = vpop.eup %9138  ;;  %v970_v12 = vmul.f32 %v7813_v61, %v944_v35  ;;  %v977_v13 = vrot.slane %v976_v6, 1  ;;  %v981_v14 = vrot.slane %v980_v7, 2  ;;  %v997_v46 = vrot.slane %v969_v5, 4 }
 0x33f   :  { %v946_v15 = vmul.f32 %v9139_v11, %v9830_v60  ;;  %v994_v17 = vadd.f32 %v993_v10, %v992_v4  ;;  %v990_v28 = vadd.f32 %v989_v9, %v988_v2  ;;  %v202_v9 = vshrl.u32 %v200_v33, 16 }
 0x340   :  { %v9141_v18 = vpop.eup %9140  ;;  %v978_v20 = vadd.f32 %v977_v13, %v976_v6  ;;  %v982_v22 = vadd.f32 %v981_v14, %v980_v7  ;;  %v998_v23 = vadd.f32 %v997_v46, %v969_v5  ;;  %v1003_v52 = vrot.slane %v970_v12, 4 }
 0x341   :  { %v948_v25 = vmul.f32 %v9141_v18, %v9834_v3  ;;  %v971_v26 = vmul.f32 %v7816_v8, %v946_v15  ;;  %v995_v29 = vrot.slane %v994_v17, 1  ;;  %v1023_v47 = vpack.c.bf16 %v990_v28, %v990_v28 }
 0x342   :  { %v983_v31 = vrot.slane %v982_v22, 1  ;;  %v999_v34 = vrot.slane %v998_v23, 2  ;;  %v1004_v19 = vadd.f32 %v1003_v52, %v970_v12  ;;  %v1021_v42 = vpack.c.bf16 %v978_v20, %v978_v20  ;;  %v477_v52 = vpop.f32.mrb[0].mxu1 }
 0x343   :  { %v972_v37 = vmul.f32 %v7817_v16, %v948_v25  ;;  %v996_v38 = vadd.f32 %v995_v29, %v994_v17  ;;  %v1009_v39 = vrot.slane %v971_v26, 4  ;;  %v1039_v58 = vunpack.c.l.b16 %v1023_v47  ;;  %v9855_v25 = vpop.f32.mrb[1].mxu1  ;;  %v8582_v29 = vld [vmem:[#allocation14] sm:$0xff]  }
 0x344   :  { %v984_v40 = vadd.f32 %v983_v31, %v982_v22  ;;  %v1000_v60 = vadd.f32 %v999_v34, %v998_v23  ;;  %v1005_v41 = vrot.slane %v1004_v19, 2  ;;  %v1037_v54 = vunpack.c.l.b16 %v1021_v42  ;;  %v8583_v34 = vld [vmem:[#allocation14 + $0x8] sm:$0xff]  }
 0x345   :  { %v1010_v43 = vadd.f32 %v1009_v39, %v971_v26  ;;  %v1015_v44 = vrot.slane %v972_v37, 4  ;;  %v1024_v3 = vpack.c.bf16 %v996_v38, %v996_v38  ;;  %v203_v16 = vpack.i.b16 %v202_v9, %v202_v9  ;;  %v481_v26 = vpop.f32.mrb[2].mxu1  ;;  %v8586_v38 = vld [vmem:[#allocation14 + $0x20] sm:$0xff]   ;;  %v8587_v39 = vld [vmem:[#allocation14 + $0x28] sm:$0xff]  }
 0x346   :  { %v1001_v48 = vrot.slane %v1000_v60, 1  ;;  %v1006_v49 = vadd.f32 %v1005_v41, %v1004_v19  ;;  %v1022_v50 = vpack.c.bf16 %v984_v40, %v984_v40  ;;  %v482_v28 = vpop.f32.mrb[3].mxu1  ;;  %v9551_v31 = vmov 0.0   ;;  %v8584_v19 = vld [vmem:[#allocation14 + $0x10] sm:$0xff]   ;;  %v175_v42 = vld [vmem:[%s10354_s11] sm:$0x7] }
 0x347   :  { %v1011_v21 = vrot.slane %v1010_v43, 2  ;;  %v1016_v51 = vadd.f32 %v1015_v44, %v972_v37  ;;  %v1040_v62 = vunpack.c.l.b16 %v1024_v3  ;;  %v208_v22 = vrot.slane %v203_v16, %v9787_v45  ;;  %8224 = vmatprep.subr.bf16.mxu0 %v9551_v31  ;;  %8244 = vmatprep.subr.bf16.mxu1 %v9551_v31  ;;  %v8585_v37 = vld [vmem:[#allocation14 + $0x18] sm:$0xff]   ;;  %v8588_v40 = vld [vmem:[#allocation14 + $0x30] sm:$0xff]   ;;  %v158_v44 = vld [vmem:[%s10353_s10] sm:$0x7] }
 0x348   :  { %v1002_v24 = vadd.f32 %v1001_v48, %v1000_v60  ;;  %v1007_v53 = vrot.slane %v1006_v49, 1  ;;  %v1038_v55 = vunpack.c.l.b16 %v1022_v50  ;;  %v8589_v60 = vld [vmem:[#allocation14 + $0x38] sm:$0xff]   ;;  %v8592_v41 = vld [vmem:[#allocation10 + $0x4] ss:$16 sps:$4 sm:$0xff]   ;;  %v9878_v47 = vrot.slane %v175_v42, %v9787_v45  ;;  %v9320_v16 = vld [vmem:[%s10346_s3] sm:$0xff] }
 0x349   :  { %v1012_v56 = vadd.f32 %v1011_v21, %v1010_v43  ;;  %v1017_v57 = vrot.slane %v1016_v51, 2  ;;  %v166_v43 = vsub.s32 1, %v9776_v30  ;;  %v9881_v48 = vrot.slane %v158_v44, %v9787_v45  ;;  %v8596_v26 = vld [vmem:[#allocation10 + $0x40] ss:$16 sps:$4 sm:$0xff]   ;;  %v8601_v28 = vld [vmem:[#allocation10 + $0x64] ss:$16 sps:$4 sm:$0xff]  }
 0x34a   :  { %v1008_v59 = vadd.f32 %v1007_v53, %v1006_v49  ;;  %v1025_v61 = vpack.c.bf16 %v1002_v24, %v1002_v24  ;;  %v1046_v63 = vsel %vm1045_vm0, %v1038_v55, %v1037_v54 }
 0x34b   :  { %v1013_v1 = vrot.slane %v1012_v56, 1  ;;  %v1018_v2 = vadd.f32 %v1017_v57, %v1016_v51  ;;  %v1048_v4 = vsel %vm1047_vm1, %v1039_v58, %v1046_v63  ;;  %v9883_v49 = vrot.slane %v175_v42, %v166_v43 }
 0x34c   :  { %v1026_v35 = vpack.c.bf16 %v1008_v59, %v1008_v59  ;;  %v1041_v5 = vunpack.c.l.b16 %v1025_v61  ;;  %v1050_v6 = vsel %vm1049_vm2, %v1040_v62, %v1048_v4  ;;  %v9885_v50 = vrot.slane %v158_v44, %v166_v43  ;;  %v8615_v43 = vld [vmem:[#allocation11 + $0x8] sm:$0xff]  }
 0x34d   :  { %v1014_v7 = vadd.f32 %v1013_v1, %v1012_v56  ;;  %v1019_v8 = vrot.slane %v1018_v2, 1  ;;  %v1462_v51 = vadd.f32 %v9782_v36, %v9878_v47  ;;  %v1463_v55 = vadd.f32 %v477_v52, %v9883_v49  ;;  %v8593_v52 = vld [vmem:[#allocation10 + $0x20] ss:$16 sps:$4 sm:$0xff]  }
 0x34e   :  { %v1042_v10 = vunpack.c.l.b16 %v1026_v35  ;;  %v1052_v11 = vsel %vm1051_vm3, %v1041_v5, %v1050_v6  ;;  %v170_v35 = vsub.s32 2, %v9776_v30 }
 0x34f   :  { %v1020_v12 = vadd.f32 %v1019_v8, %v1018_v2  ;;  %v1027_v13 = vpack.c.bf16 %v1014_v7, %v1014_v7 }
 0x350   :  { %v1054_v14 = vsel %vm1053_vm4, %v1042_v10, %v1052_v11  ;;  %v9893_v6 = vrot.slane %v175_v42, %v170_v35  ;;  %v9895_v7 = vrot.slane %v158_v44, %v170_v35  ;;  %v8614_v42 = vld [vmem:[#allocation11] sm:$0xff]   ;;  %v8616_v44 = vld [vmem:[#allocation11 + $0x10] sm:$0xff]   ;;  %v8632_v35 = vld [vmem:[#allocation10 + $0xc] ss:$16 sps:$4 sm:$0xff]  }
 0x351   :  { %v1028_v46 = vpack.c.bf16 %v1020_v12, %v1020_v12  ;;  %v1043_v15 = vunpack.c.l.b16 %v1027_v13 }
 0x352   :  { %v1464_v9 = vadd.f32 %v9855_v25, %v9893_v6  ;;  %v8598_v25 = vld [vmem:[#allocation10 + $0x44] ss:$16 sps:$4 sm:$0xff]  }
 0x353   :  { %v1044_v17 = vunpack.c.l.b16 %v1028_v46  ;;  %v1056_v18 = vsel %vm1055_vm5, %v1043_v15, %v1054_v14 }
 0x355   :  { %v1058_v20 = vsel %vm1057_vm6, %v1044_v17, %v1056_v18 }
 0x356   :  { %v1059_v23 = vpack.c.b16 %v1058_v20, %v1058_v20  ;;  %v8590_v20 = vld [vmem:[#allocation10] ss:$16 sps:$4 sm:$0xff]  }
 0x358   :  { %1413 = vmatprep.mubr.bf16.mxu1 %v1059_v23  ;;  %1454 = vmatprep.mubr.bf16.mxu0 %v1059_v23  ;;  %v8595_v23 = vld [vmem:[#allocation10 + $0x24] ss:$16 sps:$4 sm:$0xff]  }
 0x359   :  { %1414 = vmatmul.mubr.bf16.vlgmr.msra.gmra.mrb[4].mxu1 %v208_v22  ;;  %1455 = vmatmul.mubr.bf16.vlgmr.msra.gmra.mrb[12].mxu0 %v208_v22 }
 0x35a   :  { %8225 = vmatpush3.bf16.msra.mxu0 %v8582_v29  ;;  %8240 = vmatprep.mubr.msk.bf16.mxu0 %vm9552_vm7, %v9551_v31  ;;  %v8599_v29 = vld [vmem:[#allocation10 + $0x60] ss:$16 sps:$4 sm:$0xff]  }
 0x35b   :  { %8226 = vmatprep.subr.bf16.mxu0 %v9551_v31  ;;  %8260 = vmatprep.mubr.msk.bf16.mxu1 %vm9552_vm7, %v9551_v31 }
 0x35e   :  { %8227 = vmatpush3.bf16.msra.mxu0 %v8583_v34  ;;  %v8604_v34 = vld [vmem:[#allocation10 + $0x84] ss:$16 sps:$4 sm:$0xff]  }
 0x35f   :  { %8228 = vmatprep.subr.bf16.mxu0 %v9551_v31 }
 0x362   :  { %8229 = vmatpush3.bf16.msra.mxu0 %v8584_v19  ;;  %v8602_v19 = vld [vmem:[#allocation10 + $0x80] ss:$16 sps:$4 sm:$0xff]  }
 0x363   :  { %8230 = vmatprep.subr.bf16.mxu0 %v9551_v31 }
 0x366   :  { %8231 = vmatpush3.bf16.msra.mxu0 %v8585_v37  ;;  %v8607_v37 = vld [vmem:[#allocation10 + $0xa4] ss:$16 sps:$4 sm:$0xff]  }
 0x367   :  { %8232 = vmatprep.subr.bf16.mxu0 %v9551_v31 }
 0x36a   :  { %8233 = vmatpush3.bf16.msra.mxu0 %v8586_v38  ;;  %v8605_v38 = vld [vmem:[#allocation10 + $0xa0] ss:$16 sps:$4 sm:$0xff]  }
 0x36b   :  { %8234 = vmatprep.subr.bf16.mxu0 %v9551_v31 }
 0x36e   :  { %8235 = vmatpush3.bf16.msra.mxu0 %v8587_v39  ;;  %v8610_v39 = vld [vmem:[#allocation10 + $0xc4] ss:$16 sps:$4 sm:$0xff]  }
 0x36f   :  { %8236 = vmatprep.subr.bf16.mxu0 %v9551_v31 }
 0x372   :  { %8237 = vmatpush3.bf16.msra.mxu0 %v8588_v40  ;;  %v8608_v40 = vld [vmem:[#allocation10 + $0xc0] ss:$16 sps:$4 sm:$0xff]  }
 0x373   :  { %8238 = vmatprep.subr.bf16.mxu0 %v9551_v31 }
 0x376   :  { %8239 = vmatpush3.bf16.msra.mxu0 %v8589_v60  ;;  %v8613_v60 = vld [vmem:[#allocation10 + $0xe4] ss:$16 sps:$4 sm:$0xff]  }
 0x377   :  { %1896 = vmatprep.subr.bf16.mxu0 %v8592_v41  ;;  %v8611_v41 = vld [vmem:[#allocation10 + $0xe0] ss:$16 sps:$4 sm:$0xff]  }
 0x42c   :  { %v1415_v3 = vpop.f32.mrb[4].mxu1  ;;  %v8004_v21 = vpop.f32.mrb[12].mxu0 }
 0x42d   :  { %v1416_v24 = vadd.f32 %v1415_v3, %v9881_v48  ;;  %v1417_v53 = vpop.f32.mrb[5].mxu1  ;;  %v8005_v54 = vpop.f32.mrb[13].mxu0  ;;  %v8617_v3 = vld [vmem:[#allocation11 + $0x18] sm:$0xff]  }
 0x42e   :  { %v1418_v56 = vadd.f32 %v1417_v53, %v9885_v50  ;;  %v1419_v57 = vpop.f32.mrb[6].mxu1  ;;  %v8006_v58 = vadd.f32 %v8005_v54, %v8004_v21  ;;  %v8007_v59 = vpop.f32.mrb[14].mxu0  ;;  %v8618_v21 = vld [vmem:[#allocation11 + $0x20] sm:$0xff]   ;;  %v8621_v53 = vld [vmem:[#allocation11 + $0x38] sm:$0xff]  }
 0x42f   :  { %v1465_v61 = vadd.f32 %v1462_v51, %v1416_v24  ;;  %v1420_v62 = vpop.f32.mrb[7].mxu1  ;;  %v8008_v63 = vpop.f32.mrb[15].mxu0  ;;  %v8619_v51 = vld [vmem:[#allocation11 + $0x28] sm:$0xff]   ;;  %v8620_v24 = vld [vmem:[#allocation11 + $0x30] sm:$0xff]   ;;  %v8622_v54 = vld [vmem:[#allocation8] sm:$0xff]  }
 0x430   :  { %v1472_v33 = vadd.f32 %v1463_v55, %v1418_v56  ;;  %v1457_v10 = vadd.f32 %v8006_v58, %v9895_v7  ;;  %8245 = vmatpush3.bf16.msra.mxu1 %v8622_v54  ;;  %v8623_v55 = vld [vmem:[#allocation8 + $0x8] sm:$0xff]   ;;  %v8624_v56 = vld [vmem:[#allocation8 + $0x10] sm:$0xff]   ;;  %v8625_v57 = vld [vmem:[#allocation8 + $0x18] sm:$0xff]  }
 0x431   :  { %v7330_v1 = vmul.f32 -1.442695, %v1465_v61  ;;  %8246 = vmatprep.subr.bf16.mxu1 %v9551_v31  ;;  %v8626_v58 = vld [vmem:[#allocation8 + $0x20] sm:$0xff]   ;;  %v8627_v59 = vld [vmem:[#allocation8 + $0x28] sm:$0xff]   ;;  %v8628_v61 = vld [vmem:[#allocation8 + $0x30] sm:$0xff]  }
 0x432   :  { %v7331_v2 = vmul.f32 -1.442695, %v1472_v33  ;;  %v8629_v62 = vld [vmem:[#allocation8 + $0x38] sm:$0xff]   ;;  %v7235_v63 = vld [vmem:[%s10356_s13] ss:$0 sm:$0xff] }
 0x433   :  { %9142 = vpow2.f32 %v7330_v1 }
 0x434   :  { %9144 = vpow2.f32 %v7331_v2  ;;  %8247 = vmatpush3.bf16.msra.mxu1 %v8623_v55 }
 0x435   :  { %8248 = vmatprep.subr.bf16.mxu1 %v9551_v31 }
 0x438   :  { %8249 = vmatpush3.bf16.msra.mxu1 %v8624_v56 }
 0x439   :  { %8250 = vmatprep.subr.bf16.mxu1 %v9551_v31 }
 0x43c   :  { %8251 = vmatpush3.bf16.msra.mxu1 %v8625_v57 }
 0x43d   :  { %v9143_v36 = vpop.eup %9142  ;;  %8252 = vmatprep.subr.bf16.mxu1 %v9551_v31 }
 0x43e   :  { %v1469_v4 = vadd.f32 1.0, %v9143_v36  ;;  %v9145_v5 = vpop.eup %9144 }
 0x43f   :  { %v1476_v8 = vadd.f32 1.0, %v9145_v5 }
 0x440   :  { %9146 = vrcp.f32 %v1469_v4  ;;  %8253 = vmatpush3.bf16.msra.mxu1 %v8626_v58 }
 0x441   :  { %9148 = vrcp.f32 %v1476_v8  ;;  %8254 = vmatprep.subr.bf16.mxu1 %v9551_v31 }
 0x444   :  { %8255 = vmatpush3.bf16.msra.mxu1 %v8627_v59 }
 0x445   :  { %8256 = vmatprep.subr.bf16.mxu1 %v9551_v31 }
 0x448   :  { %8257 = vmatpush3.bf16.msra.mxu1 %v8628_v61 }
 0x449   :  { %8258 = vmatprep.subr.bf16.mxu1 %v9551_v31 }
 0x44a   :  { %v9147_v11 = vpop.eup %9146 }
 0x44b   :  { %v1479_v12 = vmul.f32 %v9147_v11, %v1464_v9  ;;  %v9149_v14 = vpop.eup %9148  ;;  %v7819_v11 = vld [vmem:[#allocation5] sm:$0xff]  }
 0x44c   :  { %v1482_v46 = vsub.f32 1.0, %v9149_v14  ;;  %v1484_v17 = vmul.f32 %v9320_v16, %v9149_v14  ;;  %8259 = vmatpush3.bf16.msra.mxu1 %v8629_v62  ;;  %v7953_v16 = vld [vmem:[#allocation5 + $0x10] sm:$0xff]  }
 0x44d   :  { %v1480_v13 = vadd.f32 %v1479_v12, %v1457_v10  ;;  %1937 = vmatprep.subr.bf16.mxu1 %v8632_v35 }
 0x44f   :  { %9150 = vtanh.f32 %v1480_v13  ;;  %v7952_v13 = vld [vmem:[#allocation5 + $0x8] sm:$0xff]  }
 0x459   :  { %v9151_v15 = vpop.eup %9150 }
 0x45a   :  { %v1483_v30 = vmul.f32 %v9151_v15, %v1482_v46 }
 0x45c   :  { %v9903_v18 = vadd.f32 %v1484_v17, %v1483_v30  ;;  %v7820_v17 = vunpack.c.l.bf16 %v7819_v11 }
 0x45e   :  { %v9907_v22 = vpack.c.bf16 %v9903_v18, %v9903_v18 }
 0x460   :  { %8241 = vmatmul.mubr.bf16.vlgmr.msra.gmra.mrb[16].mxu0 %v9907_v22 }
 0x461   :  { %1897 = vmatpush1.bf16.msra.mxu0 %v8590_v20  ;;  %1928 = vmatprep.mubr.bf16.mxu0 %v9549_v0  ;;  %v7821_v20 = vunpack.c.h.bf16 %v7819_v11 }
 0x462   :  { %1898 = vmatprep.subr.bf16.mxu0 %v8595_v23 }
 0x465   :  { %1899 = vmatpush1.bf16.msra.mxu0 %v8593_v52 }
 0x466   :  { %1900 = vmatprep.subr.bf16.mxu0 %v8598_v25 }
 0x469   :  { %1901 = vmatpush1.bf16.msra.mxu0 %v8596_v26 }
 0x46a   :  { %1902 = vmatprep.subr.bf16.mxu0 %v8601_v28  ;;  %v7824_v28 = vunpack.c.l.bf16 %v7952_v13 }
 0x46d   :  { %1903 = vmatpush1.bf16.msra.mxu0 %v8599_v29 }
 0x46e   :  { %1904 = vmatprep.subr.bf16.mxu0 %v8604_v34  ;;  %v7825_v34 = vunpack.c.h.bf16 %v7952_v13 }
 0x471   :  { %1905 = vmatpush1.bf16.msra.mxu0 %v8602_v19  ;;  %v7828_v19 = vunpack.c.l.bf16 %v7953_v16 }
 0x472   :  { %1906 = vmatprep.subr.bf16.mxu0 %v8607_v37 }
 0x475   :  { %1907 = vmatpush1.bf16.msra.mxu0 %v8605_v38 }
 0x476   :  { %1908 = vmatprep.subr.bf16.mxu0 %v8610_v39 }
 0x479   :  { %1909 = vmatpush1.bf16.msra.mxu0 %v8608_v40  ;;  %v7829_v40 = vunpack.c.h.bf16 %v7953_v16  ;;  %v9553_v16 = vmov 1.0|1.0  }
 0x47a   :  { %1910 = vmatprep.subr.bf16.mxu0 %v8613_v60 }
 0x47d   :  { %1911 = vmatpush1.bf16.msra.mxu0 %v8611_v41 }
 0x47e   :  { %8264 = vmatprep.subr.bf16.mxu0 %v8614_v42 }
 0x480   :  { %1929 = vmatmul.mubr.bf16.vlgmr.msra.gmra.mrb[20].mxu0 %v9907_v22 }
 0x481   :  { %8265 = vmatpush3.bf16.msra.mxu0 %v8614_v42 }
 0x482   :  { %8266 = vmatprep.subr.bf16.mxu0 %v8615_v43 }
 0x485   :  { %8267 = vmatpush3.bf16.msra.mxu0 %v8615_v43 }
 0x486   :  { %8268 = vmatprep.subr.bf16.mxu0 %v8616_v44 }
 0x489   :  { %8269 = vmatpush3.bf16.msra.mxu0 %v8616_v44 }
 0x48a   :  { %8270 = vmatprep.subr.bf16.mxu0 %v8617_v3 }
 0x48d   :  { %8271 = vmatpush3.bf16.msra.mxu0 %v8617_v3 }
 0x48e   :  { %8272 = vmatprep.subr.bf16.mxu0 %v8618_v21 }
 0x491   :  { %8273 = vmatpush3.bf16.msra.mxu0 %v8618_v21 }
 0x492   :  { %8274 = vmatprep.subr.bf16.mxu0 %v8619_v51 }
 0x495   :  { %8275 = vmatpush3.bf16.msra.mxu0 %v8619_v51 }
 0x496   :  { %8276 = vmatprep.subr.bf16.mxu0 %v8620_v24 }
 0x499   :  { %8277 = vmatpush3.bf16.msra.mxu0 %v8620_v24  ;;  %v7954_v24 = vld [vmem:[#allocation5 + $0x18] sm:$0xff]  }
 0x49a   :  { %8278 = vmatprep.subr.bf16.mxu0 %v8621_v53  ;;  %v7833_v56 = vunpack.c.h.bf16 %v7954_v24 }
 0x49d   :  { %8279 = vmatpush3.bf16.msra.mxu0 %v8621_v53 }
 0x533   :  { %v1585_v33 = vpop.f32.mrb[16].mxu0 }
 0x534   :  { %v1586_v1 = vadd.f32 %v7235_v63, %v1585_v33  ;;  %v8242_v2 = vpop.f32.mrb[17].mxu0  ;;  %v7832_v63 = vunpack.c.l.bf16 %v7954_v24 }
 0x535   :  { %v1588_v36 = vpop.f32.mrb[18].mxu0 }
 0x536   :  { %1591 = vst [vmem:[#allocation16] sm:$0xff] %v1586_v1  ;;  %1592 = vmax.index.xlane.f32.xlu0 %v1586_v1  ;;  %v8243_v4 = vpop.f32.mrb[19].mxu0 }
 0x553   :  { %v1930_v5 = vpop.f32.mrb[20].mxu0 }
 0x554   :  { %v1987_v8 = vcombine.high %v1930_v5, %v1930_v5  ;;  %v1994_v9 = vrot.slane %v1930_v5, %v9779_v32  ;;  %v9923_v10 = vpop.f32.mrb[21].mxu0 }
 0x555   :  { %v1934_v12 = vpop.f32.mrb[22].mxu0 }
 0x556   :  { %v2001_v14 = vrot.slane %v1987_v8, %v9779_v32  ;;  %v2002_v46 = vcombine.high %v1994_v9, %v1994_v9  ;;  %v2010_v15 = vrot.slane %v1994_v9, %v9779_v32  ;;  %v1935_v30 = vpop.f32.mrb[23].mxu0 }
 0x557   :  { %v8635_v30 = vld [vmem:[#allocation10 + $0x2c] ss:$16 sps:$4 sm:$0xff]  }
 0x558   :  { %v2003_v23 = vcombine.high %v2001_v14, %v2001_v14  ;;  %v2017_v52 = vrot.slane %v2001_v14, %v9779_v32  ;;  %v2024_v25 = vrot.slane %v2002_v46, %v9779_v32  ;;  %v2032_v26 = vcombine.high %v2010_v15, %v2010_v15 }
 0x559   :  { %v2047_v29 = vrot.slane %v2010_v15, %v9787_v45  ;;  %v1595_v14 = vand.u32 127, %v160_v27  ;;  %v8630_v15 = vld [vmem:[#allocation10 + $0x8] ss:$16 sps:$4 sm:$0xff]   ;;  %v8644_v27 = vld [vmem:[#allocation10 + $0x8c] ss:$16 sps:$4 sm:$0xff]  }
 0x55a   :  { %v2031_v37 = vrot.slane %v2003_v23, %v9779_v32  ;;  %v2034_v38 = vcombine.high %v2024_v25, %v2024_v25  ;;  %v2051_v39 = vrot.slane %v2024_v25, %v9787_v45  ;;  %v2033_v60 = vcombine.high %v2017_v52, %v2017_v52  ;;  %v8636_v23 = vld [vmem:[#allocation10 + $0x48] ss:$16 sps:$4 sm:$0xff]  }
 0x55b   :  { %v2055_v41 = vrot.slane %v2032_v26, %v9787_v45  ;;  %v2063_v42 = vrot.slane %v2017_v52, %v9787_v45  ;;  %v2084_v43 = vadd.f32 %v7820_v17, %v2047_v29  ;;  %v8633_v17 = vld [vmem:[#allocation10 + $0x28] ss:$16 sps:$4 sm:$0xff]   ;;  %v8641_v52 = vld [vmem:[#allocation10 + $0x6c] ss:$16 sps:$4 sm:$0xff]  }
 0x55c   :  { %v2035_v44 = vcombine.high %v2031_v37, %v2031_v37  ;;  %v2059_v3 = vrot.slane %v2034_v38, %v9787_v45  ;;  %v2085_v21 = vadd.f32 %v7821_v20, %v2051_v39  ;;  %v2067_v51 = vrot.slane %v2031_v37, %v9787_v45  ;;  %v8638_v20 = vld [vmem:[#allocation10 + $0x4c] ss:$16 sps:$4 sm:$0xff]   ;;  %v8639_v25 = vld [vmem:[#allocation10 + $0x68] ss:$16 sps:$4 sm:$0xff]  }
 0x55d   :  { %v2086_v53 = vadd.f32 %v7824_v28, %v2055_v41  ;;  %v2092_v54 = vmax.f32 %v2084_v43, 0.0  ;;  %v2088_v55 = vadd.f32 %v7828_v19, %v2063_v42  ;;  %v2071_v33 = vrot.slane %v2033_v60, %v9787_v45  ;;  %v8642_v26 = vld [vmem:[#allocation10 + $0x88] ss:$16 sps:$4 sm:$0xff]   ;;  %v8647_v28 = vld [vmem:[#allocation10 + $0xac] ss:$16 sps:$4 sm:$0xff]  }
 0x55e   :  { %v2093_v57 = vmax.f32 %v2085_v21, 0.0  ;;  %v2087_v58 = vadd.f32 %v7825_v34, %v2059_v3  ;;  %v2089_v59 = vadd.f32 %v7829_v40, %v2067_v51  ;;  %v2075_v61 = vrot.slane %v2035_v44, %v9787_v45  ;;  %v8645_v29 = vld [vmem:[#allocation10 + $0xa8] ss:$16 sps:$4 sm:$0xff]   ;;  %v8650_v34 = vld [vmem:[#allocation10 + $0xcc] ss:$16 sps:$4 sm:$0xff]  }
 0x55f   :  { %v2094_v62 = vmax.f32 %v2086_v53, 0.0  ;;  %v2096_v36 = vmax.f32 %v2088_v55, 0.0  ;;  %v2090_v9 = vadd.f32 %v7832_v63, %v2071_v33  ;;  %v8648_v19 = vld [vmem:[#allocation10 + $0xc8] ss:$16 sps:$4 sm:$0xff]   ;;  %v8653_v37 = vld [vmem:[#allocation10 + $0xec] ss:$16 sps:$4 sm:$0xff]  }
 0x560   :  { %v7770_v1 = vpack.c.bf16 %v2093_v57, %v2092_v54  ;;  %v2095_v2 = vmax.f32 %v2087_v58, 0.0  ;;  %v2097_v4 = vmax.f32 %v2089_v59, 0.0  ;;  %v2091_v8 = vadd.f32 %v7833_v56, %v2075_v61  ;;  %v8651_v38 = vld [vmem:[#allocation10 + $0xe8] ss:$16 sps:$4 sm:$0xff]   ;;  %v7382_v39 = vld [vmem:[%s10350_s7] ss:$0 sm:$0xff] }
 0x561   :  { %v2098_v12 = vmax.f32 %v2090_v9, 0.0  ;;  %v7395_v44 = vld [vmem:[%s10351_s8] ss:$0 sm:$0xff] }
 0x562   :  { %8280 = vmatprep.mubr.bf16.mxu0 %v7770_v1  ;;  %v7771_v35 = vpack.c.bf16 %v2095_v2, %v2094_v62  ;;  %v7772_v5 = vpack.c.bf16 %v2097_v4, %v2096_v36  ;;  %v2099_v11 = vmax.f32 %v2091_v8, 0.0 }
 0x564   :  { %8281 = vmatmul.mubr.bf16.vlgmr.msra.gmra.mrb[24].mxu0 %v7771_v35  ;;  %v7773_v13 = vpack.c.bf16 %v2099_v11, %v2098_v12 }
 0x565   :  { %8284 = vmatprep.mubr.bf16.mxu0 %v7772_v5 }
 0x56c   :  { %8285 = vmatmul.mubr.bf16.gmra.mrb[28].mxu0 %v7773_v13 }
 0x5c3   :  { %v1593_v46 = vpop.xlane.xlu0 %1592 }
 0x5c4   :  { %vm1596_vm8 = vcmp.eq.s32.totalorder %v1595_v14, %v1593_v46  ;;  %v8656_v14 = vld [vmem:[#allocation13 + $0x4] ss:$12 sps:$4 sm:$0xff]   ;;  %v8654_v46 = vld [vmem:[#allocation13] ss:$12 sps:$4 sm:$0xff]  }
 0x5c5   :  { %vm7348_vm9 = vmpackc.low %vm1596_vm8, %vm1596_vm8 }
 0x5c6   :  { %8261 = vmatmul.mubr.msk.bf16.vlgmr.msra.gmra.mrb[8].mxu1 %vm7348_vm9, %v9553_v16  ;;  %v8662_v16 = vld [vmem:[#allocation13 + $0x34] ss:$12 sps:$4 sm:$0xff]  }
 0x5c7   :  { %1938 = vmatpush1.bf16.msra.mxu1 %v8630_v15  ;;  %1969 = vmatprep.mubr.bf16.mxu1 %v9549_v0  ;;  %v8659_v15 = vld [vmem:[#allocation13 + $0x1c] ss:$12 sps:$4 sm:$0xff]  }
 0x5c8   :  { %1939 = vmatprep.subr.bf16.mxu1 %v8635_v30  ;;  %v8657_v30 = vld [vmem:[#allocation13 + $0x18] ss:$12 sps:$4 sm:$0xff]  }
 0x5cb   :  { %1940 = vmatpush1.bf16.msra.mxu1 %v8633_v17  ;;  %v8660_v17 = vld [vmem:[#allocation13 + $0x30] ss:$12 sps:$4 sm:$0xff]  }
 0x5cc   :  { %1941 = vmatprep.subr.bf16.mxu1 %v8638_v20  ;;  %v8665_v20 = vld [vmem:[#allocation13 + $0x4c] ss:$12 sps:$4 sm:$0xff]  }
 0x5cf   :  { %1942 = vmatpush1.bf16.msra.mxu1 %v8636_v23  ;;  %v8663_v23 = vld [vmem:[#allocation13 + $0x48] ss:$12 sps:$4 sm:$0xff]  }
 0x5d0   :  { %1943 = vmatprep.subr.bf16.mxu1 %v8641_v52  ;;  %v8668_v52 = vld [vmem:[#allocation13 + $0x64] ss:$12 sps:$4 sm:$0xff]  }
 0x5d3   :  { %1944 = vmatpush1.bf16.msra.mxu1 %v8639_v25  ;;  %v8666_v25 = vld [vmem:[#allocation13 + $0x60] ss:$12 sps:$4 sm:$0xff]  }
 0x5d4   :  { %1945 = vmatprep.subr.bf16.mxu1 %v8644_v27  ;;  %v8671_v27 = vld [vmem:[#allocation13 + $0x7c] ss:$12 sps:$4 sm:$0xff]  }
 0x5d7   :  { %1946 = vmatpush1.bf16.msra.mxu1 %v8642_v26  ;;  %v8669_v26 = vld [vmem:[#allocation13 + $0x78] ss:$12 sps:$4 sm:$0xff]  }
 0x5d8   :  { %1947 = vmatprep.subr.bf16.mxu1 %v8647_v28  ;;  %v8674_v28 = vld [vmem:[#allocation13 + $0x94] ss:$12 sps:$4 sm:$0xff]  }
 0x5db   :  { %1948 = vmatpush1.bf16.msra.mxu1 %v8645_v29  ;;  %v8672_v29 = vld [vmem:[#allocation13 + $0x90] ss:$12 sps:$4 sm:$0xff]  }
 0x5dc   :  { %1949 = vmatprep.subr.bf16.mxu1 %v8650_v34  ;;  %v8677_v34 = vld [vmem:[#allocation13 + $0xac] ss:$12 sps:$4 sm:$0xff]  }
 0x5df   :  { %1950 = vmatpush1.bf16.msra.mxu1 %v8648_v19  ;;  %v8675_v19 = vld [vmem:[#allocation13 + $0xa8] ss:$12 sps:$4 sm:$0xff]  }
 0x5e0   :  { %1951 = vmatprep.subr.bf16.mxu1 %v8653_v37  ;;  %v8678_v37 = vld [vmem:[#allocation13 + $0xc0] ss:$12 sps:$4 sm:$0xff]  }
 0x5e3   :  { %1952 = vmatpush1.bf16.msra.mxu1 %v8651_v38  ;;  %v8680_v38 = vld [vmem:[#allocation13 + $0xc4] ss:$12 sps:$4 sm:$0xff]  }
 0x5e4   :  { %2868 = vmatprep.subr.bf16.mxu1 %v8656_v14 }
 0x5e6   :  { %1970 = vmatmul.mubr.bf16.vlgmr.msra.gmra.mrb[12].mxu1 %v9907_v22 }
 0x5e7   :  { %2869 = vmatpush1.bf16.msra.mxu1 %v8654_v46 }
 0x5e8   :  { %2870 = vmatprep.subr.bf16.mxu1 %v8659_v15 }
 0x5eb   :  { %2871 = vmatpush1.bf16.msra.mxu1 %v8657_v30 }
 0x5ec   :  { %2872 = vmatprep.subr.bf16.mxu1 %v8662_v16 }
 0x5ef   :  { %2873 = vmatpush1.bf16.msra.mxu1 %v8660_v17 }
 0x5f0   :  { %2874 = vmatprep.subr.bf16.mxu1 %v8665_v20 }
 0x5f3   :  { %2875 = vmatpush1.bf16.msra.mxu1 %v8663_v23 }
 0x5f4   :  { %2876 = vmatprep.subr.bf16.mxu1 %v8668_v52 }
 0x5f7   :  { %2877 = vmatpush1.bf16.msra.mxu1 %v8666_v25 }
 0x5f8   :  { %2878 = vmatprep.subr.bf16.mxu1 %v8671_v27 }
 0x5fb   :  { %2879 = vmatpush1.bf16.msra.mxu1 %v8669_v26 }
 0x5fc   :  { %2880 = vmatprep.subr.bf16.mxu1 %v8674_v28 }
 0x5ff   :  { %2881 = vmatpush1.bf16.msra.mxu1 %v8672_v29 }
 0x600   :  { %2882 = vmatprep.subr.bf16.mxu1 %v8677_v34 }
 0x603   :  { %2883 = vmatpush1.bf16.msra.mxu1 %v8675_v19 }
 0x604   :  { %2884 = vmatprep.subr.bf16.mxu1 %v8680_v38 }
 0x607   :  { %2885 = vmatpush1.bf16.msra.mxu1 %v8678_v37 }
 0x637   :  { %v8282_v40 = vpop.f32.mrb[24].mxu0 }
 0x638   :  { %v2246_v60 = vadd.f32 %v8282_v40, %v7382_v39  ;;  %v2237_v41 = vpop.f32.mrb[25].mxu0  ;;  %v8682_v40 = vld [vmem:[#allocation13 + $0x8] ss:$12 sps:$4 sm:$0xff]  }
 0x639   :  { %v2238_v42 = vadd.f32 %v7382_v39, %v2237_v41  ;;  %v8283_v43 = vpop.f32.mrb[26].mxu0  ;;  %v8686_v41 = vld [vmem:[#allocation13 + $0xe0] ss:$12 sps:$4 sm:$0xff]  }
 0x63a   :  { %v2270_v3 = vmax.f32 %v2246_v60, 0.0  ;;  %v2249_v21 = vadd.f32 %v8283_v43, %v7382_v39  ;;  %v2240_v51 = vpop.f32.mrb[27].mxu0  ;;  %v8685_v60 = vld [vmem:[#allocation13 + $0xdc] ss:$12 sps:$4 sm:$0xff]   ;;  %v8687_v43 = vld [vmem:[#allocation13 + $0x20] ss:$12 sps:$4 sm:$0xff]  }
 0x63b   :  { %v2241_v24 = vadd.f32 %v7382_v39, %v2240_v51  ;;  %v2268_v53 = vmax.f32 %v2238_v42, 0.0  ;;  %v8683_v42 = vld [vmem:[#allocation13 + $0xd8] ss:$12 sps:$4 sm:$0xff]   ;;  %2886 = vmatprep.subr.bf16.mxu1 %v8685_v60 }
 0x63c   :  { %v2271_v54 = vmax.f32 %v2249_v21, 0.0  ;;  %v2285_v22 = vmul.f32 %v7395_v44, %v2270_v3  ;;  %v8691_v3 = vld [vmem:[#allocation13 + $0xf8] ss:$12 sps:$4 sm:$0xff]   ;;  %2887 = vmatpush1.bf16.msra.mxu1 %v8683_v42  ;;  %v8688_v21 = vld [vmem:[#allocation13 + $0xf0] ss:$12 sps:$4 sm:$0xff]  }
 0x63d   :  { %v2269_v55 = vmax.f32 %v2241_v24, 0.0  ;;  %v2283_v59 = vmul.f32 %v7395_v44, %v2268_v53  ;;  %v8692_v51 = vld [vmem:[#allocation13 + $0x38] ss:$12 sps:$4 sm:$0xff]   ;;  %v8696_v53 = vld [vmem:[#allocation13 + $0x110] ss:$12 sps:$4 sm:$0xff]  }
 0x63e   :  { %2295 = vadd.xlane.f32.xlu1 %v2285_v22  ;;  %v2286_v56 = vmul.f32 %v7395_v44, %v2271_v54  ;;  %v8695_v24 = vld [vmem:[#allocation13 + $0x10c] ss:$12 sps:$4 sm:$0xff]   ;;  %v8693_v54 = vld [vmem:[#allocation13 + $0x108] ss:$12 sps:$4 sm:$0xff]   ;;  %v8697_v22 = vld [vmem:[#allocation13 + $0x50] ss:$12 sps:$4 sm:$0xff]  }
 0x63f   :  { %v8286_v57 = vpop.f32.mrb[28].mxu0  ;;  %v2284_v1 = vmul.f32 %v7395_v44, %v2269_v55  ;;  %v8700_v55 = vld [vmem:[#allocation13 + $0x124] ss:$12 sps:$4 sm:$0xff]  }
 0x640   :  { %2297 = vadd.xlane.f32.xlu0 %v2286_v56  ;;  %v2253_v58 = vpop.f32.mrb[29].mxu0  ;;  %v2262_v61 = vadd.f32 %v8286_v57, %v7382_v39  ;;  %v8701_v56 = vld [vmem:[#allocation13 + $0x128] ss:$12 sps:$4 sm:$0xff]   ;;  %v8698_v57 = vld [vmem:[#allocation13 + $0x120] ss:$12 sps:$4 sm:$0xff]  }
 0x641   :  { %v2254_v62 = vadd.f32 %v7382_v39, %v2253_v58  ;;  %v8287_v63 = vpop.f32.mrb[30].mxu0  ;;  %v8702_v58 = vld [vmem:[#allocation13 + $0x68] ss:$12 sps:$4 sm:$0xff]  }
 0x642   :  { %v2256_v33 = vpop.f32.mrb[31].mxu0  ;;  %2291 = vadd.xlane.f32.xlu1 %v2283_v59  ;;  %v2265_v36 = vadd.f32 %v8287_v63, %v7382_v39  ;;  %v2274_v35 = vmax.f32 %v2262_v61, 0.0  ;;  %v8705_v59 = vld [vmem:[#allocation13 + $0x13c] ss:$12 sps:$4 sm:$0xff]   ;;  %v8706_v61 = vld [vmem:[#allocation13 + $0x140] ss:$12 sps:$4 sm:$0xff]  }
 0x643   :  { %v2272_v2 = vmax.f32 %v2254_v62, 0.0  ;;  %v2257_v4 = vadd.f32 %v7382_v39, %v2256_v33  ;;  %v8681_v39 = vld [vmem:[#allocation13 + $0xc8] ss:$12 sps:$4 sm:$0xff]   ;;  %v8703_v62 = vld [vmem:[#allocation13 + $0x138] ss:$12 sps:$4 sm:$0xff]  }
 0x644   :  { %2293 = vadd.xlane.f32.xlu0 %v2284_v1  ;;  %v2275_v9 = vmax.f32 %v2265_v36, 0.0  ;;  %v2289_v12 = vmul.f32 %v7395_v44, %v2274_v35  ;;  %8040 = vmatprep.subr.bf16.mxu0 %v8681_v39  ;;  %v8707_v63 = vld [vmem:[#allocation13 + $0x80] ss:$12 sps:$4 sm:$0xff]   ;;  %v8711_v1 = vld [vmem:[#allocation13 + $0x158] ss:$12 sps:$4 sm:$0xff]  }
 0x645   :  { %v2273_v5 = vmax.f32 %v2257_v4, 0.0  ;;  %v2287_v8 = vmul.f32 %v7395_v44, %v2272_v2  ;;  %8041 = vmatpush3.bf16.msra.mxu0 %v8682_v40  ;;  %v8710_v33 = vld [vmem:[#allocation13 + $0x154] ss:$12 sps:$4 sm:$0xff]   ;;  %v8708_v35 = vld [vmem:[#allocation13 + $0x150] ss:$12 sps:$4 sm:$0xff]  }
 0x646   :  { %v2290_v13 = vmul.f32 %v7395_v44, %v2275_v9  ;;  %8042 = vmatprep.subr.bf16.mxu0 %v8686_v41  ;;  %v8715_v9 = vld [vmem:[#allocation13 + $0x16c] ss:$12 sps:$4 sm:$0xff]  }
 0x647   :  { %2299 = vadd.xlane.f32.xlu1 %v2287_v8  ;;  %v2288_v11 = vmul.f32 %v7395_v44, %v2273_v5  ;;  %v8690_v44 = vld [vmem:[#allocation13 + $0xf4] ss:$12 sps:$4 sm:$0xff]   ;;  %v8712_v5 = vld [vmem:[#allocation13 + $0x98] ss:$12 sps:$4 sm:$0xff]  }
 0x648   :  { %2888 = vmatprep.subr.bf16.mxu1 %v8690_v44 }
 0x649   :  { %2301 = vadd.xlane.f32.xlu0 %v2288_v11  ;;  %8043 = vmatpush3.bf16.msra.mxu0 %v8687_v43  ;;  %v8716_v11 = vld [vmem:[#allocation13 + $0x170] ss:$12 sps:$4 sm:$0xff]  }
 0x64a   :  { %8044 = vmatprep.subr.bf16.mxu0 %v8691_v3  ;;  %2889 = vmatpush1.bf16.msra.mxu1 %v8688_v21 }
 0x64b   :  { %2303 = vadd.xlane.f32.xlu1 %v2289_v12  ;;  %2890 = vmatprep.subr.bf16.mxu1 %v8695_v24  ;;  %v8713_v12 = vld [vmem:[#allocation13 + $0x168] ss:$12 sps:$4 sm:$0xff]  }
 0x64d   :  { %2305 = vadd.xlane.f32.xlu0 %v2290_v13  ;;  %8045 = vmatpush3.bf16.msra.mxu0 %v8692_v51  ;;  %v8717_v13 = vld [vmem:[#allocation13 + $0xb0] ss:$12 sps:$4 sm:$0xff]  }
 0x64e   :  { %8046 = vmatprep.subr.bf16.mxu0 %v8696_v53  ;;  %2891 = vmatpush1.bf16.msra.mxu1 %v8693_v54 }
 0x64f   :  { %2892 = vmatprep.subr.bf16.mxu1 %v8700_v55 }
 0x651   :  { %8047 = vmatpush3.bf16.msra.mxu0 %v8697_v22 }
 0x652   :  { %8048 = vmatprep.subr.bf16.mxu0 %v8701_v56  ;;  %2893 = vmatpush1.bf16.msra.mxu1 %v8698_v57 }
 0x653   :  { %2894 = vmatprep.subr.bf16.mxu1 %v8705_v59 }
 0x655   :  { %8049 = vmatpush3.bf16.msra.mxu0 %v8702_v58 }
 0x656   :  { %8050 = vmatprep.subr.bf16.mxu0 %v8706_v61  ;;  %2895 = vmatpush1.bf16.msra.mxu1 %v8703_v62 }
 0x657   :  { %2896 = vmatprep.subr.bf16.mxu1 %v8710_v33 }
 0x659   :  { %8051 = vmatpush3.bf16.msra.mxu0 %v8707_v63 }
 0x65a   :  { %8052 = vmatprep.subr.bf16.mxu0 %v8711_v1  ;;  %2897 = vmatpush1.bf16.msra.mxu1 %v8708_v35 }
 0x65b   :  { %2898 = vmatprep.subr.bf16.mxu1 %v8715_v9 }
 0x65d   :  { %8053 = vmatpush3.bf16.msra.mxu0 %v8712_v5 }
 0x65e   :  { %8054 = vmatprep.subr.bf16.mxu0 %v8716_v11  ;;  %2899 = vmatpush1.bf16.msra.mxu1 %v8713_v12 }
 0x661   :  { %8055 = vmatpush3.bf16.msra.mxu0 %v8717_v13 }
 0x662   :  { %8288 = vmatprep.subr.bf16.mxu0 %v9551_v31 }
 0x699   :  { %v9947_v2 = vpop.f32.mrb[8].mxu1 }
 0x69a   :  { %v8262_v36 = vpop.f32.mrb[9].mxu1 }
 0x69b   :  { %v1700_v4 = vpop.f32.mrb[10].mxu1 }
 0x69c   :  { %v8263_v8 = vpop.f32.mrb[11].mxu1 }
 0x6b9   :  { %v9950_v14 = vpop.f32.mrb[12].mxu1 }
 0x6ba   :  { %v9952_v46 = vpop.f32.mrb[13].mxu1 }
 0x6bb   :  { %v1975_v15 = vpop.f32.mrb[14].mxu1 }
 0x6bc   :  { %v1976_v30 = vpop.f32.mrb[15].mxu1 }
 0x6cb   :  { %v2296_v16 = vpop.xlane.xlu1 %2295 }
 0x6cc   :  { %v2319_v17 = vrot.slane %v2296_v16, 4 }
 0x6cd   :  { %v2298_v20 = vpop.xlane.xlu0 %2297 }
 0x6ce   :  { %v2320_v23 = vmax.f32 %v2296_v16, %v2319_v17  ;;  %v2325_v52 = vrot.slane %v2298_v20, 4 }
 0x6cf   :  { %v2292_v25 = vpop.xlane.xlu1 %2291 }
 0x6d0   :  { %v2321_v27 = vrot.slane %v2320_v23, 2  ;;  %v2326_v26 = vmax.f32 %v2298_v20, %v2325_v52  ;;  %v2307_v28 = vrot.slane %v2292_v25, 4 }
 0x6d1   :  { %v2294_v29 = vpop.xlane.xlu0 %2293 }
 0x6d2   :  { %v2322_v34 = vmax.f32 %v2320_v23, %v2321_v27  ;;  %v2327_v19 = vrot.slane %v2326_v26, 2  ;;  %v2308_v37 = vmax.f32 %v2292_v25, %v2307_v28  ;;  %v2313_v38 = vrot.slane %v2294_v29, 4 }
 0x6d4   :  { %v2323_v39 = vrot.slane %v2322_v34, 1  ;;  %v2328_v40 = vmax.f32 %v2326_v26, %v2327_v19  ;;  %v2309_v60 = vrot.slane %v2308_v37, 2  ;;  %v2314_v41 = vmax.f32 %v2294_v29, %v2313_v38  ;;  %v2300_v42 = vpop.xlane.xlu1 %2299 }
 0x6d5   :  { %v2331_v43 = vrot.slane %v2300_v42, 4 }
 0x6d6   :  { %v2324_v44 = vmax.f32 %v2322_v34, %v2323_v39  ;;  %v2329_v3 = vrot.slane %v2328_v40, 1  ;;  %v2310_v21 = vmax.f32 %v2308_v37, %v2309_v60  ;;  %v2315_v51 = vrot.slane %v2314_v41, 2  ;;  %v2302_v24 = vpop.xlane.xlu0 %2301 }
 0x6d7   :  { %v2332_v53 = vmax.f32 %v2300_v42, %v2331_v43  ;;  %v2337_v54 = vrot.slane %v2302_v24, 4 }
 0x6d8   :  { %v2357_v22 = vsub.f32 %v2296_v16, %v2324_v44  ;;  %v2330_v55 = vmax.f32 %v2328_v40, %v2329_v3  ;;  %v2311_v56 = vrot.slane %v2310_v21, 1  ;;  %v2316_v57 = vmax.f32 %v2314_v41, %v2315_v51  ;;  %v2304_v58 = vpop.xlane.xlu1 %2303 }
 0x6d9   :  { %v2333_v59 = vrot.slane %v2332_v53, 2  ;;  %v2338_v61 = vmax.f32 %v2302_v24, %v2337_v54  ;;  %v2343_v62 = vrot.slane %v2304_v58, 4 }
 0x6da   :  { %v2367_v63 = vmul.f32 1.442695, %v2357_v22  ;;  %v2358_v33 = vsub.f32 %v2298_v20, %v2330_v55  ;;  %v2312_v1 = vmax.f32 %v2310_v21, %v2311_v56  ;;  %v2317_v36 = vrot.slane %v2316_v57, 1  ;;  %v2306_v4 = vpop.xlane.xlu0 %2305 }
 0x6db   :  { %v2334_v35 = vmax.f32 %v2332_v53, %v2333_v59  ;;  %v2339_v5 = vrot.slane %v2338_v61, 2  ;;  %v2344_v8 = vmax.f32 %v2304_v58, %v2343_v62  ;;  %v2349_v9 = vrot.slane %v2306_v4, 4 }
 0x6dc   :  { %9152 = vpow2.f32 %v2367_v63  ;;  %v2369_v11 = vmul.f32 1.442695, %v2358_v33  ;;  %v2355_v12 = vsub.f32 %v2292_v25, %v2312_v1  ;;  %v2318_v13 = vmax.f32 %v2316_v57, %v2317_v36 }
 0x6dd   :  { %v2335_v15 = vrot.slane %v2334_v35, 1  ;;  %v2340_v30 = vmax.f32 %v2338_v61, %v2339_v5  ;;  %v2345_v16 = vrot.slane %v2344_v8, 2  ;;  %v2350_v17 = vmax.f32 %v2306_v4, %v2349_v9 }
 0x6de   :  { %9154 = vpow2.f32 %v2369_v11  ;;  %v2363_v23 = vmul.f32 1.442695, %v2355_v12  ;;  %v2356_v52 = vsub.f32 %v2294_v29, %v2318_v13 }
 0x6df   :  { %v2336_v27 = vmax.f32 %v2334_v35, %v2335_v15  ;;  %v2341_v20 = vrot.slane %v2340_v30, 1  ;;  %v2346_v26 = vmax.f32 %v2344_v8, %v2345_v16  ;;  %v2351_v28 = vrot.slane %v2350_v17, 2 }
 0x6e0   :  { %9156 = vpow2.f32 %v2363_v23  ;;  %v2365_v34 = vmul.f32 1.442695, %v2356_v52 }
 0x6e1   :  { %v2359_v19 = vsub.f32 %v2300_v42, %v2336_v27  ;;  %v2342_v37 = vmax.f32 %v2340_v30, %v2341_v20  ;;  %v2347_v38 = vrot.slane %v2346_v26, 1  ;;  %v2352_v39 = vmax.f32 %v2350_v17, %v2351_v28 }
 0x6e2   :  { %9158 = vpow2.f32 %v2365_v34 }
 0x6e3   :  { %v2371_v25 = vmul.f32 1.442695, %v2359_v19  ;;  %v2360_v40 = vsub.f32 %v2302_v24, %v2342_v37  ;;  %v2348_v60 = vmax.f32 %v2346_v26, %v2347_v38  ;;  %v2353_v41 = vrot.slane %v2352_v39, 1 }
 0x6e5   :  { %9160 = vpow2.f32 %v2371_v25  ;;  %v2373_v43 = vmul.f32 1.442695, %v2360_v40  ;;  %v2361_v44 = vsub.f32 %v2304_v58, %v2348_v60  ;;  %v2354_v3 = vmax.f32 %v2352_v39, %v2353_v41 }
 0x6e6   :  { %v9954_v29 = vpop.eup %9152 }
 0x6e7   :  { %v2391_v21 = vrot.slane %v9954_v29, 4  ;;  %9162 = vpow2.f32 %v2373_v43  ;;  %v2375_v51 = vmul.f32 1.442695, %v2361_v44  ;;  %v2362_v53 = vsub.f32 %v2306_v4, %v2354_v3 }
 0x6e8   :  { %v9957_v42 = vpop.eup %9154 }
 0x6e9   :  { %v2392_v54 = vadd.f32 %v9954_v29, %v2391_v21  ;;  %v2397_v22 = vrot.slane %v9957_v42, 4  ;;  %9164 = vpow2.f32 %v2375_v51  ;;  %v2377_v24 = vmul.f32 1.442695, %v2362_v53  ;;  %v7955_v21 = vld [vmem:[#allocation7 + $0x8] sm:$0xff]  }
 0x6ea   :  { %v9961_v55 = vpop.eup %9156 }
 0x6eb   :  { %v2393_v56 = vrot.slane %v2392_v54, 2  ;;  %v2398_v57 = vadd.f32 %v9957_v42, %v2397_v22  ;;  %v2379_v58 = vrot.slane %v9961_v55, 4  ;;  %9166 = vpow2.f32 %v2377_v24 }
 0x6ec   :  { %v9965_v59 = vpop.eup %9158  ;;  %v7840_v24 = vunpack.c.l.bf16 %v7955_v21 }
 0x6ed   :  { %v2394_v61 = vadd.f32 %v2393_v56, %v2392_v54  ;;  %v2399_v62 = vrot.slane %v2398_v57, 2  ;;  %v2380_v63 = vadd.f32 %v9961_v55, %v2379_v58  ;;  %v2385_v33 = vrot.slane %v9965_v59, 4 }
 0x6ef   :  { %v9969_v1 = vpop.eup %9160  ;;  %v2395_v36 = vrot.slane %v2394_v61, 1  ;;  %v2400_v4 = vadd.f32 %v2399_v62, %v2398_v57  ;;  %v2381_v35 = vrot.slane %v2380_v63, 2  ;;  %v2386_v5 = vadd.f32 %v9965_v59, %v2385_v33 }
 0x6f0   :  { %v2403_v8 = vrot.slane %v9969_v1, 4 }
 0x6f1   :  { %v9973_v9 = vpop.eup %9162  ;;  %v2396_v11 = vadd.f32 %v2395_v36, %v2394_v61  ;;  %v2401_v12 = vrot.slane %v2400_v4, 1  ;;  %v2382_v13 = vadd.f32 %v2381_v35, %v2380_v63  ;;  %v2387_v15 = vrot.slane %v2386_v5, 2  ;;  %v7835_v61 = vld [vmem:[#allocation7] sm:$0xff]  }
 0x6f2   :  { %v2404_v30 = vadd.f32 %v9969_v1, %v2403_v8  ;;  %v2409_v16 = vrot.slane %v9973_v9, 4  ;;  %v7841_v63 = vunpack.c.h.bf16 %v7955_v21 }
 0x6f3   :  { %v9977_v17 = vpop.eup %9164  ;;  %9168 = vrcp.f32 %v2396_v11  ;;  %v2402_v23 = vadd.f32 %v2401_v12, %v2400_v4  ;;  %v2383_v52 = vrot.slane %v2382_v13, 1  ;;  %v2388_v27 = vadd.f32 %v2387_v15, %v2386_v5 }
 0x6f4   :  { %v2405_v20 = vrot.slane %v2404_v30, 2  ;;  %v2410_v26 = vadd.f32 %v9973_v9, %v2409_v16  ;;  %v2415_v28 = vrot.slane %v9977_v17, 4  ;;  %v7836_v5 = vunpack.c.l.bf16 %v7835_v61  ;;  %v7956_v16 = vld [vmem:[#allocation7 + $0x10] sm:$0xff]  }
 0x6f5   :  { %v9981_v34 = vpop.eup %9166  ;;  %9170 = vrcp.f32 %v2402_v23  ;;  %v2384_v19 = vadd.f32 %v2383_v52, %v2382_v13  ;;  %v2389_v37 = vrot.slane %v2388_v27, 1  ;;  %v7837_v15 = vunpack.c.h.bf16 %v7835_v61 }
 0x6f6   :  { %v2406_v38 = vadd.f32 %v2405_v20, %v2404_v30  ;;  %v2411_v39 = vrot.slane %v2410_v26, 2  ;;  %v2416_v25 = vadd.f32 %v9977_v17, %v2415_v28  ;;  %v2421_v40 = vrot.slane %v9981_v34, 4 }
 0x6f7   :  { %9172 = vrcp.f32 %v2384_v19  ;;  %v2390_v60 = vadd.f32 %v2389_v37, %v2388_v27  ;;  %v7844_v19 = vunpack.c.l.bf16 %v7956_v16 }
 0x6f8   :  { %v2407_v41 = vrot.slane %v2406_v38, 1  ;;  %v2412_v43 = vadd.f32 %v2411_v39, %v2410_v26  ;;  %v2417_v44 = vrot.slane %v2416_v25, 2  ;;  %v2422_v3 = vadd.f32 %v9981_v34, %v2421_v40 }
 0x6f9   :  { %9174 = vrcp.f32 %v2390_v60 }
 0x6fa   :  { %v2408_v51 = vadd.f32 %v2407_v41, %v2406_v38  ;;  %v2413_v53 = vrot.slane %v2412_v43, 1  ;;  %v2418_v54 = vadd.f32 %v2417_v44, %v2416_v25  ;;  %v2423_v22 = vrot.slane %v2422_v3, 2  ;;  %v7957_v38 = vld [vmem:[#allocation7 + $0x18] sm:$0xff]  }
 0x6fc   :  { %9176 = vrcp.f32 %v2408_v51  ;;  %v2414_v56 = vadd.f32 %v2413_v53, %v2412_v43  ;;  %v2419_v57 = vrot.slane %v2418_v54, 1  ;;  %v2424_v58 = vadd.f32 %v2423_v22, %v2422_v3 }
 0x6fd   :  { %v9169_v62 = vpop.eup %9168  ;;  %v7848_v51 = vunpack.c.l.bf16 %v7957_v38 }
 0x6fe   :  { %v2420_v33 = vadd.f32 %v2419_v57, %v2418_v54  ;;  %v2425_v36 = vrot.slane %v2424_v58, 1  ;;  %v2432_v4 = vmul.f32 %v9169_v62, %v9954_v29  ;;  %9178 = vrcp.f32 %v2414_v56 }
 0x6ff   :  { %v9171_v35 = vpop.eup %9170 }
 0x700   :  { %v2426_v8 = vadd.f32 %v2425_v36, %v2424_v58  ;;  %v2434_v11 = vmul.f32 %v9171_v35, %v9957_v42  ;;  %9180 = vrcp.f32 %v2420_v33  ;;  %v2461_v12 = vmul.f32 %v7840_v24, %v2432_v4 }
 0x701   :  { %v9173_v13 = vpop.eup %9172  ;;  %v7849_v58 = vunpack.c.h.bf16 %v7957_v38 }
 0x702   :  { %v2428_v30 = vmul.f32 %v9173_v13, %v9961_v55  ;;  %9182 = vrcp.f32 %v2426_v8  ;;  %v2462_v23 = vmul.f32 %v7841_v63, %v2434_v11  ;;  %v2479_v52 = vrot.slane %v2461_v12, 4 }
 0x703   :  { %v9175_v27 = vpop.eup %9174  ;;  %v7845_v55 = vunpack.c.h.bf16 %v7956_v16 }
 0x704   :  { %v2430_v20 = vmul.f32 %v9175_v27, %v9965_v59  ;;  %v2459_v29 = vmul.f32 %v7836_v5, %v2428_v30  ;;  %v2480_v26 = vadd.f32 %v2479_v52, %v2461_v12  ;;  %v2485_v28 = vrot.slane %v2462_v23, 4 }
 0x706   :  { %v9177_v37 = vpop.eup %9176  ;;  %v2460_v42 = vmul.f32 %v7837_v15, %v2430_v20  ;;  %v2467_v39 = vrot.slane %v2459_v29, 4  ;;  %v2481_v25 = vrot.slane %v2480_v26, 2  ;;  %v2486_v40 = vadd.f32 %v2485_v28, %v2462_v23 }
 0x707   :  { %v2436_v60 = vmul.f32 %v9177_v37, %v9969_v1 }
 0x708   :  { %v9179_v41 = vpop.eup %9178  ;;  %v2468_v43 = vadd.f32 %v2467_v39, %v2459_v29  ;;  %v2473_v44 = vrot.slane %v2460_v42, 4  ;;  %v2482_v3 = vadd.f32 %v2481_v25, %v2480_v26  ;;  %v2487_v21 = vrot.slane %v2486_v40, 2 }
 0x709   :  { %v2438_v59 = vmul.f32 %v9179_v41, %v9973_v9  ;;  %v2463_v53 = vmul.f32 %v7844_v19, %v2436_v60 }
 0x70a   :  { %v9181_v54 = vpop.eup %9180  ;;  %v2469_v22 = vrot.slane %v2468_v43, 2  ;;  %v2474_v24 = vadd.f32 %v2473_v44, %v2460_v42  ;;  %v2488_v56 = vadd.f32 %v2487_v21, %v2486_v40  ;;  %v2483_v36 = vrot.slane %v2482_v3, 1 }
 0x70b   :  { %v2440_v57 = vmul.f32 %v9181_v54, %v9977_v17  ;;  %v2464_v61 = vmul.f32 %v7845_v55, %v2438_v59  ;;  %v2491_v62 = vrot.slane %v2463_v53, 4 }
 0x70c   :  { %v9183_v1 = vpop.eup %9182  ;;  %v2470_v63 = vadd.f32 %v2469_v22, %v2468_v43  ;;  %v2475_v33 = vrot.slane %v2474_v24, 2  ;;  %v2489_v4 = vrot.slane %v2488_v56, 1  ;;  %v2484_v52 = vadd.f32 %v2483_v36, %v2482_v3 }
 0x70d   :  { %v2442_v35 = vmul.f32 %v9183_v1, %v9981_v34  ;;  %v2465_v5 = vmul.f32 %v7848_v51, %v2440_v57  ;;  %v2492_v9 = vadd.f32 %v2491_v62, %v2463_v53  ;;  %v2497_v8 = vrot.slane %v2464_v61, 4 }
 0x70e   :  { %v2471_v11 = vrot.slane %v2470_v63, 1  ;;  %v2476_v12 = vadd.f32 %v2475_v33, %v2474_v24  ;;  %v2490_v27 = vadd.f32 %v2489_v4, %v2488_v56  ;;  %v2517_v40 = vpack.c.bf16 %v2484_v52, %v2484_v52  ;;  %v8722_v52 = vld [vmem:[#allocation14 + $0x8] sm:$0xff]  }
 0x70f   :  { %v2466_v13 = vmul.f32 %v7849_v58, %v2442_v35  ;;  %v2493_v15 = vrot.slane %v2492_v9, 2  ;;  %v2498_v30 = vadd.f32 %v2497_v8, %v2464_v61  ;;  %v2503_v16 = vrot.slane %v2465_v5, 4 }
 0x710   :  { %v2472_v17 = vadd.f32 %v2471_v11, %v2470_v63  ;;  %v2477_v23 = vrot.slane %v2476_v12, 1  ;;  %v2518_v60 = vpack.c.bf16 %v2490_v27, %v2490_v27  ;;  %v2533_v22 = vunpack.c.l.b16 %v2517_v40  ;;  %v8725_v27 = vld [vmem:[#allocation10 + $0x24] ss:$16 sps:$4 sm:$0xff]   ;;  %v8739_v40 = vld [vmem:[#allocation10 + $0xa0] ss:$16 sps:$4 sm:$0xff]  }
 0x711   :  { %v2494_v20 = vadd.f32 %v2493_v15, %v2492_v9  ;;  %v2499_v29 = vrot.slane %v2498_v30, 2  ;;  %v2504_v26 = vadd.f32 %v2503_v16, %v2465_v5  ;;  %v2509_v28 = vrot.slane %v2466_v13, 4  ;;  %v8718_v16 = vld [vmem:[#allocation14] sm:$0xff]  }
 0x712   :  { %v2478_v19 = vadd.f32 %v2477_v23, %v2476_v12  ;;  %v2515_v37 = vpack.c.bf16 %v2472_v17, %v2472_v17  ;;  %v2534_v24 = vunpack.c.l.b16 %v2518_v60  ;;  %v8721_v17 = vld [vmem:[#allocation10 + $0x4] ss:$16 sps:$4 sm:$0xff]   ;;  %v8719_v23 = vld [vmem:[#allocation10] ss:$16 sps:$4 sm:$0xff]  }
 0x713   :  { %v2495_v34 = vrot.slane %v2494_v20, 1  ;;  %v2500_v38 = vadd.f32 %v2499_v29, %v2498_v30  ;;  %v2505_v42 = vrot.slane %v2504_v26, 2  ;;  %v2510_v39 = vadd.f32 %v2509_v28, %v2466_v13  ;;  %3274 = vmatprep.subr.bf16.mxu1 %v8721_v17  ;;  %v8729_v29 = vld [vmem:[#allocation10 + $0x44] ss:$16 sps:$4 sm:$0xff]   ;;  %v8730_v28 = vld [vmem:[#allocation14 + $0x18] sm:$0xff]  }
 0x714   :  { %v2516_v25 = vpack.c.bf16 %v2478_v19, %v2478_v19  ;;  %v2531_v21 = vunpack.c.l.b16 %v2515_v37  ;;  %v1703_v30 = vpack.c.bf16 %v9947_v2, %v9947_v2  ;;  %v8723_v2 = vld [vmem:[#allocation10 + $0x20] ss:$16 sps:$4 sm:$0xff]   ;;  %v8733_v19 = vld [vmem:[#allocation10 + $0x64] ss:$16 sps:$4 sm:$0xff]  }
 0x715   :  { %v2496_v55 = vadd.f32 %v2495_v34, %v2494_v20  ;;  %v2501_v41 = vrot.slane %v2500_v38, 1  ;;  %v2506_v43 = vadd.f32 %v2505_v42, %v2504_v26  ;;  %v2511_v44 = vrot.slane %v2510_v39, 2  ;;  %v8726_v20 = vld [vmem:[#allocation14 + $0x10] sm:$0xff]   ;;  %v8734_v34 = vld [vmem:[#allocation14 + $0x20] sm:$0xff]  }
 0x716   :  { %v2532_v3 = vunpack.c.l.b16 %v2516_v25  ;;  %v8727_v26 = vld [vmem:[#allocation10 + $0x40] ss:$16 sps:$4 sm:$0xff]   ;;  %v8737_v42 = vld [vmem:[#allocation10 + $0x84] ss:$16 sps:$4 sm:$0xff]   ;;  %v8738_v25 = vld [vmem:[#allocation14 + $0x28] sm:$0xff]  }
 0x717   :  { %v2502_v59 = vadd.f32 %v2501_v41, %v2500_v38  ;;  %v2507_v51 = vrot.slane %v2506_v43, 1  ;;  %v2512_v53 = vadd.f32 %v2511_v44, %v2510_v39  ;;  %v2519_v54 = vpack.c.bf16 %v2496_v55, %v2496_v55  ;;  %v8731_v37 = vld [vmem:[#allocation10 + $0x60] ss:$16 sps:$4 sm:$0xff]   ;;  %v8741_v39 = vld [vmem:[#allocation10 + $0xa4] ss:$16 sps:$4 sm:$0xff]   ;;  %v8746_v44 = vld [vmem:[#allocation14 + $0x38] sm:$0xff]  }
 0x718   :  { %v2539_v56 = vsel %vm1045_vm0, %v2532_v3, %v2531_v21  ;;  %v8735_v38 = vld [vmem:[#allocation10 + $0x80] ss:$16 sps:$4 sm:$0xff]   ;;  %v8745_v60 = vld [vmem:[#allocation10 + $0xc4] ss:$16 sps:$4 sm:$0xff]   ;;  %v8752_v3 = vld [vmem:[#allocation10 + $0xc] ss:$16 sps:$4 sm:$0xff]  }
 0x719   :  { %v2508_v57 = vadd.f32 %v2507_v51, %v2506_v43  ;;  %v2513_v58 = vrot.slane %v2512_v53, 1  ;;  %v2520_v61 = vpack.c.bf16 %v2502_v59, %v2502_v59  ;;  %v2535_v62 = vunpack.c.l.b16 %v2519_v54  ;;  %v8742_v55 = vld [vmem:[#allocation14 + $0x30] sm:$0xff]   ;;  %v8774_v59 = vld [vmem:[#allocation11] sm:$0xff]  }
 0x71a   :  { %v2540_v1 = vsel %vm1047_vm1, %v2533_v22, %v2539_v56  ;;  %v8743_v41 = vld [vmem:[#allocation10 + $0xc0] ss:$16 sps:$4 sm:$0xff]   ;;  %v8749_v43 = vld [vmem:[#allocation10 + $0xe4] ss:$16 sps:$4 sm:$0xff]   ;;  %v2949_v54 = vadd.f32 %v9923_v10, %v9878_v47 }
 0x71b   :  { %v2514_v63 = vadd.f32 %v2513_v58, %v2512_v53  ;;  %v2521_v33 = vpack.c.bf16 %v2508_v57, %v2508_v57  ;;  %v2536_v36 = vunpack.c.l.b16 %v2520_v61  ;;  %v2541_v4 = vsel %vm1049_vm2, %v2534_v24, %v2540_v1  ;;  %v8747_v21 = vld [vmem:[#allocation10 + $0xe0] ss:$16 sps:$4 sm:$0xff]  }
 0x71c   :  { %v2542_v35 = vsel %vm1051_vm3, %v2535_v62, %v2541_v4  ;;  %v2950_v57 = vadd.f32 %v9950_v14, %v9883_v49  ;;  %v2951_v14 = vadd.f32 %v9952_v46, %v9893_v6  ;;  %v8755_v46 = vld [vmem:[#allocation10 + $0x2c] ss:$16 sps:$4 sm:$0xff]  }
 0x71d   :  { %v2522_v5 = vpack.c.bf16 %v2514_v63, %v2514_v63  ;;  %v2537_v9 = vunpack.c.l.b16 %v2521_v33  ;;  %v2543_v8 = vsel %vm1053_vm4, %v2536_v36, %v2542_v35 }
 0x71f   :  { %v2538_v11 = vunpack.c.l.b16 %v2522_v5  ;;  %v2544_v12 = vsel %vm1055_vm5, %v2537_v9, %v2543_v8 }
 0x721   :  { %v2545_v13 = vsel %vm1057_vm6, %v2538_v11, %v2544_v12 }
 0x722   :  { %v2546_v15 = vpack.c.b16 %v2545_v13, %v2545_v13 }
 0x724   :  { %2900 = vmatprep.mubr.bf16.mxu1 %v2546_v15  ;;  %2941 = vmatprep.mubr.bf16.mxu0 %v2546_v15 }
 0x725   :  { %2901 = vmatmul.mubr.bf16.vlgmr.msra.gmra.mrb[16].mxu1 %v1703_v30  ;;  %2942 = vmatmul.mubr.bf16.vlgmr.msra.gmra.mrb[32].mxu0 %v1703_v30 }
 0x726   :  { %8304 = vmatprep.mubr.msk.bf16.mxu0 %vm9552_vm7, %v9551_v31  ;;  %3306 = vmatprep.mubr.bf16.mxu1 %v9549_v0 }
 0x727   :  { %8289 = vmatpush3.bf16.msra.mxu0 %v8718_v16  ;;  %3275 = vmatpush1.bf16.msra.mxu1 %v8719_v23 }
 0x728   :  { %8290 = vmatprep.subr.bf16.mxu0 %v9551_v31  ;;  %3276 = vmatprep.subr.bf16.mxu1 %v8725_v27 }
 0x72b   :  { %8291 = vmatpush3.bf16.msra.mxu0 %v8722_v52  ;;  %3277 = vmatpush1.bf16.msra.mxu1 %v8723_v2 }
 0x72c   :  { %8292 = vmatprep.subr.bf16.mxu0 %v9551_v31  ;;  %3278 = vmatprep.subr.bf16.mxu1 %v8729_v29 }
 0x72f   :  { %8293 = vmatpush3.bf16.msra.mxu0 %v8726_v20  ;;  %3279 = vmatpush1.bf16.msra.mxu1 %v8727_v26  ;;  %v8750_v20 = vld [vmem:[#allocation10 + $0x8] ss:$16 sps:$4 sm:$0xff]  }
 0x730   :  { %8294 = vmatprep.subr.bf16.mxu0 %v9551_v31  ;;  %3280 = vmatprep.subr.bf16.mxu1 %v8733_v19  ;;  %v8775_v26 = vld [vmem:[#allocation11 + $0x8] sm:$0xff]  }
 0x731   :  { %v8758_v19 = vld [vmem:[#allocation10 + $0x4c] ss:$16 sps:$4 sm:$0xff]  }
 0x733   :  { %8295 = vmatpush3.bf16.msra.mxu0 %v8730_v28  ;;  %3281 = vmatpush1.bf16.msra.mxu1 %v8731_v37  ;;  %v8753_v28 = vld [vmem:[#allocation10 + $0x28] ss:$16 sps:$4 sm:$0xff]   ;;  %v8776_v37 = vld [vmem:[#allocation11 + $0x10] sm:$0xff]  }
 0x734   :  { %8296 = vmatprep.subr.bf16.mxu0 %v9551_v31  ;;  %3282 = vmatprep.subr.bf16.mxu1 %v8737_v42  ;;  %v8759_v42 = vld [vmem:[#allocation10 + $0x68] ss:$16 sps:$4 sm:$0xff]  }
 0x737   :  { %8297 = vmatpush3.bf16.msra.mxu0 %v8734_v34  ;;  %3283 = vmatpush1.bf16.msra.mxu1 %v8735_v38  ;;  %v8761_v34 = vld [vmem:[#allocation10 + $0x6c] ss:$16 sps:$4 sm:$0xff]  }
 0x738   :  { %8298 = vmatprep.subr.bf16.mxu0 %v9551_v31  ;;  %3284 = vmatprep.subr.bf16.mxu1 %v8741_v39  ;;  %v8777_v38 = vld [vmem:[#allocation11 + $0x18] sm:$0xff]  }
 0x739   :  { %v8764_v39 = vld [vmem:[#allocation10 + $0x8c] ss:$16 sps:$4 sm:$0xff]  }
 0x73b   :  { %8299 = vmatpush3.bf16.msra.mxu0 %v8738_v25  ;;  %3285 = vmatpush1.bf16.msra.mxu1 %v8739_v40  ;;  %v8762_v25 = vld [vmem:[#allocation10 + $0x88] ss:$16 sps:$4 sm:$0xff]   ;;  %v8767_v40 = vld [vmem:[#allocation10 + $0xac] ss:$16 sps:$4 sm:$0xff]  }
 0x73c   :  { %8300 = vmatprep.subr.bf16.mxu0 %v9551_v31  ;;  %3286 = vmatprep.subr.bf16.mxu1 %v8745_v60  ;;  %v8765_v60 = vld [vmem:[#allocation10 + $0xa8] ss:$16 sps:$4 sm:$0xff]  }
 0x73f   :  { %8301 = vmatpush3.bf16.msra.mxu0 %v8742_v55  ;;  %3287 = vmatpush1.bf16.msra.mxu1 %v8743_v41  ;;  %v8770_v55 = vld [vmem:[#allocation10 + $0xcc] ss:$16 sps:$4 sm:$0xff]   ;;  %v8768_v41 = vld [vmem:[#allocation10 + $0xc8] ss:$16 sps:$4 sm:$0xff]  }
 0x740   :  { %8302 = vmatprep.subr.bf16.mxu0 %v9551_v31  ;;  %3288 = vmatprep.subr.bf16.mxu1 %v8749_v43  ;;  %v8773_v43 = vld [vmem:[#allocation10 + $0xec] ss:$16 sps:$4 sm:$0xff]  }
 0x743   :  { %8303 = vmatpush3.bf16.msra.mxu0 %v8746_v44  ;;  %3289 = vmatpush1.bf16.msra.mxu1 %v8747_v21  ;;  %v8771_v44 = vld [vmem:[#allocation10 + $0xe8] ss:$16 sps:$4 sm:$0xff]   ;;  %v8778_v21 = vld [vmem:[#allocation11 + $0x20] sm:$0xff]  }
 0x744   :  { %3315 = vmatprep.subr.bf16.mxu0 %v8752_v3  ;;  %8308 = vmatprep.subr.bf16.mxu1 %v8774_v59  ;;  %v8779_v3 = vld [vmem:[#allocation11 + $0x28] sm:$0xff]  }
 0x7f8   :  { %v2902_v51 = vpop.f32.mrb[16].mxu1  ;;  %v8056_v53 = vpop.f32.mrb[32].mxu0 }
 0x7f9   :  { %v2903_v22 = vadd.f32 %v2902_v51, %v9881_v48  ;;  %v2904_v24 = vpop.f32.mrb[17].mxu1  ;;  %v8057_v56 = vpop.f32.mrb[33].mxu0  ;;  %v8781_v51 = vld [vmem:[#allocation11 + $0x38] sm:$0xff]  }
 0x7fa   :  { %v2905_v58 = vadd.f32 %v2904_v24, %v9885_v50  ;;  %v8058_v61 = vadd.f32 %v8057_v56, %v8056_v53  ;;  %v2906_v62 = vpop.f32.mrb[18].mxu1  ;;  %v8059_v1 = vpop.f32.mrb[34].mxu0 }
 0x7fb   :  { %v2952_v63 = vadd.f32 %v2949_v54, %v2903_v22  ;;  %v2907_v33 = vpop.f32.mrb[19].mxu1  ;;  %v8060_v36 = vpop.f32.mrb[35].mxu0  ;;  %v9321_v22 = vld [vmem:[%s10356_s13] ss:$0 sm:$0xff]  ;;  %v7851_v62 = vld [vmem:[#allocation5] sm:$0xff]  }
 0x7fc   :  { %v2959_v4 = vadd.f32 %v2950_v57, %v2905_v58  ;;  %v2944_v13 = vadd.f32 %v8058_v61, %v9895_v7  ;;  %v7958_v33 = vld [vmem:[#allocation5 + $0x8] sm:$0xff]  }
 0x7fd   :  { %v7444_v35 = vmul.f32 -1.442695, %v2952_v63 }
 0x7fe   :  { %v7445_v5 = vmul.f32 -1.442695, %v2959_v4 }
 0x7ff   :  { %9184 = vpow2.f32 %v7444_v35 }
 0x800   :  { %9186 = vpow2.f32 %v7445_v5 }
 0x809   :  { %v9185_v10 = vpop.eup %9184 }
 0x80a   :  { %v2956_v9 = vadd.f32 1.0, %v9185_v10  ;;  %v9187_v8 = vpop.eup %9186 }
 0x80b   :  { %v2963_v11 = vadd.f32 1.0, %v9187_v8  ;;  %v7852_v8 = vunpack.c.l.bf16 %v7851_v62 }
 0x80c   :  { %9188 = vrcp.f32 %v2956_v9  ;;  %v7959_v9 = vld [vmem:[#allocation5 + $0x10] sm:$0xff]  }
 0x80d   :  { %9190 = vrcp.f32 %v2963_v11  ;;  %v7853_v11 = vunpack.c.h.bf16 %v7851_v62 }
 0x816   :  { %v9189_v12 = vpop.eup %9188 }
 0x817   :  { %v2966_v15 = vmul.f32 %v9189_v12, %v2951_v14  ;;  %v9191_v16 = vpop.eup %9190 }
 0x818   :  { %v2969_v17 = vsub.f32 1.0, %v9191_v16  ;;  %v2971_v27 = vmul.f32 %v9191_v16, %v9903_v18  ;;  %v8756_v18 = vld [vmem:[#allocation10 + $0x48] ss:$16 sps:$4 sm:$0xff]  }
 0x819   :  { %v2967_v30 = vadd.f32 %v2966_v15, %v2944_v13 }
 0x81b   :  { %9192 = vtanh.f32 %v2967_v30  ;;  %v7856_v30 = vunpack.c.l.bf16 %v7958_v33 }
 0x825   :  { %v9193_v23 = vpop.eup %9192 }
 0x826   :  { %v2970_v52 = vmul.f32 %v9193_v23, %v2969_v17  ;;  %v7857_v17 = vunpack.c.h.bf16 %v7958_v33  ;;  %v7860_v23 = vunpack.c.l.bf16 %v7959_v9 }
 0x828   :  { %v10023_v2 = vadd.f32 %v2971_v27, %v2970_v52 }
 0x82a   :  { %v2973_v29 = vpack.c.bf16 %v10023_v2, %v10023_v2 }
 0x82c   :  { %8305 = vmatmul.mubr.bf16.vlgmr.msra.gmra.mrb[36].mxu0 %v2973_v29  ;;  %3307 = vmatmul.mubr.bf16.vlgmr.msra.gmra.mrb[20].mxu1 %v2973_v29 }
 0x82d   :  { %3316 = vmatpush1.bf16.msra.mxu0 %v8750_v20  ;;  %3347 = vmatprep.mubr.bf16.mxu0 %v9549_v0 }
 0x82e   :  { %3317 = vmatprep.subr.bf16.mxu0 %v8755_v46  ;;  %8309 = vmatpush3.bf16.msra.mxu1 %v8774_v59  ;;  %v8780_v59 = vld [vmem:[#allocation11 + $0x30] sm:$0xff]  }
 0x82f   :  { %8310 = vmatprep.subr.bf16.mxu1 %v8775_v26 }
 0x831   :  { %3318 = vmatpush1.bf16.msra.mxu0 %v8753_v28 }
 0x832   :  { %3319 = vmatprep.subr.bf16.mxu0 %v8758_v19  ;;  %8311 = vmatpush3.bf16.msra.mxu1 %v8775_v26 }
 0x833   :  { %8312 = vmatprep.subr.bf16.mxu1 %v8776_v37 }
 0x835   :  { %3320 = vmatpush1.bf16.msra.mxu0 %v8756_v18 }
 0x836   :  { %3321 = vmatprep.subr.bf16.mxu0 %v8761_v34  ;;  %8313 = vmatpush3.bf16.msra.mxu1 %v8776_v37 }
 0x837   :  { %8314 = vmatprep.subr.bf16.mxu1 %v8777_v38 }
 0x839   :  { %3322 = vmatpush1.bf16.msra.mxu0 %v8759_v42  ;;  %v7960_v42 = vld [vmem:[#allocation5 + $0x18] sm:$0xff]  }
 0x83a   :  { %3323 = vmatprep.subr.bf16.mxu0 %v8764_v39  ;;  %8315 = vmatpush3.bf16.msra.mxu1 %v8777_v38 }
 0x83b   :  { %8316 = vmatprep.subr.bf16.mxu1 %v8778_v21 }
 0x83d   :  { %3324 = vmatpush1.bf16.msra.mxu0 %v8762_v25 }
 0x83e   :  { %3325 = vmatprep.subr.bf16.mxu0 %v8767_v40  ;;  %8317 = vmatpush3.bf16.msra.mxu1 %v8778_v21 }
 0x83f   :  { %8318 = vmatprep.subr.bf16.mxu1 %v8779_v3 }
 0x841   :  { %3326 = vmatpush1.bf16.msra.mxu0 %v8765_v60  ;;  %v7865_v60 = vunpack.c.h.bf16 %v7960_v42 }
 0x842   :  { %3327 = vmatprep.subr.bf16.mxu0 %v8770_v55  ;;  %8319 = vmatpush3.bf16.msra.mxu1 %v8779_v3  ;;  %v7864_v3 = vunpack.c.l.bf16 %v7960_v42 }
 0x843   :  { %8320 = vmatprep.subr.bf16.mxu1 %v8780_v59 }
 0x845   :  { %3328 = vmatpush1.bf16.msra.mxu0 %v8768_v41 }
 0x846   :  { %3329 = vmatprep.subr.bf16.mxu0 %v8773_v43  ;;  %8321 = vmatpush3.bf16.msra.mxu1 %v8780_v59 }
 0x847   :  { %8322 = vmatprep.subr.bf16.mxu1 %v8781_v51 }
 0x849   :  { %3330 = vmatpush1.bf16.msra.mxu0 %v8771_v44 }
 0x84a   :  { %8323 = vmatpush3.bf16.msra.mxu1 %v8781_v51 }
 0x84c   :  { %3348 = vmatmul.mubr.bf16.vlgmr.msra.gmra.mrb[40].mxu0 %v2973_v29  ;;  %v7861_v29 = vunpack.c.h.bf16 %v7959_v9 }
 0x8ff   :  { %v3072_v53 = vpop.f32.mrb[36].mxu0  ;;  %v3308_v54 = vpop.f32.mrb[20].mxu1 }
 0x900   :  { %v3073_v24 = vadd.f32 %v9321_v22, %v3072_v53  ;;  %v3365_v56 = vcombine.high %v3308_v54, %v3308_v54  ;;  %v3372_v57 = vrot.slane %v3308_v54, %v9779_v32  ;;  %v8306_v58 = vpop.f32.mrb[37].mxu0  ;;  %v10032_v61 = vpop.f32.mrb[21].mxu1 }
 0x901   :  { %v3075_v1 = vpop.f32.mrb[38].mxu0  ;;  %v3312_v63 = vpop.f32.mrb[22].mxu1 }
 0x902   :  { %3079 = vst [vmem:[#allocation16 + $0x8] sm:$0xff] %v3073_v24  ;;  %v3379_v36 = vrot.slane %v3365_v56, %v9779_v32  ;;  %v3380_v4 = vcombine.high %v3372_v57, %v3372_v57  ;;  %v3388_v35 = vrot.slane %v3372_v57, %v9779_v32  ;;  %v8307_v5 = vpop.f32.mrb[39].mxu0  ;;  %v3313_v10 = vpop.f32.mrb[23].mxu1 }
 0x903   :  { %v7486_v5 = vld [vmem:[%s10350_s7] ss:$0 sm:$0xff] }
 0x904   :  { %v3381_v14 = vcombine.high %v3379_v36, %v3379_v36  ;;  %v3395_v12 = vrot.slane %v3379_v36, %v9779_v32  ;;  %v3402_v13 = vrot.slane %v3380_v4, %v9779_v32  ;;  %v3410_v15 = vcombine.high %v3388_v35, %v3388_v35 }
 0x905   :  { %v3425_v16 = vrot.slane %v3388_v35, %v9787_v45 }
 0x906   :  { %v3409_v52 = vrot.slane %v3381_v14, %v9779_v32  ;;  %v3412_v27 = vcombine.high %v3402_v13, %v3402_v13  ;;  %v3429_v20 = vrot.slane %v3402_v13, %v9787_v45  ;;  %v3411_v46 = vcombine.high %v3395_v12, %v3395_v12 }
 0x907   :  { %v3433_v26 = vrot.slane %v3410_v15, %v9787_v45  ;;  %v3441_v28 = vrot.slane %v3395_v12, %v9787_v45  ;;  %v3462_v19 = vadd.f32 %v7852_v8, %v3425_v16  ;;  %v7499_v12 = vld [vmem:[%s10351_s8] ss:$0 sm:$0xff] }
 0x908   :  { %v3413_v37 = vcombine.high %v3409_v52, %v3409_v52  ;;  %v3437_v18 = vrot.slane %v3412_v27, %v9787_v45  ;;  %v3463_v34 = vadd.f32 %v7853_v11, %v3429_v20  ;;  %v3445_v38 = vrot.slane %v3409_v52, %v9787_v45 }
 0x909   :  { %v3464_v39 = vadd.f32 %v7856_v30, %v3433_v26  ;;  %v3470_v25 = vmax.f32 %v3462_v19, 0.0  ;;  %v3466_v40 = vadd.f32 %v7860_v23, %v3441_v28  ;;  %v3449_v59 = vrot.slane %v3411_v46, %v9787_v45 }
 0x90a   :  { %v3471_v55 = vmax.f32 %v3463_v34, 0.0  ;;  %v3465_v41 = vadd.f32 %v7857_v17, %v3437_v18  ;;  %v3467_v43 = vadd.f32 %v7861_v29, %v3445_v38  ;;  %v3453_v44 = vrot.slane %v3413_v37, %v9787_v45 }
 0x90b   :  { %v3472_v21 = vmax.f32 %v3464_v39, 0.0  ;;  %v3474_v54 = vmax.f32 %v3466_v40, 0.0  ;;  %v3468_v58 = vadd.f32 %v7864_v3, %v3449_v59  ;;  %v8782_v3 = vld [vmem:[#allocation13] ss:$12 sps:$4 sm:$0xff]   ;;  %v8787_v59 = vld [vmem:[#allocation13 + $0x1c] ss:$12 sps:$4 sm:$0xff]  }
 0x90c   :  { %v7774_v51 = vpack.c.bf16 %v3471_v55, %v3470_v25  ;;  %v3473_v53 = vmax.f32 %v3465_v41, 0.0  ;;  %v3475_v22 = vmax.f32 %v3467_v43, 0.0  ;;  %v3469_v57 = vadd.f32 %v7865_v60, %v3453_v44 }
 0x90d   :  { %v3476_v1 = vmax.f32 %v3468_v58, 0.0  ;;  %v8799_v58 = vld [vmem:[#allocation13 + $0x7c] ss:$12 sps:$4 sm:$0xff]  }
 0x90e   :  { %8324 = vmatprep.mubr.bf16.mxu1 %v7774_v51  ;;  %v7775_v24 = vpack.c.bf16 %v3473_v53, %v3472_v21  ;;  %v7776_v56 = vpack.c.bf16 %v3475_v22, %v3474_v54  ;;  %v3477_v62 = vmax.f32 %v3469_v57, 0.0  ;;  %v8784_v21 = vld [vmem:[#allocation13 + $0x4] ss:$12 sps:$4 sm:$0xff]   ;;  %v8790_v53 = vld [vmem:[#allocation13 + $0x34] ss:$12 sps:$4 sm:$0xff]  }
 0x90f   :  { %4246 = vmatprep.subr.bf16.mxu0 %v8784_v21  ;;  %v8785_v51 = vld [vmem:[#allocation13 + $0x18] ss:$12 sps:$4 sm:$0xff]   ;;  %v8788_v54 = vld [vmem:[#allocation13 + $0x30] ss:$12 sps:$4 sm:$0xff]   ;;  %v8794_v57 = vld [vmem:[#allocation13 + $0x60] ss:$12 sps:$4 sm:$0xff]  }
 0x910   :  { %8325 = vmatmul.mubr.bf16.vlgmr.msra.gmra.mrb[24].mxu1 %v7775_v24  ;;  %v7777_v63 = vpack.c.bf16 %v3477_v62, %v3476_v1  ;;  %4247 = vmatpush1.bf16.msra.mxu0 %v8782_v3  ;;  %v8793_v22 = vld [vmem:[#allocation13 + $0x4c] ss:$12 sps:$4 sm:$0xff]   ;;  %v8791_v24 = vld [vmem:[#allocation13 + $0x48] ss:$12 sps:$4 sm:$0xff]  }
 0x911   :  { %8328 = vmatprep.mubr.bf16.mxu1 %v7776_v56  ;;  %4248 = vmatprep.subr.bf16.mxu0 %v8787_v59  ;;  %v8796_v56 = vld [vmem:[#allocation13 + $0x64] ss:$12 sps:$4 sm:$0xff]   ;;  %v8802_v1 = vld [vmem:[#allocation13 + $0x94] ss:$12 sps:$4 sm:$0xff]  }
 0x912   :  { %v8797_v62 = vld [vmem:[#allocation13 + $0x78] ss:$12 sps:$4 sm:$0xff]  }
 0x914   :  { %4249 = vmatpush1.bf16.msra.mxu0 %v8785_v51 }
 0x915   :  { %4250 = vmatprep.subr.bf16.mxu0 %v8790_v53 }
 0x918   :  { %8329 = vmatmul.mubr.bf16.gmra.mrb[28].mxu1 %v7777_v63  ;;  %4251 = vmatpush1.bf16.msra.mxu0 %v8788_v54  ;;  %v8800_v63 = vld [vmem:[#allocation13 + $0x90] ss:$12 sps:$4 sm:$0xff]  }
 0x919   :  { %4252 = vmatprep.subr.bf16.mxu0 %v8793_v22 }
 0x91c   :  { %4253 = vmatpush1.bf16.msra.mxu0 %v8791_v24 }
 0x91d   :  { %4254 = vmatprep.subr.bf16.mxu0 %v8796_v56 }
 0x91f   :  { %v10047_v33 = vpop.f32.mrb[40].mxu0 }
 0x920   :  { %v10049_v36 = vpop.f32.mrb[41].mxu0  ;;  %4255 = vmatpush1.bf16.msra.mxu0 %v8794_v57 }
 0x921   :  { %v3353_v4 = vpop.f32.mrb[42].mxu0  ;;  %4256 = vmatprep.subr.bf16.mxu0 %v8799_v58 }
 0x922   :  { %v3354_v35 = vpop.f32.mrb[43].mxu0  ;;  %v8805_v4 = vld [vmem:[#allocation13 + $0xac] ss:$12 sps:$4 sm:$0xff]  }
 0x923   :  { %v8803_v35 = vld [vmem:[#allocation13 + $0xa8] ss:$12 sps:$4 sm:$0xff]  }
 0x924   :  { %4257 = vmatpush1.bf16.msra.mxu0 %v8797_v62 }
 0x925   :  { %4258 = vmatprep.subr.bf16.mxu0 %v8802_v1 }
 0x928   :  { %4259 = vmatpush1.bf16.msra.mxu0 %v8800_v63 }
 0x929   :  { %4260 = vmatprep.subr.bf16.mxu0 %v8805_v4 }
 0x92c   :  { %4261 = vmatpush1.bf16.msra.mxu0 %v8803_v35 }
 0x9e3   :  { %v8326_v10 = vpop.f32.mrb[24].mxu1 }
 0x9e4   :  { %v3624_v9 = vadd.f32 %v8326_v10, %v7486_v5  ;;  %v3615_v8 = vpop.f32.mrb[25].mxu1  ;;  %v8808_v10 = vld [vmem:[#allocation13 + $0xc4] ss:$12 sps:$4 sm:$0xff]  }
 0x9e5   :  { %v3616_v11 = vadd.f32 %v7486_v5, %v3615_v8  ;;  %v8327_v14 = vpop.f32.mrb[26].mxu1  ;;  %4262 = vmatprep.subr.bf16.mxu0 %v8808_v10  ;;  %v8809_v8 = vld [vmem:[#allocation13 + $0xd8] ss:$12 sps:$4 sm:$0xff]  }
 0x9e6   :  { %v3648_v13 = vmax.f32 %v3624_v9, 0.0  ;;  %v3627_v15 = vadd.f32 %v8327_v14, %v7486_v5  ;;  %v3618_v30 = vpop.f32.mrb[27].mxu1  ;;  %v8811_v9 = vld [vmem:[#allocation13 + $0xdc] ss:$12 sps:$4 sm:$0xff]  }
 0x9e7   :  { %v3619_v16 = vadd.f32 %v7486_v5, %v3618_v30  ;;  %v3646_v17 = vmax.f32 %v3616_v11, 0.0  ;;  %v8814_v11 = vld [vmem:[#allocation13 + $0xf4] ss:$12 sps:$4 sm:$0xff]  }
 0x9e8   :  { %v3649_v23 = vmax.f32 %v3627_v15, 0.0  ;;  %v3663_v52 = vmul.f32 %v7499_v12, %v3648_v13  ;;  %v8827_v14 = vld [vmem:[#allocation13 + $0xc8] ss:$12 sps:$4 sm:$0xff]   ;;  %v8832_v13 = vld [vmem:[#allocation13 + $0xe0] ss:$12 sps:$4 sm:$0xff]  }
 0x9e9   :  { %v3647_v27 = vmax.f32 %v3619_v16, 0.0  ;;  %v3661_v26 = vmul.f32 %v7499_v12, %v3646_v17  ;;  %8083 = vmatprep.subr.bf16.mxu1 %v8827_v14  ;;  %v8812_v15 = vld [vmem:[#allocation13 + $0xf0] ss:$12 sps:$4 sm:$0xff]   ;;  %v8833_v30 = vld [vmem:[#allocation13 + $0x20] ss:$12 sps:$4 sm:$0xff]  }
 0x9ea   :  { %3673 = vadd.xlane.f32.xlu1 %v3663_v52  ;;  %v3664_v20 = vmul.f32 %v7499_v12, %v3649_v23  ;;  %v8817_v16 = vld [vmem:[#allocation13 + $0x10c] ss:$12 sps:$4 sm:$0xff]   ;;  %v8815_v17 = vld [vmem:[#allocation13 + $0x108] ss:$12 sps:$4 sm:$0xff]   ;;  %v8820_v23 = vld [vmem:[#allocation13 + $0x124] ss:$12 sps:$4 sm:$0xff]  }
 0x9eb   :  { %v8330_v29 = vpop.f32.mrb[28].mxu1  ;;  %v3662_v34 = vmul.f32 %v7499_v12, %v3647_v27  ;;  %v8818_v52 = vld [vmem:[#allocation13 + $0x120] ss:$12 sps:$4 sm:$0xff]   ;;  %v8823_v27 = vld [vmem:[#allocation13 + $0x13c] ss:$12 sps:$4 sm:$0xff]  }
 0x9ec   :  { %3675 = vadd.xlane.f32.xlu0 %v3664_v20  ;;  %v3631_v46 = vpop.f32.mrb[29].mxu1  ;;  %v3640_v28 = vadd.f32 %v8330_v29, %v7486_v5  ;;  %v8821_v20 = vld [vmem:[#allocation13 + $0x138] ss:$12 sps:$4 sm:$0xff]   ;;  %v8826_v29 = vld [vmem:[#allocation13 + $0x154] ss:$12 sps:$4 sm:$0xff]  }
 0x9ed   :  { %v3632_v19 = vadd.f32 %v7486_v5, %v3631_v46  ;;  %v8331_v37 = vpop.f32.mrb[30].mxu1  ;;  %v8824_v46 = vld [vmem:[#allocation13 + $0x150] ss:$12 sps:$4 sm:$0xff]  }
 0x9ee   :  { %v3634_v18 = vpop.f32.mrb[31].mxu1  ;;  %3669 = vadd.xlane.f32.xlu1 %v3661_v26  ;;  %v3643_v42 = vadd.f32 %v8331_v37, %v7486_v5  ;;  %v3652_v25 = vmax.f32 %v3640_v28, 0.0  ;;  %v8831_v26 = vld [vmem:[#allocation13 + $0x16c] ss:$12 sps:$4 sm:$0xff]   ;;  %v8829_v28 = vld [vmem:[#allocation13 + $0x168] ss:$12 sps:$4 sm:$0xff]  }
 0x9ef   :  { %v3650_v38 = vmax.f32 %v3632_v19, 0.0  ;;  %v3635_v39 = vadd.f32 %v7486_v5, %v3634_v18  ;;  %v8806_v5 = vld [vmem:[#allocation13 + $0xc0] ss:$12 sps:$4 sm:$0xff]   ;;  %v8834_v19 = vld [vmem:[#allocation13 + $0xf8] ss:$12 sps:$4 sm:$0xff]  }
 0x9f0   :  { %3671 = vadd.xlane.f32.xlu0 %v3662_v34  ;;  %v3653_v55 = vmax.f32 %v3643_v42, 0.0  ;;  %v3667_v43 = vmul.f32 %v7499_v12, %v3652_v25  ;;  %4263 = vmatpush1.bf16.msra.mxu0 %v8806_v5  ;;  %v8835_v37 = vld [vmem:[#allocation13 + $0x38] ss:$12 sps:$4 sm:$0xff]   ;;  %v8836_v18 = vld [vmem:[#allocation13 + $0x110] ss:$12 sps:$4 sm:$0xff]  }
 0x9f1   :  { %v3651_v40 = vmax.f32 %v3635_v39, 0.0  ;;  %v3665_v60 = vmul.f32 %v7499_v12, %v3650_v38  ;;  %4264 = vmatprep.subr.bf16.mxu0 %v8811_v9  ;;  %v8837_v34 = vld [vmem:[#allocation13 + $0x50] ss:$12 sps:$4 sm:$0xff]   ;;  %v8838_v38 = vld [vmem:[#allocation13 + $0x128] ss:$12 sps:$4 sm:$0xff]  }
 0x9f2   :  { %v3668_v44 = vmul.f32 %v7499_v12, %v3653_v55  ;;  %v8839_v42 = vld [vmem:[#allocation13 + $0x68] ss:$12 sps:$4 sm:$0xff]   ;;  %v8840_v39 = vld [vmem:[#allocation13 + $0x140] ss:$12 sps:$4 sm:$0xff]   ;;  %v8844_v55 = vld [vmem:[#allocation13 + $0x170] ss:$12 sps:$4 sm:$0xff]  }
 0x9f3   :  { %3677 = vadd.xlane.f32.xlu1 %v3665_v60  ;;  %v3666_v41 = vmul.f32 %v7499_v12, %v3651_v40  ;;  %v8828_v12 = vld [vmem:[#allocation13 + $0x8] ss:$12 sps:$4 sm:$0xff]   ;;  %v8841_v25 = vld [vmem:[#allocation13 + $0x80] ss:$12 sps:$4 sm:$0xff]   ;;  %v8842_v40 = vld [vmem:[#allocation13 + $0x158] ss:$12 sps:$4 sm:$0xff]  }
 0x9f4   :  { %4265 = vmatpush1.bf16.msra.mxu0 %v8809_v8  ;;  %8084 = vmatpush3.bf16.msra.mxu1 %v8828_v12  ;;  %v8843_v60 = vld [vmem:[#allocation13 + $0x98] ss:$12 sps:$4 sm:$0xff]  }
 0x9f5   :  { %3679 = vadd.xlane.f32.xlu0 %v3666_v41  ;;  %4266 = vmatprep.subr.bf16.mxu0 %v8814_v11  ;;  %v8845_v41 = vld [vmem:[#allocation13 + $0xb0] ss:$12 sps:$4 sm:$0xff]  }
 0x9f6   :  { %8085 = vmatprep.subr.bf16.mxu1 %v8832_v13 }
 0x9f7   :  { %3681 = vadd.xlane.f32.xlu1 %v3667_v43 }
 0x9f8   :  { %4267 = vmatpush1.bf16.msra.mxu0 %v8812_v15  ;;  %8086 = vmatpush3.bf16.msra.mxu1 %v8833_v30 }
 0x9f9   :  { %3683 = vadd.xlane.f32.xlu0 %v3668_v44  ;;  %4268 = vmatprep.subr.bf16.mxu0 %v8817_v16 }
 0x9fa   :  { %8087 = vmatprep.subr.bf16.mxu1 %v8834_v19 }
 0x9fc   :  { %4269 = vmatpush1.bf16.msra.mxu0 %v8815_v17  ;;  %8088 = vmatpush3.bf16.msra.mxu1 %v8835_v37 }
 0x9fd   :  { %4270 = vmatprep.subr.bf16.mxu0 %v8820_v23  ;;  %8089 = vmatprep.subr.bf16.mxu1 %v8836_v18 }
 0xa00   :  { %4271 = vmatpush1.bf16.msra.mxu0 %v8818_v52  ;;  %8090 = vmatpush3.bf16.msra.mxu1 %v8837_v34 }
 0xa01   :  { %4272 = vmatprep.subr.bf16.mxu0 %v8823_v27  ;;  %8091 = vmatprep.subr.bf16.mxu1 %v8838_v38 }
 0xa04   :  { %4273 = vmatpush1.bf16.msra.mxu0 %v8821_v20  ;;  %8092 = vmatpush3.bf16.msra.mxu1 %v8839_v42 }
 0xa05   :  { %4274 = vmatprep.subr.bf16.mxu0 %v8826_v29  ;;  %8093 = vmatprep.subr.bf16.mxu1 %v8840_v39 }
 0xa08   :  { %4275 = vmatpush1.bf16.msra.mxu0 %v8824_v46  ;;  %8094 = vmatpush3.bf16.msra.mxu1 %v8841_v25 }
 0xa09   :  { %4276 = vmatprep.subr.bf16.mxu0 %v8831_v26  ;;  %8095 = vmatprep.subr.bf16.mxu1 %v8842_v40 }
 0xa0c   :  { %4277 = vmatpush1.bf16.msra.mxu0 %v8829_v28  ;;  %8096 = vmatpush3.bf16.msra.mxu1 %v8843_v60 }
 0xa0d   :  { %8097 = vmatprep.subr.bf16.mxu1 %v8844_v55 }
 0xa10   :  { %8098 = vmatpush3.bf16.msra.mxu1 %v8845_v41 }
 0xa11   :  { %8332 = vmatprep.subr.bf16.mxu1 %v9551_v31 }
 0xa77   :  { %v3674_v43 = vpop.xlane.xlu1 %3673 }
 0xa78   :  { %v3697_v44 = vrot.slane %v3674_v43, 4 }
 0xa79   :  { %v3676_v21 = vpop.xlane.xlu0 %3675 }
 0xa7a   :  { %v3698_v3 = vmax.f32 %v3674_v43, %v3697_v44  ;;  %v3703_v59 = vrot.slane %v3676_v21, 4 }
 0xa7b   :  { %v3670_v51 = vpop.xlane.xlu1 %3669 }
 0xa7c   :  { %v3699_v53 = vrot.slane %v3698_v3, 2  ;;  %v3704_v54 = vmax.f32 %v3676_v21, %v3703_v59  ;;  %v3685_v22 = vrot.slane %v3670_v51, 4 }
 0xa7d   :  { %v3672_v24 = vpop.xlane.xlu0 %3671 }
 0xa7e   :  { %v3700_v56 = vmax.f32 %v3698_v3, %v3699_v53  ;;  %v3705_v57 = vrot.slane %v3704_v54, 2  ;;  %v3686_v58 = vmax.f32 %v3670_v51, %v3685_v22  ;;  %v3691_v62 = vrot.slane %v3672_v24, 4 }
 0xa80   :  { %v3701_v1 = vrot.slane %v3700_v56, 1  ;;  %v3706_v63 = vmax.f32 %v3704_v54, %v3705_v57  ;;  %v3687_v4 = vrot.slane %v3686_v58, 2  ;;  %v3692_v35 = vmax.f32 %v3672_v24, %v3691_v62  ;;  %v3678_v5 = vpop.xlane.xlu1 %3677 }
 0xa81   :  { %v3709_v10 = vrot.slane %v3678_v5, 4 }
 0xa82   :  { %v3702_v9 = vmax.f32 %v3700_v56, %v3701_v1  ;;  %v3707_v8 = vrot.slane %v3706_v63, 1  ;;  %v3688_v11 = vmax.f32 %v3686_v58, %v3687_v4  ;;  %v3693_v14 = vrot.slane %v3692_v35, 2  ;;  %v3680_v12 = vpop.xlane.xlu0 %3679 }
 0xa83   :  { %v3710_v13 = vmax.f32 %v3678_v5, %v3709_v10  ;;  %v3715_v15 = vrot.slane %v3680_v12, 4 }
 0xa84   :  { %v3735_v30 = vsub.f32 %v3674_v43, %v3702_v9  ;;  %v3708_v16 = vmax.f32 %v3706_v63, %v3707_v8  ;;  %v3689_v17 = vrot.slane %v3688_v11, 1  ;;  %v3694_v23 = vmax.f32 %v3692_v35, %v3693_v14  ;;  %v3682_v52 = vpop.xlane.xlu1 %3681 }
 0xa85   :  { %v3711_v27 = vrot.slane %v3710_v13, 2  ;;  %v3716_v20 = vmax.f32 %v3680_v12, %v3715_v15  ;;  %v3721_v29 = vrot.slane %v3682_v52, 4 }
 0xa86   :  { %v3745_v46 = vmul.f32 1.442695, %v3735_v30  ;;  %v3736_v26 = vsub.f32 %v3676_v21, %v3708_v16  ;;  %v3690_v28 = vmax.f32 %v3688_v11, %v3689_v17  ;;  %v3695_v19 = vrot.slane %v3694_v23, 1  ;;  %v3684_v37 = vpop.xlane.xlu0 %3683 }
 0xa87   :  { %v3712_v18 = vmax.f32 %v3710_v13, %v3711_v27  ;;  %v3717_v34 = vrot.slane %v3716_v20, 2  ;;  %v3722_v38 = vmax.f32 %v3682_v52, %v3721_v29  ;;  %v3727_v42 = vrot.slane %v3684_v37, 4 }
 0xa88   :  { %9194 = vpow2.f32 %v3745_v46  ;;  %v3747_v39 = vmul.f32 1.442695, %v3736_v26  ;;  %v3733_v25 = vsub.f32 %v3670_v51, %v3690_v28  ;;  %v3696_v40 = vmax.f32 %v3694_v23, %v3695_v19 }
 0xa89   :  { %v3713_v60 = vrot.slane %v3712_v18, 1  ;;  %v3718_v55 = vmax.f32 %v3716_v20, %v3717_v34  ;;  %v3723_v41 = vrot.slane %v3722_v38, 2  ;;  %v3728_v43 = vmax.f32 %v3684_v37, %v3727_v42 }
 0xa8a   :  { %9196 = vpow2.f32 %v3747_v39  ;;  %v3741_v44 = vmul.f32 1.442695, %v3733_v25  ;;  %v3734_v3 = vsub.f32 %v3672_v24, %v3696_v40 }
 0xa8b   :  { %v3714_v59 = vmax.f32 %v3712_v18, %v3713_v60  ;;  %v3719_v21 = vrot.slane %v3718_v55, 1  ;;  %v3724_v53 = vmax.f32 %v3722_v38, %v3723_v41  ;;  %v3729_v54 = vrot.slane %v3728_v43, 2 }
 0xa8c   :  { %9198 = vpow2.f32 %v3741_v44  ;;  %v3743_v22 = vmul.f32 1.442695, %v3734_v3 }
 0xa8d   :  { %v3737_v56 = vsub.f32 %v3678_v5, %v3714_v59  ;;  %v3720_v57 = vmax.f32 %v3718_v55, %v3719_v21  ;;  %v3725_v58 = vrot.slane %v3724_v53, 1  ;;  %v3730_v62 = vmax.f32 %v3728_v43, %v3729_v54 }
 0xa8e   :  { %9200 = vpow2.f32 %v3743_v22 }
 0xa8f   :  { %v3749_v51 = vmul.f32 1.442695, %v3737_v56  ;;  %v3738_v1 = vsub.f32 %v3680_v12, %v3720_v57  ;;  %v3726_v63 = vmax.f32 %v3724_v53, %v3725_v58  ;;  %v3731_v4 = vrot.slane %v3730_v62, 1 }
 0xa91   :  { %9202 = vpow2.f32 %v3749_v51  ;;  %v3751_v35 = vmul.f32 1.442695, %v3738_v1  ;;  %v3739_v10 = vsub.f32 %v3682_v52, %v3726_v63  ;;  %v3732_v9 = vmax.f32 %v3730_v62, %v3731_v4 }
 0xa92   :  { %v10058_v24 = vpop.eup %9194 }
 0xa93   :  { %v3769_v8 = vrot.slane %v10058_v24, 4  ;;  %9204 = vpow2.f32 %v3751_v35  ;;  %v3753_v11 = vmul.f32 1.442695, %v3739_v10  ;;  %v3740_v14 = vsub.f32 %v3684_v37, %v3732_v9  ;;  %v7961_v9 = vld [vmem:[#allocation7 + $0x8] sm:$0xff]  }
 0xa94   :  { %v10061_v5 = vpop.eup %9196 }
 0xa95   :  { %v3770_v13 = vadd.f32 %v10058_v24, %v3769_v8  ;;  %v3775_v15 = vrot.slane %v10061_v5, 4  ;;  %9206 = vpow2.f32 %v3753_v11  ;;  %v3755_v12 = vmul.f32 1.442695, %v3740_v14 }
 0xa96   :  { %v10065_v30 = vpop.eup %9198 }
 0xa97   :  { %v3771_v16 = vrot.slane %v3770_v13, 2  ;;  %v3776_v17 = vadd.f32 %v10061_v5, %v3775_v15  ;;  %v3757_v23 = vrot.slane %v10065_v30, 4  ;;  %9208 = vpow2.f32 %v3755_v12 }
 0xa98   :  { %v10069_v52 = vpop.eup %9200  ;;  %v7872_v15 = vunpack.c.l.bf16 %v7961_v9 }
 0xa99   :  { %v3772_v27 = vadd.f32 %v3771_v16, %v3770_v13  ;;  %v3777_v20 = vrot.slane %v3776_v17, 2  ;;  %v3758_v29 = vadd.f32 %v10065_v30, %v3757_v23  ;;  %v3763_v46 = vrot.slane %v10069_v52, 4  ;;  %v7867_v23 = vld [vmem:[#allocation7] sm:$0xff]  }
 0xa9b   :  { %v10073_v26 = vpop.eup %9202  ;;  %v3773_v28 = vrot.slane %v3772_v27, 1  ;;  %v3778_v19 = vadd.f32 %v3777_v20, %v3776_v17  ;;  %v3759_v37 = vrot.slane %v3758_v29, 2  ;;  %v3764_v18 = vadd.f32 %v10069_v52, %v3763_v46 }
 0xa9c   :  { %v3781_v34 = vrot.slane %v10073_v26, 4  ;;  %v7873_v20 = vunpack.c.h.bf16 %v7961_v9 }
 0xa9d   :  { %v10077_v38 = vpop.eup %9204  ;;  %v3774_v42 = vadd.f32 %v3773_v28, %v3772_v27  ;;  %v3779_v39 = vrot.slane %v3778_v19, 1  ;;  %v3760_v25 = vadd.f32 %v3759_v37, %v3758_v29  ;;  %v3765_v40 = vrot.slane %v3764_v18, 2 }
 0xa9e   :  { %v3782_v60 = vadd.f32 %v10073_v26, %v3781_v34  ;;  %v3787_v55 = vrot.slane %v10077_v38, 4  ;;  %v7868_v37 = vunpack.c.l.bf16 %v7867_v23 }
 0xa9f   :  { %v10081_v41 = vpop.eup %9206  ;;  %9210 = vrcp.f32 %v3774_v42  ;;  %v3780_v43 = vadd.f32 %v3779_v39, %v3778_v19  ;;  %v3761_v44 = vrot.slane %v3760_v25, 1  ;;  %v3766_v3 = vadd.f32 %v3765_v40, %v3764_v18 }
 0xaa0   :  { %v3783_v59 = vrot.slane %v3782_v60, 2  ;;  %v3788_v21 = vadd.f32 %v10077_v38, %v3787_v55  ;;  %v3793_v53 = vrot.slane %v10081_v41, 4 }
 0xaa1   :  { %v10085_v54 = vpop.eup %9208  ;;  %9212 = vrcp.f32 %v3780_v43  ;;  %v3762_v22 = vadd.f32 %v3761_v44, %v3760_v25  ;;  %v3767_v56 = vrot.slane %v3766_v3, 1  ;;  %v7869_v25 = vunpack.c.h.bf16 %v7867_v23 }
 0xaa2   :  { %v3784_v57 = vadd.f32 %v3783_v59, %v3782_v60  ;;  %v3789_v58 = vrot.slane %v3788_v21, 2  ;;  %v3794_v62 = vadd.f32 %v10081_v41, %v3793_v53  ;;  %v3799_v51 = vrot.slane %v10085_v54, 4  ;;  %v7962_v60 = vld [vmem:[#allocation7 + $0x10] sm:$0xff]  }
 0xaa3   :  { %9214 = vrcp.f32 %v3762_v22  ;;  %v3768_v1 = vadd.f32 %v3767_v56, %v3766_v3  ;;  %v7876_v53 = vunpack.c.l.bf16 %v7962_v60  ;;  %v7963_v56 = vld [vmem:[#allocation7 + $0x18] sm:$0xff]  }
 0xaa4   :  { %v3785_v63 = vrot.slane %v3784_v57, 1  ;;  %v3790_v4 = vadd.f32 %v3789_v58, %v3788_v21  ;;  %v3795_v35 = vrot.slane %v3794_v62, 2  ;;  %v3800_v10 = vadd.f32 %v10085_v54, %v3799_v51 }
 0xaa5   :  { %9216 = vrcp.f32 %v3768_v1  ;;  %v7880_v9 = vunpack.c.l.bf16 %v7963_v56 }
 0xaa6   :  { %v3786_v8 = vadd.f32 %v3785_v63, %v3784_v57  ;;  %v3791_v11 = vrot.slane %v3790_v4, 1  ;;  %v3796_v14 = vadd.f32 %v3795_v35, %v3794_v62  ;;  %v3801_v13 = vrot.slane %v3800_v10, 2 }
 0xaa8   :  { %9218 = vrcp.f32 %v3786_v8  ;;  %v3792_v12 = vadd.f32 %v3791_v11, %v3790_v4  ;;  %v3797_v16 = vrot.slane %v3796_v14, 1  ;;  %v3802_v17 = vadd.f32 %v3801_v13, %v3800_v10 }
 0xaa9   :  { %v9211_v27 = vpop.eup %9210 }
 0xaaa   :  { %v3798_v29 = vadd.f32 %v3797_v16, %v3796_v14  ;;  %v3803_v46 = vrot.slane %v3802_v17, 1  ;;  %v3810_v28 = vmul.f32 %v9211_v27, %v10058_v24  ;;  %9220 = vrcp.f32 %v3792_v12 }
 0xaab   :  { %v9213_v19 = vpop.eup %9212  ;;  %v7881_v16 = vunpack.c.h.bf16 %v7963_v56 }
 0xaac   :  { %v3804_v18 = vadd.f32 %v3803_v46, %v3802_v17  ;;  %v3812_v34 = vmul.f32 %v9213_v19, %v10061_v5  ;;  %9222 = vrcp.f32 %v3798_v29  ;;  %v3839_v42 = vmul.f32 %v7872_v15, %v3810_v28 }
 0xaad   :  { %v9215_v39 = vpop.eup %9214 }
 0xaae   :  { %v3806_v40 = vmul.f32 %v9215_v39, %v10065_v30  ;;  %9224 = vrcp.f32 %v3804_v18  ;;  %v3840_v55 = vmul.f32 %v7873_v20, %v3812_v34  ;;  %v3857_v43 = vrot.slane %v3839_v42, 4 }
 0xaaf   :  { %v9217_v44 = vpop.eup %9216  ;;  %v7877_v30 = vunpack.c.h.bf16 %v7962_v60 }
 0xab0   :  { %v3808_v3 = vmul.f32 %v9217_v44, %v10069_v52  ;;  %v3837_v24 = vmul.f32 %v7868_v37, %v3806_v40  ;;  %v3858_v59 = vadd.f32 %v3857_v43, %v3839_v42  ;;  %v3863_v21 = vrot.slane %v3840_v55, 4 }
 0xab2   :  { %v9219_v22 = vpop.eup %9218  ;;  %v3838_v5 = vmul.f32 %v7869_v25, %v3808_v3  ;;  %v3845_v57 = vrot.slane %v3837_v24, 4  ;;  %v3859_v58 = vrot.slane %v3858_v59, 2  ;;  %v3864_v62 = vadd.f32 %v3863_v21, %v3840_v55 }
 0xab3   :  { %v3814_v51 = vmul.f32 %v9219_v22, %v10073_v26 }
 0xab4   :  { %v9221_v1 = vpop.eup %9220  ;;  %v3846_v63 = vadd.f32 %v3845_v57, %v3837_v24  ;;  %v3851_v4 = vrot.slane %v3838_v5, 4  ;;  %v3860_v35 = vadd.f32 %v3859_v58, %v3858_v59  ;;  %v3865_v10 = vrot.slane %v3864_v62, 2 }
 0xab5   :  { %v3816_v52 = vmul.f32 %v9221_v1, %v10077_v38  ;;  %v3841_v8 = vmul.f32 %v7876_v53, %v3814_v51 }
 0xab6   :  { %v9223_v11 = vpop.eup %9222  ;;  %v3847_v14 = vrot.slane %v3846_v63, 2  ;;  %v3852_v13 = vadd.f32 %v3851_v4, %v3838_v5  ;;  %v3866_v15 = vadd.f32 %v3865_v10, %v3864_v62  ;;  %v3861_v29 = vrot.slane %v3860_v35, 1 }
 0xab7   :  { %v3818_v12 = vmul.f32 %v9223_v11, %v10081_v41  ;;  %v3842_v17 = vmul.f32 %v7877_v30, %v3816_v52  ;;  %v3869_v23 = vrot.slane %v3841_v8, 4 }
 0xab8   :  { %v9225_v26 = vpop.eup %9224  ;;  %v3848_v27 = vadd.f32 %v3847_v14, %v3846_v63  ;;  %v3853_v20 = vrot.slane %v3852_v13, 2  ;;  %v3867_v46 = vrot.slane %v3866_v15, 1  ;;  %v3862_v55 = vadd.f32 %v3861_v29, %v3860_v35 }
 0xab9   :  { %v3820_v28 = vmul.f32 %v9225_v26, %v10085_v54  ;;  %v3843_v19 = vmul.f32 %v7880_v9, %v3818_v12  ;;  %v3870_v38 = vadd.f32 %v3869_v23, %v3841_v8  ;;  %v3875_v37 = vrot.slane %v3842_v17, 4 }
 0xaba   :  { %v3849_v18 = vrot.slane %v3848_v27, 1  ;;  %v3854_v34 = vadd.f32 %v3853_v20, %v3852_v13  ;;  %v3868_v43 = vadd.f32 %v3867_v46, %v3866_v15  ;;  %v3895_v58 = vpack.c.bf16 %v3862_v55, %v3862_v55  ;;  %v8853_v55 = vld [vmem:[#allocation10 + $0x24] ss:$16 sps:$4 sm:$0xff]  }
 0xabb   :  { %v3844_v42 = vmul.f32 %v7881_v16, %v3820_v28  ;;  %v3871_v39 = vrot.slane %v3870_v38, 2  ;;  %v3876_v25 = vadd.f32 %v3875_v37, %v3842_v17  ;;  %v3881_v40 = vrot.slane %v3843_v19, 4 }
 0xabc   :  { %v3850_v41 = vadd.f32 %v3849_v18, %v3848_v27  ;;  %v3855_v60 = vrot.slane %v3854_v34, 1  ;;  %v3896_v62 = vpack.c.bf16 %v3868_v43, %v3868_v43  ;;  %v3911_v11 = vunpack.c.l.b16 %v3895_v58  ;;  %v8851_v43 = vld [vmem:[#allocation10 + $0x20] ss:$16 sps:$4 sm:$0xff]  }
 0xabd   :  { %v3872_v44 = vadd.f32 %v3871_v39, %v3870_v38  ;;  %v3877_v3 = vrot.slane %v3876_v25, 2  ;;  %v3882_v24 = vadd.f32 %v3881_v40, %v3843_v19  ;;  %v3887_v59 = vrot.slane %v3844_v42, 4  ;;  %v3081_v39 = vld [vmem:[#allocation2 + $0x8] sm:$0xf]  ;;  %v8867_v58 = vld [vmem:[#allocation10 + $0xa0] ss:$16 sps:$4 sm:$0xff]  }
 0xabe   :  { %v3856_v21 = vadd.f32 %v3855_v60, %v3854_v34  ;;  %v3893_v53 = vpack.c.bf16 %v3850_v41, %v3850_v41  ;;  %v3912_v14 = vunpack.c.l.b16 %v3896_v62  ;;  %v8849_v40 = vld [vmem:[#allocation10 + $0x4] ss:$16 sps:$4 sm:$0xff]   ;;  %v8847_v41 = vld [vmem:[#allocation10] ss:$16 sps:$4 sm:$0xff]   ;;  %v8850_v60 = vld [vmem:[#allocation14 + $0x8] sm:$0xff]  }
 0xabf   :  { %v3873_v54 = vrot.slane %v3872_v44, 1  ;;  %v3878_v22 = vadd.f32 %v3877_v3, %v3876_v25  ;;  %v3883_v56 = vrot.slane %v3882_v24, 2  ;;  %v3888_v5 = vadd.f32 %v3887_v59, %v3844_v42  ;;  %v8846_v25 = vld [vmem:[#allocation14] sm:$0xff]   ;;  %4652 = vmatprep.subr.bf16.mxu0 %v8849_v40  ;;  %v8858_v59 = vld [vmem:[#allocation14 + $0x18] sm:$0xff]  }
 0xac0   :  { %v3894_v57 = vpack.c.bf16 %v3856_v21, %v3856_v21  ;;  %v3909_v4 = vunpack.c.l.b16 %v3893_v53  ;;  %v8857_v3 = vld [vmem:[#allocation10 + $0x44] ss:$16 sps:$4 sm:$0xff]   ;;  %v8859_v53 = vld [vmem:[#allocation10 + $0x60] ss:$16 sps:$4 sm:$0xff]  }
 0xac1   :  { %v3874_v51 = vadd.f32 %v3873_v54, %v3872_v44  ;;  %v3879_v30 = vrot.slane %v3878_v22, 1  ;;  %v3884_v1 = vadd.f32 %v3883_v56, %v3882_v24  ;;  %v3889_v63 = vrot.slane %v3888_v5, 2  ;;  %v8854_v44 = vld [vmem:[#allocation14 + $0x10] sm:$0xff]   ;;  %v8862_v54 = vld [vmem:[#allocation14 + $0x20] sm:$0xff]  }
 0xac2   :  { %v3910_v35 = vunpack.c.l.b16 %v3894_v57  ;;  %v8855_v24 = vld [vmem:[#allocation10 + $0x40] ss:$16 sps:$4 sm:$0xff]   ;;  %v8861_v21 = vld [vmem:[#allocation10 + $0x64] ss:$16 sps:$4 sm:$0xff]   ;;  %v8866_v57 = vld [vmem:[#allocation14 + $0x28] sm:$0xff]  }
 0xac3   :  { %v3880_v10 = vadd.f32 %v3879_v30, %v3878_v22  ;;  %v3885_v52 = vrot.slane %v3884_v1, 1  ;;  %v3890_v9 = vadd.f32 %v3889_v63, %v3888_v5  ;;  %v3897_v8 = vpack.c.bf16 %v3874_v51, %v3874_v51  ;;  %v8863_v22 = vld [vmem:[#allocation10 + $0x80] ss:$16 sps:$4 sm:$0xff]   ;;  %v8865_v56 = vld [vmem:[#allocation10 + $0x84] ss:$16 sps:$4 sm:$0xff]   ;;  %v8874_v63 = vld [vmem:[#allocation14 + $0x38] sm:$0xff]  }
 0xac4   :  { %v3917_v13 = vsel %vm1045_vm0, %v3910_v35, %v3909_v4  ;;  %v8869_v5 = vld [vmem:[#allocation10 + $0xa4] ss:$16 sps:$4 sm:$0xff]   ;;  %v8871_v30 = vld [vmem:[#allocation10 + $0xc0] ss:$16 sps:$4 sm:$0xff]   ;;  %v8880_v35 = vld [vmem:[#allocation10 + $0xc] ss:$16 sps:$4 sm:$0xff]  }
 0xac5   :  { %v3886_v15 = vadd.f32 %v3885_v52, %v3884_v1  ;;  %v3891_v12 = vrot.slane %v3890_v9, 1  ;;  %v3898_v16 = vpack.c.bf16 %v3880_v10, %v3880_v10  ;;  %v3913_v17 = vunpack.c.l.b16 %v3897_v8  ;;  %v8873_v62 = vld [vmem:[#allocation10 + $0xc4] ss:$16 sps:$4 sm:$0xff]   ;;  %v8875_v4 = vld [vmem:[#allocation10 + $0xe0] ss:$16 sps:$4 sm:$0xff]  }
 0xac6   :  { %v3918_v23 = vsel %vm1047_vm1, %v3911_v11, %v3917_v13  ;;  %v8870_v51 = vld [vmem:[#allocation14 + $0x30] sm:$0xff]   ;;  %v8902_v10 = vld [vmem:[#allocation11] sm:$0xff]   ;;  %v4327_v8 = vadd.f32 %v10032_v61, %v9878_v47 }
 0xac7   :  { %v3892_v26 = vadd.f32 %v3891_v12, %v3890_v9  ;;  %v3899_v27 = vpack.c.bf16 %v3886_v15, %v3886_v15  ;;  %v3914_v20 = vunpack.c.l.b16 %v3898_v16  ;;  %v3919_v29 = vsel %vm1049_vm2, %v3912_v14, %v3918_v23  ;;  %v8877_v1 = vld [vmem:[#allocation10 + $0xe4] ss:$16 sps:$4 sm:$0xff]  }
 0xac8   :  { %v3920_v46 = vsel %vm1051_vm3, %v3913_v17, %v3919_v29  ;;  %v4328_v15 = vadd.f32 %v10047_v33, %v9883_v49  ;;  %v4329_v33 = vadd.f32 %v10049_v36, %v9893_v6  ;;  %v8883_v36 = vld [vmem:[#allocation10 + $0x2c] ss:$16 sps:$4 sm:$0xff]  }
 0xac9   :  { %v3900_v28 = vpack.c.bf16 %v3892_v26, %v3892_v26  ;;  %v3915_v19 = vunpack.c.l.b16 %v3899_v27  ;;  %v3921_v38 = vsel %vm1053_vm4, %v3914_v20, %v3920_v46 }
 0xacb   :  { %v3916_v37 = vunpack.c.l.b16 %v3900_v28  ;;  %v3922_v18 = vsel %vm1055_vm5, %v3915_v19, %v3921_v38 }
 0xacd   :  { %v3923_v34 = vsel %vm1057_vm6, %v3916_v37, %v3922_v18 }
 0xace   :  { %v3924_v42 = vpack.c.b16 %v3923_v34, %v3923_v34 }
 0xad0   :  { %4278 = vmatprep.mubr.bf16.mxu0 %v3924_v42  ;;  %4319 = vmatprep.mubr.bf16.mxu1 %v3924_v42 }
 0xad1   :  { %4279 = vmatmul.mubr.bf16.vlgmr.msra.gmra.mrb[44].mxu0 %v3081_v39  ;;  %4320 = vmatmul.mubr.bf16.vlgmr.msra.gmra.mrb[32].mxu1 %v3081_v39 }
 0xad2   :  { %8348 = vmatprep.mubr.msk.bf16.mxu1 %vm9552_vm7, %v9551_v31  ;;  %4684 = vmatprep.mubr.bf16.mxu0 %v9549_v0 }
 0xad3   :  { %8333 = vmatpush3.bf16.msra.mxu1 %v8846_v25  ;;  %4653 = vmatpush1.bf16.msra.mxu0 %v8847_v41 }
 0xad4   :  { %8334 = vmatprep.subr.bf16.mxu1 %v9551_v31  ;;  %4654 = vmatprep.subr.bf16.mxu0 %v8853_v55 }
 0xad7   :  { %8335 = vmatpush3.bf16.msra.mxu1 %v8850_v60  ;;  %4655 = vmatpush1.bf16.msra.mxu0 %v8851_v43 }
 0xad8   :  { %8336 = vmatprep.subr.bf16.mxu1 %v9551_v31  ;;  %4656 = vmatprep.subr.bf16.mxu0 %v8857_v3 }
 0xadb   :  { %8337 = vmatpush3.bf16.msra.mxu1 %v8854_v44  ;;  %4657 = vmatpush1.bf16.msra.mxu0 %v8855_v24  ;;  %v8878_v44 = vld [vmem:[#allocation10 + $0x8] ss:$16 sps:$4 sm:$0xff]  }
 0xadc   :  { %8338 = vmatprep.subr.bf16.mxu1 %v9551_v31  ;;  %4658 = vmatprep.subr.bf16.mxu0 %v8861_v21  ;;  %v8903_v24 = vld [vmem:[#allocation11 + $0x8] sm:$0xff]  }
 0xadd   :  { %v8886_v21 = vld [vmem:[#allocation10 + $0x4c] ss:$16 sps:$4 sm:$0xff]  }
 0xadf   :  { %8339 = vmatpush3.bf16.msra.mxu1 %v8858_v59  ;;  %4659 = vmatpush1.bf16.msra.mxu0 %v8859_v53  ;;  %v8881_v59 = vld [vmem:[#allocation10 + $0x28] ss:$16 sps:$4 sm:$0xff]   ;;  %v8904_v53 = vld [vmem:[#allocation11 + $0x10] sm:$0xff]  }
 0xae0   :  { %8340 = vmatprep.subr.bf16.mxu1 %v9551_v31  ;;  %4660 = vmatprep.subr.bf16.mxu0 %v8865_v56  ;;  %v8887_v56 = vld [vmem:[#allocation10 + $0x68] ss:$16 sps:$4 sm:$0xff]  }
 0xae3   :  { %8341 = vmatpush3.bf16.msra.mxu1 %v8862_v54  ;;  %4661 = vmatpush1.bf16.msra.mxu0 %v8863_v22  ;;  %v8889_v54 = vld [vmem:[#allocation10 + $0x6c] ss:$16 sps:$4 sm:$0xff]  }
 0xae4   :  { %8342 = vmatprep.subr.bf16.mxu1 %v9551_v31  ;;  %4662 = vmatprep.subr.bf16.mxu0 %v8869_v5  ;;  %v8905_v22 = vld [vmem:[#allocation11 + $0x18] sm:$0xff]  }
 0xae5   :  { %v8892_v5 = vld [vmem:[#allocation10 + $0x8c] ss:$16 sps:$4 sm:$0xff]  }
 0xae7   :  { %8343 = vmatpush3.bf16.msra.mxu1 %v8866_v57  ;;  %4663 = vmatpush1.bf16.msra.mxu0 %v8867_v58  ;;  %v8890_v57 = vld [vmem:[#allocation10 + $0x88] ss:$16 sps:$4 sm:$0xff]   ;;  %v8895_v58 = vld [vmem:[#allocation10 + $0xac] ss:$16 sps:$4 sm:$0xff]  }
 0xae8   :  { %8344 = vmatprep.subr.bf16.mxu1 %v9551_v31  ;;  %4664 = vmatprep.subr.bf16.mxu0 %v8873_v62  ;;  %v8893_v62 = vld [vmem:[#allocation10 + $0xa8] ss:$16 sps:$4 sm:$0xff]  }
 0xaeb   :  { %8345 = vmatpush3.bf16.msra.mxu1 %v8870_v51  ;;  %4665 = vmatpush1.bf16.msra.mxu0 %v8871_v30  ;;  %v8898_v51 = vld [vmem:[#allocation10 + $0xcc] ss:$16 sps:$4 sm:$0xff]   ;;  %v8896_v30 = vld [vmem:[#allocation10 + $0xc8] ss:$16 sps:$4 sm:$0xff]  }
 0xaec   :  { %8346 = vmatprep.subr.bf16.mxu1 %v9551_v31  ;;  %4666 = vmatprep.subr.bf16.mxu0 %v8877_v1  ;;  %v8901_v1 = vld [vmem:[#allocation10 + $0xec] ss:$16 sps:$4 sm:$0xff]  }
 0xaef   :  { %8347 = vmatpush3.bf16.msra.mxu1 %v8874_v63  ;;  %4667 = vmatpush1.bf16.msra.mxu0 %v8875_v4  ;;  %v8899_v63 = vld [vmem:[#allocation10 + $0xe8] ss:$16 sps:$4 sm:$0xff]   ;;  %v8906_v4 = vld [vmem:[#allocation11 + $0x20] sm:$0xff]  }
 0xaf0   :  { %4693 = vmatprep.subr.bf16.mxu1 %v8880_v35  ;;  %8352 = vmatprep.subr.bf16.mxu0 %v8902_v10  ;;  %v8907_v35 = vld [vmem:[#allocation11 + $0x28] sm:$0xff]  }
 0xba4   :  { %v4280_v52 = vpop.f32.mrb[44].mxu0  ;;  %v8099_v9 = vpop.f32.mrb[32].mxu1 }
 0xba5   :  { %v4281_v11 = vadd.f32 %v4280_v52, %v9881_v48  ;;  %v4282_v14 = vpop.f32.mrb[45].mxu0  ;;  %v8100_v13 = vpop.f32.mrb[33].mxu1  ;;  %v8909_v52 = vld [vmem:[#allocation11 + $0x38] sm:$0xff]  }
 0xba6   :  { %v4283_v12 = vadd.f32 %v4282_v14, %v9885_v50  ;;  %v4284_v16 = vpop.f32.mrb[46].mxu0  ;;  %v8101_v17 = vadd.f32 %v8100_v13, %v8099_v9  ;;  %v8102_v23 = vpop.f32.mrb[34].mxu1 }
 0xba7   :  { %v4330_v26 = vadd.f32 %v4327_v8, %v4281_v11  ;;  %v4285_v27 = vpop.f32.mrb[47].mxu0  ;;  %v8103_v20 = vpop.f32.mrb[35].mxu1  ;;  %v9322_v11 = vld [vmem:[%s10356_s13] ss:$0 sm:$0xff] }
 0xba8   :  { %v4337_v29 = vadd.f32 %v4328_v15, %v4283_v12  ;;  %v4322_v18 = vadd.f32 %v8101_v17, %v9895_v7  ;;  %v7883_v17 = vld [vmem:[#allocation5] sm:$0xff]   ;;  %v7964_v27 = vld [vmem:[#allocation5 + $0x8] sm:$0xff]  }
 0xba9   :  { %v7548_v46 = vmul.f32 -1.442695, %v4330_v26 }
 0xbaa   :  { %v7549_v28 = vmul.f32 -1.442695, %v4337_v29 }
 0xbab   :  { %9226 = vpow2.f32 %v7548_v46 }
 0xbac   :  { %9228 = vpow2.f32 %v7549_v28 }
 0xbb5   :  { %v9227_v61 = vpop.eup %9226 }
 0xbb6   :  { %v4334_v19 = vadd.f32 1.0, %v9227_v61  ;;  %v9229_v38 = vpop.eup %9228 }
 0xbb7   :  { %v4341_v37 = vadd.f32 1.0, %v9229_v38  ;;  %v7884_v38 = vunpack.c.l.bf16 %v7883_v17 }
 0xbb8   :  { %9230 = vrcp.f32 %v4334_v19  ;;  %v7965_v19 = vld [vmem:[#allocation5 + $0x10] sm:$0xff]  }
 0xbb9   :  { %9232 = vrcp.f32 %v4341_v37  ;;  %v7885_v37 = vunpack.c.h.bf16 %v7883_v17 }
 0xbc2   :  { %v9231_v34 = vpop.eup %9230 }
 0xbc3   :  { %v4344_v42 = vmul.f32 %v9231_v34, %v4329_v33  ;;  %v9233_v25 = vpop.eup %9232 }
 0xbc4   :  { %v4347_v40 = vsub.f32 1.0, %v9233_v25  ;;  %v4349_v55 = vmul.f32 %v9233_v25, %v10023_v2  ;;  %v8884_v2 = vld [vmem:[#allocation10 + $0x48] ss:$16 sps:$4 sm:$0xff]  }
 0xbc5   :  { %v4345_v39 = vadd.f32 %v4344_v42, %v4322_v18 }
 0xbc7   :  { %9234 = vtanh.f32 %v4345_v39  ;;  %v7888_v39 = vunpack.c.l.bf16 %v7964_v27 }
 0xbd1   :  { %v9235_v41 = vpop.eup %9234 }
 0xbd2   :  { %v4348_v60 = vmul.f32 %v9235_v41, %v4347_v40  ;;  %v7889_v40 = vunpack.c.h.bf16 %v7964_v27  ;;  %v7892_v41 = vunpack.c.l.bf16 %v7965_v19 }
 0xbd4   :  { %v10125_v43 = vadd.f32 %v4349_v55, %v4348_v60 }
 0xbd6   :  { %v4351_v3 = vpack.c.bf16 %v10125_v43, %v10125_v43 }
 0xbd8   :  { %8349 = vmatmul.mubr.bf16.vlgmr.msra.gmra.mrb[36].mxu1 %v4351_v3  ;;  %4685 = vmatmul.mubr.bf16.vlgmr.msra.gmra.mrb[48].mxu0 %v4351_v3 }
 0xbd9   :  { %4694 = vmatpush1.bf16.msra.mxu1 %v8878_v44  ;;  %4725 = vmatprep.mubr.bf16.mxu1 %v9549_v0 }
 0xbda   :  { %4695 = vmatprep.subr.bf16.mxu1 %v8883_v36  ;;  %8353 = vmatpush3.bf16.msra.mxu0 %v8902_v10  ;;  %v8908_v10 = vld [vmem:[#allocation11 + $0x30] sm:$0xff]  }
 0xbdb   :  { %8354 = vmatprep.subr.bf16.mxu0 %v8903_v24 }
 0xbdd   :  { %4696 = vmatpush1.bf16.msra.mxu1 %v8881_v59 }
 0xbde   :  { %4697 = vmatprep.subr.bf16.mxu1 %v8886_v21  ;;  %8355 = vmatpush3.bf16.msra.mxu0 %v8903_v24 }
 0xbdf   :  { %8356 = vmatprep.subr.bf16.mxu0 %v8904_v53 }
 0xbe1   :  { %4698 = vmatpush1.bf16.msra.mxu1 %v8884_v2 }
 0xbe2   :  { %4699 = vmatprep.subr.bf16.mxu1 %v8889_v54  ;;  %8357 = vmatpush3.bf16.msra.mxu0 %v8904_v53 }
 0xbe3   :  { %8358 = vmatprep.subr.bf16.mxu0 %v8905_v22 }
 0xbe5   :  { %4700 = vmatpush1.bf16.msra.mxu1 %v8887_v56  ;;  %v7966_v56 = vld [vmem:[#allocation5 + $0x18] sm:$0xff]  }
 0xbe6   :  { %4701 = vmatprep.subr.bf16.mxu1 %v8892_v5  ;;  %8359 = vmatpush3.bf16.msra.mxu0 %v8905_v22 }
 0xbe7   :  { %8360 = vmatprep.subr.bf16.mxu0 %v8906_v4 }
 0xbe9   :  { %4702 = vmatpush1.bf16.msra.mxu1 %v8890_v57 }
 0xbea   :  { %4703 = vmatprep.subr.bf16.mxu1 %v8895_v58  ;;  %8361 = vmatpush3.bf16.msra.mxu0 %v8906_v4 }
 0xbeb   :  { %8362 = vmatprep.subr.bf16.mxu0 %v8907_v35 }
 0xbed   :  { %4704 = vmatpush1.bf16.msra.mxu1 %v8893_v62  ;;  %v7897_v62 = vunpack.c.h.bf16 %v7966_v56 }
 0xbee   :  { %4705 = vmatprep.subr.bf16.mxu1 %v8898_v51  ;;  %8363 = vmatpush3.bf16.msra.mxu0 %v8907_v35  ;;  %v7896_v35 = vunpack.c.l.bf16 %v7966_v56 }
 0xbef   :  { %8364 = vmatprep.subr.bf16.mxu0 %v8908_v10 }
 0xbf1   :  { %4706 = vmatpush1.bf16.msra.mxu1 %v8896_v30 }
 0xbf2   :  { %4707 = vmatprep.subr.bf16.mxu1 %v8901_v1  ;;  %8365 = vmatpush3.bf16.msra.mxu0 %v8908_v10 }
 0xbf3   :  { %8366 = vmatprep.subr.bf16.mxu0 %v8909_v52 }
 0xbf5   :  { %4708 = vmatpush1.bf16.msra.mxu1 %v8899_v63 }
 0xbf6   :  { %8367 = vmatpush3.bf16.msra.mxu0 %v8909_v52 }
 0xbf8   :  { %4726 = vmatmul.mubr.bf16.vlgmr.msra.gmra.mrb[40].mxu1 %v4351_v3  ;;  %v7893_v3 = vunpack.c.h.bf16 %v7965_v19 }
 0xcab   :  { %v4450_v9 = vpop.f32.mrb[36].mxu1  ;;  %v4686_v8 = vpop.f32.mrb[48].mxu0 }
 0xcac   :  { %v4451_v14 = vadd.f32 %v9322_v11, %v4450_v9  ;;  %v4743_v13 = vcombine.high %v4686_v8, %v4686_v8  ;;  %v4750_v15 = vrot.slane %v4686_v8, %v9779_v32  ;;  %v8350_v12 = vpop.f32.mrb[37].mxu1  ;;  %v10134_v16 = vpop.f32.mrb[49].mxu0 }
 0xcad   :  { %v4453_v23 = vpop.f32.mrb[38].mxu1  ;;  %v4690_v26 = vpop.f32.mrb[50].mxu0 }
 0xcae   :  { %4457 = vst [vmem:[#allocation16 + $0x10] sm:$0xff] %v4451_v14  ;;  %v4757_v20 = vrot.slane %v4743_v13, %v9779_v32  ;;  %v4758_v29 = vcombine.high %v4750_v15, %v4750_v15  ;;  %v4766_v46 = vrot.slane %v4750_v15, %v9779_v32  ;;  %v8351_v28 = vpop.f32.mrb[39].mxu1  ;;  %v4691_v61 = vpop.f32.mrb[51].mxu0 }
 0xcaf   :  { %v7590_v28 = vld [vmem:[%s10350_s7] ss:$0 sm:$0xff] }
 0xcb0   :  { %v4759_v33 = vcombine.high %v4757_v20, %v4757_v20  ;;  %v4773_v18 = vrot.slane %v4757_v20, %v9779_v32  ;;  %v4780_v34 = vrot.slane %v4758_v29, %v9779_v32  ;;  %v4788_v42 = vcombine.high %v4766_v46, %v4766_v46 }
 0xcb1   :  { %v4803_v25 = vrot.slane %v4766_v46, %v9787_v45 }
 0xcb2   :  { %v4787_v60 = vrot.slane %v4759_v33, %v9779_v32  ;;  %v4790_v55 = vcombine.high %v4780_v34, %v4780_v34  ;;  %v4807_v44 = vrot.slane %v4780_v34, %v9787_v45  ;;  %v4789_v36 = vcombine.high %v4773_v18, %v4773_v18 }
 0xcb3   :  { %v4811_v24 = vrot.slane %v4788_v42, %v9787_v45  ;;  %v4819_v59 = vrot.slane %v4773_v18, %v9787_v45  ;;  %v4840_v21 = vadd.f32 %v7884_v38, %v4803_v25  ;;  %v7603_v18 = vld [vmem:[%s10351_s8] ss:$0 sm:$0xff] }
 0xcb4   :  { %v4791_v53 = vcombine.high %v4787_v60, %v4787_v60  ;;  %v4815_v2 = vrot.slane %v4790_v55, %v9787_v45  ;;  %v4841_v54 = vadd.f32 %v7885_v37, %v4807_v44  ;;  %v4823_v22 = vrot.slane %v4787_v60, %v9787_v45 }
 0xcb5   :  { %v4842_v5 = vadd.f32 %v7888_v39, %v4811_v24  ;;  %v4848_v57 = vmax.f32 %v4840_v21, 0.0  ;;  %v4844_v58 = vadd.f32 %v7892_v41, %v4819_v59  ;;  %v4827_v10 = vrot.slane %v4789_v36, %v9787_v45 }
 0xcb6   :  { %v4849_v51 = vmax.f32 %v4841_v54, 0.0  ;;  %v4843_v30 = vadd.f32 %v7889_v40, %v4815_v2  ;;  %v4845_v1 = vadd.f32 %v7893_v3, %v4823_v22  ;;  %v4831_v63 = vrot.slane %v4791_v53, %v9787_v45 }
 0xcb7   :  { %v4850_v4 = vmax.f32 %v4842_v5, 0.0  ;;  %v4852_v8 = vmax.f32 %v4844_v58, 0.0  ;;  %v4846_v12 = vadd.f32 %v7896_v35, %v4827_v10  ;;  %v8910_v35 = vld [vmem:[#allocation13] ss:$12 sps:$4 sm:$0xff]   ;;  %v8915_v10 = vld [vmem:[#allocation13 + $0x1c] ss:$12 sps:$4 sm:$0xff]  }
 0xcb8   :  { %v7778_v52 = vpack.c.bf16 %v4849_v51, %v4848_v57  ;;  %v4851_v9 = vmax.f32 %v4843_v30, 0.0  ;;  %v4853_v11 = vmax.f32 %v4845_v1, 0.0  ;;  %v4847_v15 = vadd.f32 %v7897_v62, %v4831_v63 }
 0xcb9   :  { %v4854_v23 = vmax.f32 %v4846_v12, 0.0  ;;  %v8927_v12 = vld [vmem:[#allocation13 + $0x7c] ss:$12 sps:$4 sm:$0xff]  }
 0xcba   :  { %8368 = vmatprep.mubr.bf16.mxu0 %v7778_v52  ;;  %v7779_v14 = vpack.c.bf16 %v4851_v9, %v4850_v4  ;;  %v7780_v13 = vpack.c.bf16 %v4853_v11, %v4852_v8  ;;  %v4855_v17 = vmax.f32 %v4847_v15, 0.0  ;;  %v8912_v4 = vld [vmem:[#allocation13 + $0x4] ss:$12 sps:$4 sm:$0xff]   ;;  %v8918_v9 = vld [vmem:[#allocation13 + $0x34] ss:$12 sps:$4 sm:$0xff]  }
 0xcbb   :  { %5624 = vmatprep.subr.bf16.mxu1 %v8912_v4  ;;  %v8913_v52 = vld [vmem:[#allocation13 + $0x18] ss:$12 sps:$4 sm:$0xff]   ;;  %v8916_v8 = vld [vmem:[#allocation13 + $0x30] ss:$12 sps:$4 sm:$0xff]   ;;  %v8922_v15 = vld [vmem:[#allocation13 + $0x60] ss:$12 sps:$4 sm:$0xff]  }
 0xcbc   :  { %8369 = vmatmul.mubr.bf16.vlgmr.msra.gmra.mrb[52].mxu0 %v7779_v14  ;;  %v7781_v26 = vpack.c.bf16 %v4855_v17, %v4854_v23  ;;  %5625 = vmatpush1.bf16.msra.mxu1 %v8910_v35  ;;  %v8921_v11 = vld [vmem:[#allocation13 + $0x4c] ss:$12 sps:$4 sm:$0xff]   ;;  %v8919_v14 = vld [vmem:[#allocation13 + $0x48] ss:$12 sps:$4 sm:$0xff]  }
 0xcbd   :  { %8372 = vmatprep.mubr.bf16.mxu0 %v7780_v13  ;;  %5626 = vmatprep.subr.bf16.mxu1 %v8915_v10  ;;  %v8924_v13 = vld [vmem:[#allocation13 + $0x64] ss:$12 sps:$4 sm:$0xff]   ;;  %v8930_v23 = vld [vmem:[#allocation13 + $0x94] ss:$12 sps:$4 sm:$0xff]  }
 0xcbe   :  { %v8925_v17 = vld [vmem:[#allocation13 + $0x78] ss:$12 sps:$4 sm:$0xff]  }
 0xcc0   :  { %5627 = vmatpush1.bf16.msra.mxu1 %v8913_v52 }
 0xcc1   :  { %5628 = vmatprep.subr.bf16.mxu1 %v8918_v9 }
 0xcc4   :  { %8373 = vmatmul.mubr.bf16.gmra.mrb[56].mxu0 %v7781_v26  ;;  %5629 = vmatpush1.bf16.msra.mxu1 %v8916_v8  ;;  %v8928_v26 = vld [vmem:[#allocation13 + $0x90] ss:$12 sps:$4 sm:$0xff]  }
 0xcc5   :  { %5630 = vmatprep.subr.bf16.mxu1 %v8921_v11 }
 0xcc8   :  { %5631 = vmatpush1.bf16.msra.mxu1 %v8919_v14 }
 0xcc9   :  { %5632 = vmatprep.subr.bf16.mxu1 %v8924_v13 }
 0xccb   :  { %v10149_v27 = vpop.f32.mrb[40].mxu1 }
 0xccc   :  { %v10151_v20 = vpop.f32.mrb[41].mxu1  ;;  %5633 = vmatpush1.bf16.msra.mxu1 %v8922_v15 }
 0xccd   :  { %v4731_v29 = vpop.f32.mrb[42].mxu1  ;;  %5634 = vmatprep.subr.bf16.mxu1 %v8927_v12 }
 0xcce   :  { %v4732_v46 = vpop.f32.mrb[43].mxu1  ;;  %v8933_v29 = vld [vmem:[#allocation13 + $0xac] ss:$12 sps:$4 sm:$0xff]  }
 0xccf   :  { %v8931_v46 = vld [vmem:[#allocation13 + $0xa8] ss:$12 sps:$4 sm:$0xff]  }
 0xcd0   :  { %5635 = vmatpush1.bf16.msra.mxu1 %v8925_v17 }
 0xcd1   :  { %5636 = vmatprep.subr.bf16.mxu1 %v8930_v23 }
 0xcd4   :  { %5637 = vmatpush1.bf16.msra.mxu1 %v8928_v26 }
 0xcd5   :  { %5638 = vmatprep.subr.bf16.mxu1 %v8933_v29 }
 0xcd8   :  { %5639 = vmatpush1.bf16.msra.mxu1 %v8931_v46 }
 0xd8f   :  { %v8370_v61 = vpop.f32.mrb[52].mxu0 }
 0xd90   :  { %v5002_v19 = vadd.f32 %v8370_v61, %v7590_v28  ;;  %v4993_v38 = vpop.f32.mrb[53].mxu0  ;;  %v8936_v61 = vld [vmem:[#allocation13 + $0xc4] ss:$12 sps:$4 sm:$0xff]  }
 0xd91   :  { %v4994_v37 = vadd.f32 %v7590_v28, %v4993_v38  ;;  %v8371_v33 = vpop.f32.mrb[54].mxu0  ;;  %5640 = vmatprep.subr.bf16.mxu1 %v8936_v61  ;;  %v8937_v38 = vld [vmem:[#allocation13 + $0xd8] ss:$12 sps:$4 sm:$0xff]  }
 0xd92   :  { %v5026_v34 = vmax.f32 %v5002_v19, 0.0  ;;  %v5005_v42 = vadd.f32 %v8371_v33, %v7590_v28  ;;  %v4996_v39 = vpop.f32.mrb[55].mxu0  ;;  %v8939_v19 = vld [vmem:[#allocation13 + $0xdc] ss:$12 sps:$4 sm:$0xff]  }
 0xd93   :  { %v4997_v25 = vadd.f32 %v7590_v28, %v4996_v39  ;;  %v5024_v40 = vmax.f32 %v4994_v37, 0.0  ;;  %v8942_v37 = vld [vmem:[#allocation13 + $0xf4] ss:$12 sps:$4 sm:$0xff]  }
 0xd94   :  { %v5027_v41 = vmax.f32 %v5005_v42, 0.0  ;;  %v5041_v60 = vmul.f32 %v7603_v18, %v5026_v34  ;;  %v8955_v33 = vld [vmem:[#allocation13 + $0xc8] ss:$12 sps:$4 sm:$0xff]   ;;  %v8960_v34 = vld [vmem:[#allocation13 + $0xe0] ss:$12 sps:$4 sm:$0xff]  }
 0xd95   :  { %v5025_v55 = vmax.f32 %v4997_v25, 0.0  ;;  %v5039_v24 = vmul.f32 %v7603_v18, %v5024_v40  ;;  %8126 = vmatprep.subr.bf16.mxu0 %v8955_v33  ;;  %v8940_v42 = vld [vmem:[#allocation13 + $0xf0] ss:$12 sps:$4 sm:$0xff]   ;;  %v8961_v39 = vld [vmem:[#allocation13 + $0x20] ss:$12 sps:$4 sm:$0xff]  }
 0xd96   :  { %5051 = vadd.xlane.f32.xlu1 %v5041_v60  ;;  %v5042_v44 = vmul.f32 %v7603_v18, %v5027_v41  ;;  %v8945_v25 = vld [vmem:[#allocation13 + $0x10c] ss:$12 sps:$4 sm:$0xff]   ;;  %v8943_v40 = vld [vmem:[#allocation13 + $0x108] ss:$12 sps:$4 sm:$0xff]   ;;  %v8948_v41 = vld [vmem:[#allocation13 + $0x124] ss:$12 sps:$4 sm:$0xff]  }
 0xd97   :  { %v8374_v3 = vpop.f32.mrb[56].mxu0  ;;  %v5040_v54 = vmul.f32 %v7603_v18, %v5025_v55  ;;  %v8946_v60 = vld [vmem:[#allocation13 + $0x120] ss:$12 sps:$4 sm:$0xff]   ;;  %v8951_v55 = vld [vmem:[#allocation13 + $0x13c] ss:$12 sps:$4 sm:$0xff]  }
 0xd98   :  { %5053 = vadd.xlane.f32.xlu0 %v5042_v44  ;;  %v5009_v36 = vpop.f32.mrb[57].mxu0  ;;  %v5018_v59 = vadd.f32 %v8374_v3, %v7590_v28  ;;  %v8949_v44 = vld [vmem:[#allocation13 + $0x138] ss:$12 sps:$4 sm:$0xff]   ;;  %v8954_v3 = vld [vmem:[#allocation13 + $0x154] ss:$12 sps:$4 sm:$0xff]  }
 0xd99   :  { %v5010_v21 = vadd.f32 %v7590_v28, %v5009_v36  ;;  %v8375_v53 = vpop.f32.mrb[58].mxu0  ;;  %v8952_v36 = vld [vmem:[#allocation13 + $0x150] ss:$12 sps:$4 sm:$0xff]  }
 0xd9a   :  { %v5012_v2 = vpop.f32.mrb[59].mxu0  ;;  %5047 = vadd.xlane.f32.xlu1 %v5039_v24  ;;  %v5021_v56 = vadd.f32 %v8375_v53, %v7590_v28  ;;  %v5030_v57 = vmax.f32 %v5018_v59, 0.0  ;;  %v8959_v24 = vld [vmem:[#allocation13 + $0x16c] ss:$12 sps:$4 sm:$0xff]   ;;  %v8957_v59 = vld [vmem:[#allocation13 + $0x168] ss:$12 sps:$4 sm:$0xff]  }
 0xd9b   :  { %v5028_v22 = vmax.f32 %v5010_v21, 0.0  ;;  %v5013_v5 = vadd.f32 %v7590_v28, %v5012_v2  ;;  %v8934_v28 = vld [vmem:[#allocation13 + $0xc0] ss:$12 sps:$4 sm:$0xff]   ;;  %v8962_v21 = vld [vmem:[#allocation13 + $0xf8] ss:$12 sps:$4 sm:$0xff]  }
 0xd9c   :  { %5049 = vadd.xlane.f32.xlu0 %v5040_v54  ;;  %v5031_v51 = vmax.f32 %v5021_v56, 0.0  ;;  %v5045_v1 = vmul.f32 %v7603_v18, %v5030_v57  ;;  %5641 = vmatpush1.bf16.msra.mxu1 %v8934_v28  ;;  %v8963_v53 = vld [vmem:[#allocation13 + $0x38] ss:$12 sps:$4 sm:$0xff]   ;;  %v8964_v2 = vld [vmem:[#allocation13 + $0x110] ss:$12 sps:$4 sm:$0xff]  }
 0xd9d   :  { %v5029_v58 = vmax.f32 %v5013_v5, 0.0  ;;  %v5043_v62 = vmul.f32 %v7603_v18, %v5028_v22  ;;  %5642 = vmatprep.subr.bf16.mxu1 %v8939_v19  ;;  %v8965_v54 = vld [vmem:[#allocation13 + $0x50] ss:$12 sps:$4 sm:$0xff]   ;;  %v8966_v22 = vld [vmem:[#allocation13 + $0x128] ss:$12 sps:$4 sm:$0xff]  }
 0xd9e   :  { %v5046_v63 = vmul.f32 %v7603_v18, %v5031_v51  ;;  %v8967_v56 = vld [vmem:[#allocation13 + $0x68] ss:$12 sps:$4 sm:$0xff]   ;;  %v8968_v5 = vld [vmem:[#allocation13 + $0x140] ss:$12 sps:$4 sm:$0xff]   ;;  %v8972_v51 = vld [vmem:[#allocation13 + $0x170] ss:$12 sps:$4 sm:$0xff]  }
 0xd9f   :  { %5055 = vadd.xlane.f32.xlu1 %v5043_v62  ;;  %v5044_v30 = vmul.f32 %v7603_v18, %v5029_v58  ;;  %v8956_v18 = vld [vmem:[#allocation13 + $0x8] ss:$12 sps:$4 sm:$0xff]   ;;  %v8969_v57 = vld [vmem:[#allocation13 + $0x80] ss:$12 sps:$4 sm:$0xff]   ;;  %v8970_v58 = vld [vmem:[#allocation13 + $0x158] ss:$12 sps:$4 sm:$0xff]  }
 0xda0   :  { %5643 = vmatpush1.bf16.msra.mxu1 %v8937_v38  ;;  %8127 = vmatpush3.bf16.msra.mxu0 %v8956_v18  ;;  %v8971_v62 = vld [vmem:[#allocation13 + $0x98] ss:$12 sps:$4 sm:$0xff]  }
 0xda1   :  { %5057 = vadd.xlane.f32.xlu0 %v5044_v30  ;;  %5644 = vmatprep.subr.bf16.mxu1 %v8942_v37  ;;  %v8973_v30 = vld [vmem:[#allocation13 + $0xb0] ss:$12 sps:$4 sm:$0xff]  }
 0xda2   :  { %8128 = vmatprep.subr.bf16.mxu0 %v8960_v34 }
 0xda3   :  { %5059 = vadd.xlane.f32.xlu1 %v5045_v1 }
 0xda4   :  { %5645 = vmatpush1.bf16.msra.mxu1 %v8940_v42  ;;  %8129 = vmatpush3.bf16.msra.mxu0 %v8961_v39 }
 0xda5   :  { %5061 = vadd.xlane.f32.xlu0 %v5046_v63  ;;  %5646 = vmatprep.subr.bf16.mxu1 %v8945_v25 }
 0xda6   :  { %8130 = vmatprep.subr.bf16.mxu0 %v8962_v21 }
 0xda8   :  { %5647 = vmatpush1.bf16.msra.mxu1 %v8943_v40  ;;  %8131 = vmatpush3.bf16.msra.mxu0 %v8963_v53 }
 0xda9   :  { %5648 = vmatprep.subr.bf16.mxu1 %v8948_v41  ;;  %8132 = vmatprep.subr.bf16.mxu0 %v8964_v2 }
 0xdac   :  { %5649 = vmatpush1.bf16.msra.mxu1 %v8946_v60  ;;  %8133 = vmatpush3.bf16.msra.mxu0 %v8965_v54 }
 0xdad   :  { %5650 = vmatprep.subr.bf16.mxu1 %v8951_v55  ;;  %8134 = vmatprep.subr.bf16.mxu0 %v8966_v22 }
 0xdb0   :  { %5651 = vmatpush1.bf16.msra.mxu1 %v8949_v44  ;;  %8135 = vmatpush3.bf16.msra.mxu0 %v8967_v56 }
 0xdb1   :  { %5652 = vmatprep.subr.bf16.mxu1 %v8954_v3  ;;  %8136 = vmatprep.subr.bf16.mxu0 %v8968_v5 }
 0xdb4   :  { %5653 = vmatpush1.bf16.msra.mxu1 %v8952_v36  ;;  %8137 = vmatpush3.bf16.msra.mxu0 %v8969_v57 }
 0xdb5   :  { %5654 = vmatprep.subr.bf16.mxu1 %v8959_v24  ;;  %8138 = vmatprep.subr.bf16.mxu0 %v8970_v58 }
 0xdb8   :  { %5655 = vmatpush1.bf16.msra.mxu1 %v8957_v59  ;;  %8139 = vmatpush3.bf16.msra.mxu0 %v8971_v62 }
 0xdb9   :  { %8140 = vmatprep.subr.bf16.mxu0 %v8972_v51 }
 0xdbc   :  { %8141 = vmatpush3.bf16.msra.mxu0 %v8973_v30 }
 0xdbd   :  { %8376 = vmatprep.subr.bf16.mxu0 %v9551_v31 }
 0xe23   :  { %v5052_v1 = vpop.xlane.xlu1 %5051 }
 0xe24   :  { %v5075_v63 = vrot.slane %v5052_v1, 4 }
 0xe25   :  { %v5054_v4 = vpop.xlane.xlu0 %5053 }
 0xe26   :  { %v5076_v35 = vmax.f32 %v5052_v1, %v5075_v63  ;;  %v5081_v10 = vrot.slane %v5054_v4, 4 }
 0xe27   :  { %v5048_v52 = vpop.xlane.xlu1 %5047 }
 0xe28   :  { %v5077_v9 = vrot.slane %v5076_v35, 2  ;;  %v5082_v8 = vmax.f32 %v5054_v4, %v5081_v10  ;;  %v5063_v11 = vrot.slane %v5048_v52, 4 }
 0xe29   :  { %v5050_v14 = vpop.xlane.xlu0 %5049 }
 0xe2a   :  { %v5078_v13 = vmax.f32 %v5076_v35, %v5077_v9  ;;  %v5083_v15 = vrot.slane %v5082_v8, 2  ;;  %v5064_v12 = vmax.f32 %v5048_v52, %v5063_v11  ;;  %v5069_v17 = vrot.slane %v5050_v14, 4 }
 0xe2c   :  { %v5079_v23 = vrot.slane %v5078_v13, 1  ;;  %v5084_v26 = vmax.f32 %v5082_v8, %v5083_v15  ;;  %v5065_v29 = vrot.slane %v5064_v12, 2  ;;  %v5070_v46 = vmax.f32 %v5050_v14, %v5069_v17  ;;  %v5056_v28 = vpop.xlane.xlu1 %5055 }
 0xe2d   :  { %v5087_v61 = vrot.slane %v5056_v28, 4 }
 0xe2e   :  { %v5080_v19 = vmax.f32 %v5078_v13, %v5079_v23  ;;  %v5085_v38 = vrot.slane %v5084_v26, 1  ;;  %v5066_v37 = vmax.f32 %v5064_v12, %v5065_v29  ;;  %v5071_v33 = vrot.slane %v5070_v46, 2  ;;  %v5058_v18 = vpop.xlane.xlu0 %5057 }
 0xe2f   :  { %v5088_v34 = vmax.f32 %v5056_v28, %v5087_v61  ;;  %v5093_v42 = vrot.slane %v5058_v18, 4 }
 0xe30   :  { %v5113_v39 = vsub.f32 %v5052_v1, %v5080_v19  ;;  %v5086_v25 = vmax.f32 %v5084_v26, %v5085_v38  ;;  %v5067_v40 = vrot.slane %v5066_v37, 1  ;;  %v5072_v41 = vmax.f32 %v5070_v46, %v5071_v33  ;;  %v5060_v60 = vpop.xlane.xlu1 %5059 }
 0xe31   :  { %v5089_v55 = vrot.slane %v5088_v34, 2  ;;  %v5094_v44 = vmax.f32 %v5058_v18, %v5093_v42  ;;  %v5099_v3 = vrot.slane %v5060_v60, 4 }
 0xe32   :  { %v5123_v36 = vmul.f32 1.442695, %v5113_v39  ;;  %v5114_v24 = vsub.f32 %v5054_v4, %v5086_v25  ;;  %v5068_v59 = vmax.f32 %v5066_v37, %v5067_v40  ;;  %v5073_v21 = vrot.slane %v5072_v41, 1  ;;  %v5062_v53 = vpop.xlane.xlu0 %5061 }
 0xe33   :  { %v5090_v2 = vmax.f32 %v5088_v34, %v5089_v55  ;;  %v5095_v54 = vrot.slane %v5094_v44, 2  ;;  %v5100_v22 = vmax.f32 %v5060_v60, %v5099_v3  ;;  %v5105_v56 = vrot.slane %v5062_v53, 4 }
 0xe34   :  { %9236 = vpow2.f32 %v5123_v36  ;;  %v5125_v5 = vmul.f32 1.442695, %v5114_v24  ;;  %v5111_v57 = vsub.f32 %v5048_v52, %v5068_v59  ;;  %v5074_v58 = vmax.f32 %v5072_v41, %v5073_v21 }
 0xe35   :  { %v5091_v62 = vrot.slane %v5090_v2, 1  ;;  %v5096_v51 = vmax.f32 %v5094_v44, %v5095_v54  ;;  %v5101_v30 = vrot.slane %v5100_v22, 2  ;;  %v5106_v1 = vmax.f32 %v5062_v53, %v5105_v56 }
 0xe36   :  { %9238 = vpow2.f32 %v5125_v5  ;;  %v5119_v63 = vmul.f32 1.442695, %v5111_v57  ;;  %v5112_v35 = vsub.f32 %v5050_v14, %v5074_v58 }
 0xe37   :  { %v5092_v10 = vmax.f32 %v5090_v2, %v5091_v62  ;;  %v5097_v4 = vrot.slane %v5096_v51, 1  ;;  %v5102_v9 = vmax.f32 %v5100_v22, %v5101_v30  ;;  %v5107_v8 = vrot.slane %v5106_v1, 2 }
 0xe38   :  { %9240 = vpow2.f32 %v5119_v63  ;;  %v5121_v11 = vmul.f32 1.442695, %v5112_v35 }
 0xe39   :  { %v5115_v13 = vsub.f32 %v5056_v28, %v5092_v10  ;;  %v5098_v15 = vmax.f32 %v5096_v51, %v5097_v4  ;;  %v5103_v12 = vrot.slane %v5102_v9, 1  ;;  %v5108_v17 = vmax.f32 %v5106_v1, %v5107_v8 }
 0xe3a   :  { %9242 = vpow2.f32 %v5121_v11 }
 0xe3b   :  { %v5127_v52 = vmul.f32 1.442695, %v5115_v13  ;;  %v5116_v23 = vsub.f32 %v5058_v18, %v5098_v15  ;;  %v5104_v26 = vmax.f32 %v5102_v9, %v5103_v12  ;;  %v5109_v29 = vrot.slane %v5108_v17, 1 }
 0xe3d   :  { %9244 = vpow2.f32 %v5127_v52  ;;  %v5129_v46 = vmul.f32 1.442695, %v5116_v23  ;;  %v5117_v61 = vsub.f32 %v5060_v60, %v5104_v26  ;;  %v5110_v19 = vmax.f32 %v5108_v17, %v5109_v29 }
 0xe3e   :  { %v10160_v14 = vpop.eup %9236 }
 0xe3f   :  { %v5147_v38 = vrot.slane %v10160_v14, 4  ;;  %9246 = vpow2.f32 %v5129_v46  ;;  %v5131_v37 = vmul.f32 1.442695, %v5117_v61  ;;  %v5118_v33 = vsub.f32 %v5062_v53, %v5110_v19  ;;  %v7967_v19 = vld [vmem:[#allocation7 + $0x8] sm:$0xff]  }
 0xe40   :  { %v10163_v28 = vpop.eup %9238 }
 0xe41   :  { %v5148_v34 = vadd.f32 %v10160_v14, %v5147_v38  ;;  %v5153_v42 = vrot.slane %v10163_v28, 4  ;;  %9248 = vpow2.f32 %v5131_v37  ;;  %v5133_v18 = vmul.f32 1.442695, %v5118_v33 }
 0xe42   :  { %v10167_v39 = vpop.eup %9240 }
 0xe43   :  { %v5149_v25 = vrot.slane %v5148_v34, 2  ;;  %v5154_v40 = vadd.f32 %v10163_v28, %v5153_v42  ;;  %v5135_v41 = vrot.slane %v10167_v39, 4  ;;  %9250 = vpow2.f32 %v5133_v18 }
 0xe44   :  { %v10171_v60 = vpop.eup %9242  ;;  %v7904_v42 = vunpack.c.l.bf16 %v7967_v19 }
 0xe45   :  { %v5150_v55 = vadd.f32 %v5149_v25, %v5148_v34  ;;  %v5155_v44 = vrot.slane %v5154_v40, 2  ;;  %v5136_v3 = vadd.f32 %v10167_v39, %v5135_v41  ;;  %v5141_v36 = vrot.slane %v10171_v60, 4  ;;  %v7899_v41 = vld [vmem:[#allocation7] sm:$0xff]  }
 0xe47   :  { %v10175_v24 = vpop.eup %9244  ;;  %v5151_v59 = vrot.slane %v5150_v55, 1  ;;  %v5156_v21 = vadd.f32 %v5155_v44, %v5154_v40  ;;  %v5137_v53 = vrot.slane %v5136_v3, 2  ;;  %v5142_v2 = vadd.f32 %v10171_v60, %v5141_v36 }
 0xe48   :  { %v5159_v54 = vrot.slane %v10175_v24, 4  ;;  %v7905_v44 = vunpack.c.h.bf16 %v7967_v19 }
 0xe49   :  { %v10179_v22 = vpop.eup %9246  ;;  %v5152_v56 = vadd.f32 %v5151_v59, %v5150_v55  ;;  %v5157_v5 = vrot.slane %v5156_v21, 1  ;;  %v5138_v57 = vadd.f32 %v5137_v53, %v5136_v3  ;;  %v5143_v58 = vrot.slane %v5142_v2, 2 }
 0xe4a   :  { %v5160_v62 = vadd.f32 %v10175_v24, %v5159_v54  ;;  %v5165_v51 = vrot.slane %v10179_v22, 4  ;;  %v7900_v53 = vunpack.c.l.bf16 %v7899_v41 }
 0xe4b   :  { %v10183_v30 = vpop.eup %9248  ;;  %9252 = vrcp.f32 %v5152_v56  ;;  %v5158_v1 = vadd.f32 %v5157_v5, %v5156_v21  ;;  %v5139_v63 = vrot.slane %v5138_v57, 1  ;;  %v5144_v35 = vadd.f32 %v5143_v58, %v5142_v2 }
 0xe4c   :  { %v5161_v10 = vrot.slane %v5160_v62, 2  ;;  %v5166_v4 = vadd.f32 %v10179_v22, %v5165_v51  ;;  %v5171_v9 = vrot.slane %v10183_v30, 4 }
 0xe4d   :  { %v10187_v8 = vpop.eup %9250  ;;  %9254 = vrcp.f32 %v5158_v1  ;;  %v5140_v11 = vadd.f32 %v5139_v63, %v5138_v57  ;;  %v5145_v13 = vrot.slane %v5144_v35, 1  ;;  %v7901_v57 = vunpack.c.h.bf16 %v7899_v41 }
 0xe4e   :  { %v5162_v15 = vadd.f32 %v5161_v10, %v5160_v62  ;;  %v5167_v12 = vrot.slane %v5166_v4, 2  ;;  %v5172_v17 = vadd.f32 %v10183_v30, %v5171_v9  ;;  %v5177_v52 = vrot.slane %v10187_v8, 4  ;;  %v7968_v62 = vld [vmem:[#allocation7 + $0x10] sm:$0xff]  }
 0xe4f   :  { %9256 = vrcp.f32 %v5140_v11  ;;  %v5146_v23 = vadd.f32 %v5145_v13, %v5144_v35  ;;  %v7908_v9 = vunpack.c.l.bf16 %v7968_v62  ;;  %v7969_v13 = vld [vmem:[#allocation7 + $0x18] sm:$0xff]  }
 0xe50   :  { %v5163_v26 = vrot.slane %v5162_v15, 1  ;;  %v5168_v29 = vadd.f32 %v5167_v12, %v5166_v4  ;;  %v5173_v46 = vrot.slane %v5172_v17, 2  ;;  %v5178_v61 = vadd.f32 %v10187_v8, %v5177_v52 }
 0xe51   :  { %9258 = vrcp.f32 %v5146_v23  ;;  %v7912_v19 = vunpack.c.l.bf16 %v7969_v13 }
 0xe52   :  { %v5164_v38 = vadd.f32 %v5163_v26, %v5162_v15  ;;  %v5169_v37 = vrot.slane %v5168_v29, 1  ;;  %v5174_v33 = vadd.f32 %v5173_v46, %v5172_v17  ;;  %v5179_v34 = vrot.slane %v5178_v61, 2 }
 0xe54   :  { %9260 = vrcp.f32 %v5164_v38  ;;  %v5170_v18 = vadd.f32 %v5169_v37, %v5168_v29  ;;  %v5175_v25 = vrot.slane %v5174_v33, 1  ;;  %v5180_v40 = vadd.f32 %v5179_v34, %v5178_v61 }
 0xe55   :  { %v9253_v55 = vpop.eup %9252 }
 0xe56   :  { %v5176_v3 = vadd.f32 %v5175_v25, %v5174_v33  ;;  %v5181_v36 = vrot.slane %v5180_v40, 1  ;;  %v5188_v59 = vmul.f32 %v9253_v55, %v10160_v14  ;;  %9262 = vrcp.f32 %v5170_v18 }
 0xe57   :  { %v9255_v21 = vpop.eup %9254  ;;  %v7913_v25 = vunpack.c.h.bf16 %v7969_v13 }
 0xe58   :  { %v5182_v2 = vadd.f32 %v5181_v36, %v5180_v40  ;;  %v5190_v54 = vmul.f32 %v9255_v21, %v10163_v28  ;;  %9264 = vrcp.f32 %v5176_v3  ;;  %v5217_v56 = vmul.f32 %v7904_v42, %v5188_v59 }
 0xe59   :  { %v9257_v5 = vpop.eup %9256 }
 0xe5a   :  { %v5184_v58 = vmul.f32 %v9257_v5, %v10167_v39  ;;  %9266 = vrcp.f32 %v5182_v2  ;;  %v5218_v51 = vmul.f32 %v7905_v44, %v5190_v54  ;;  %v5235_v1 = vrot.slane %v5217_v56, 4 }
 0xe5b   :  { %v9259_v63 = vpop.eup %9258  ;;  %v7909_v39 = vunpack.c.h.bf16 %v7968_v62 }
 0xe5c   :  { %v5186_v35 = vmul.f32 %v9259_v63, %v10171_v60  ;;  %v5215_v14 = vmul.f32 %v7900_v53, %v5184_v58  ;;  %v5236_v10 = vadd.f32 %v5235_v1, %v5217_v56  ;;  %v5241_v4 = vrot.slane %v5218_v51, 4 }
 0xe5e   :  { %v9261_v11 = vpop.eup %9260  ;;  %v5216_v28 = vmul.f32 %v7901_v57, %v5186_v35  ;;  %v5223_v15 = vrot.slane %v5215_v14, 4  ;;  %v5237_v12 = vrot.slane %v5236_v10, 2  ;;  %v5242_v17 = vadd.f32 %v5241_v4, %v5218_v51 }
 0xe5f   :  { %v5192_v52 = vmul.f32 %v9261_v11, %v10175_v24 }
 0xe60   :  { %v9263_v23 = vpop.eup %9262  ;;  %v5224_v26 = vadd.f32 %v5223_v15, %v5215_v14  ;;  %v5229_v29 = vrot.slane %v5216_v28, 4  ;;  %v5238_v46 = vadd.f32 %v5237_v12, %v5236_v10  ;;  %v5243_v61 = vrot.slane %v5242_v17, 2 }
 0xe61   :  { %v5194_v60 = vmul.f32 %v9263_v23, %v10179_v22  ;;  %v5219_v38 = vmul.f32 %v7908_v9, %v5192_v52 }
 0xe62   :  { %v9265_v37 = vpop.eup %9264  ;;  %v5225_v33 = vrot.slane %v5224_v26, 2  ;;  %v5230_v34 = vadd.f32 %v5229_v29, %v5216_v28  ;;  %v5244_v42 = vadd.f32 %v5243_v61, %v5242_v17  ;;  %v5239_v3 = vrot.slane %v5238_v46, 1 }
 0xe63   :  { %v5196_v18 = vmul.f32 %v9265_v37, %v10183_v30  ;;  %v5220_v40 = vmul.f32 %v7909_v39, %v5194_v60  ;;  %v5247_v41 = vrot.slane %v5219_v38, 4 }
 0xe64   :  { %v9267_v24 = vpop.eup %9266  ;;  %v5226_v55 = vadd.f32 %v5225_v33, %v5224_v26  ;;  %v5231_v44 = vrot.slane %v5230_v34, 2  ;;  %v5245_v36 = vrot.slane %v5244_v42, 1  ;;  %v5240_v51 = vadd.f32 %v5239_v3, %v5238_v46 }
 0xe65   :  { %v5198_v59 = vmul.f32 %v9267_v24, %v10187_v8  ;;  %v5221_v21 = vmul.f32 %v7912_v19, %v5196_v18  ;;  %v5248_v22 = vadd.f32 %v5247_v41, %v5219_v38  ;;  %v5253_v53 = vrot.slane %v5220_v40, 4 }
 0xe66   :  { %v5227_v2 = vrot.slane %v5226_v55, 1  ;;  %v5232_v54 = vadd.f32 %v5231_v44, %v5230_v34  ;;  %v5246_v1 = vadd.f32 %v5245_v36, %v5244_v42  ;;  %v5273_v12 = vpack.c.bf16 %v5240_v51, %v5240_v51  ;;  %v8981_v51 = vld [vmem:[#allocation10 + $0x24] ss:$16 sps:$4 sm:$0xff]  }
 0xe67   :  { %v5222_v56 = vmul.f32 %v7913_v25, %v5198_v59  ;;  %v5249_v5 = vrot.slane %v5248_v22, 2  ;;  %v5254_v57 = vadd.f32 %v5253_v53, %v5220_v40  ;;  %v5259_v58 = vrot.slane %v5221_v21, 4 }
 0xe68   :  { %v5228_v30 = vadd.f32 %v5227_v2, %v5226_v55  ;;  %v5233_v62 = vrot.slane %v5232_v54, 1  ;;  %v5274_v17 = vpack.c.bf16 %v5246_v1, %v5246_v1  ;;  %v5289_v37 = vunpack.c.l.b16 %v5273_v12  ;;  %v8979_v1 = vld [vmem:[#allocation10 + $0x20] ss:$16 sps:$4 sm:$0xff]  }
 0xe69   :  { %v5250_v63 = vadd.f32 %v5249_v5, %v5248_v22  ;;  %v5255_v35 = vrot.slane %v5254_v57, 2  ;;  %v5260_v14 = vadd.f32 %v5259_v58, %v5221_v21  ;;  %v5265_v10 = vrot.slane %v5222_v56, 4  ;;  %v4459_v5 = vld [vmem:[#allocation2 + $0xc] sm:$0xf]  ;;  %v8977_v58 = vld [vmem:[#allocation10 + $0x4] ss:$16 sps:$4 sm:$0xff]  }
 0xe6a   :  { %v5234_v4 = vadd.f32 %v5233_v62, %v5232_v54  ;;  %v5271_v9 = vpack.c.bf16 %v5228_v30, %v5228_v30  ;;  %v5290_v33 = vunpack.c.l.b16 %v5274_v17  ;;  %v8975_v30 = vld [vmem:[#allocation10] ss:$16 sps:$4 sm:$0xff]   ;;  %6030 = vmatprep.subr.bf16.mxu1 %v8977_v58  ;;  %v8978_v62 = vld [vmem:[#allocation14 + $0x8] sm:$0xff]   ;;  %v9001_v17 = vld [vmem:[#allocation10 + $0xc4] ss:$16 sps:$4 sm:$0xff]  }
 0xe6b   :  { %v5251_v8 = vrot.slane %v5250_v63, 1  ;;  %v5256_v11 = vadd.f32 %v5255_v35, %v5254_v57  ;;  %v5261_v13 = vrot.slane %v5260_v14, 2  ;;  %v5266_v28 = vadd.f32 %v5265_v10, %v5222_v56  ;;  %v8974_v57 = vld [vmem:[#allocation14] sm:$0xff]   ;;  %v8986_v10 = vld [vmem:[#allocation14 + $0x18] sm:$0xff]  }
 0xe6c   :  { %v5272_v15 = vpack.c.bf16 %v5234_v4, %v5234_v4  ;;  %v5287_v29 = vunpack.c.l.b16 %v5271_v9  ;;  %v8985_v35 = vld [vmem:[#allocation10 + $0x44] ss:$16 sps:$4 sm:$0xff]   ;;  %v8987_v9 = vld [vmem:[#allocation10 + $0x60] ss:$16 sps:$4 sm:$0xff]  }
 0xe6d   :  { %v5252_v52 = vadd.f32 %v5251_v8, %v5250_v63  ;;  %v5257_v39 = vrot.slane %v5256_v11, 1  ;;  %v5262_v23 = vadd.f32 %v5261_v13, %v5260_v14  ;;  %v5267_v26 = vrot.slane %v5266_v28, 2  ;;  %v8982_v63 = vld [vmem:[#allocation14 + $0x10] sm:$0xff]   ;;  %v8990_v8 = vld [vmem:[#allocation14 + $0x20] sm:$0xff]  }
 0xe6e   :  { %v5288_v46 = vunpack.c.l.b16 %v5272_v15  ;;  %v8983_v14 = vld [vmem:[#allocation10 + $0x40] ss:$16 sps:$4 sm:$0xff]   ;;  %v8989_v4 = vld [vmem:[#allocation10 + $0x64] ss:$16 sps:$4 sm:$0xff]   ;;  %v8994_v15 = vld [vmem:[#allocation14 + $0x28] sm:$0xff]  }
 0xe6f   :  { %v5258_v61 = vadd.f32 %v5257_v39, %v5256_v11  ;;  %v5263_v60 = vrot.slane %v5262_v23, 1  ;;  %v5268_v19 = vadd.f32 %v5267_v26, %v5266_v28  ;;  %v5275_v38 = vpack.c.bf16 %v5252_v52, %v5252_v52  ;;  %v8991_v11 = vld [vmem:[#allocation10 + $0x80] ss:$16 sps:$4 sm:$0xff]   ;;  %v8993_v13 = vld [vmem:[#allocation10 + $0x84] ss:$16 sps:$4 sm:$0xff]   ;;  %v9002_v26 = vld [vmem:[#allocation14 + $0x38] sm:$0xff]  }
 0xe70   :  { %v5295_v34 = vsel %vm1045_vm0, %v5288_v46, %v5287_v29  ;;  %v8997_v28 = vld [vmem:[#allocation10 + $0xa4] ss:$16 sps:$4 sm:$0xff]   ;;  %v8995_v12 = vld [vmem:[#allocation10 + $0xa0] ss:$16 sps:$4 sm:$0xff]   ;;  %v9008_v46 = vld [vmem:[#allocation10 + $0xc] ss:$16 sps:$4 sm:$0xff]  }
 0xe71   :  { %v5264_v42 = vadd.f32 %v5263_v60, %v5262_v23  ;;  %v5269_v18 = vrot.slane %v5268_v19, 1  ;;  %v5276_v25 = vpack.c.bf16 %v5258_v61, %v5258_v61  ;;  %v5291_v40 = vunpack.c.l.b16 %v5275_v38  ;;  %v8998_v52 = vld [vmem:[#allocation14 + $0x30] sm:$0xff]   ;;  %v9030_v61 = vld [vmem:[#allocation11] sm:$0xff]  }
 0xe72   :  { %v5296_v41 = vsel %vm1047_vm1, %v5289_v37, %v5295_v34  ;;  %v8999_v39 = vld [vmem:[#allocation10 + $0xc0] ss:$16 sps:$4 sm:$0xff]   ;;  %v9005_v23 = vld [vmem:[#allocation10 + $0xe4] ss:$16 sps:$4 sm:$0xff]   ;;  %v5705_v38 = vadd.f32 %v10134_v16, %v9878_v47 }
 0xe73   :  { %v5270_v24 = vadd.f32 %v5269_v18, %v5268_v19  ;;  %v5277_v55 = vpack.c.bf16 %v5264_v42, %v5264_v42  ;;  %v5292_v44 = vunpack.c.l.b16 %v5276_v25  ;;  %v5297_v3 = vsel %vm1049_vm2, %v5290_v33, %v5296_v41  ;;  %v9003_v29 = vld [vmem:[#allocation10 + $0xe0] ss:$16 sps:$4 sm:$0xff]  }
 0xe74   :  { %v5298_v36 = vsel %vm1051_vm3, %v5291_v40, %v5297_v3  ;;  %v5706_v42 = vadd.f32 %v10149_v27, %v9883_v49  ;;  %v5707_v27 = vadd.f32 %v10151_v20, %v9893_v6  ;;  %v9011_v20 = vld [vmem:[#allocation10 + $0x2c] ss:$16 sps:$4 sm:$0xff]  }
 0xe75   :  { %v5278_v59 = vpack.c.bf16 %v5270_v24, %v5270_v24  ;;  %v5293_v21 = vunpack.c.l.b16 %v5277_v55  ;;  %v5299_v22 = vsel %vm1053_vm4, %v5292_v44, %v5298_v36 }
 0xe77   :  { %v5294_v53 = vunpack.c.l.b16 %v5278_v59  ;;  %v5300_v2 = vsel %vm1055_vm5, %v5293_v21, %v5299_v22 }
 0xe79   :  { %v5301_v54 = vsel %vm1057_vm6, %v5294_v53, %v5300_v2 }
 0xe7a   :  { %v5302_v56 = vpack.c.b16 %v5301_v54, %v5301_v54 }
 0xe7c   :  { %5656 = vmatprep.mubr.bf16.mxu1 %v5302_v56  ;;  %5697 = vmatprep.mubr.bf16.mxu0 %v5302_v56 }
 0xe7d   :  { %5657 = vmatmul.mubr.bf16.vlgmr.msra.gmra.mrb[44].mxu1 %v4459_v5  ;;  %5698 = vmatmul.mubr.bf16.vlgmr.msra.gmra.mrb[60].mxu0 %v4459_v5 }
 0xe7e   :  { %8392 = vmatprep.mubr.msk.bf16.mxu0 %vm9552_vm7, %v9551_v31  ;;  %6062 = vmatprep.mubr.bf16.mxu1 %v9549_v0 }
 0xe7f   :  { %8377 = vmatpush3.bf16.msra.mxu0 %v8974_v57  ;;  %6031 = vmatpush1.bf16.msra.mxu1 %v8975_v30 }
 0xe80   :  { %8378 = vmatprep.subr.bf16.mxu0 %v9551_v31  ;;  %6032 = vmatprep.subr.bf16.mxu1 %v8981_v51 }
 0xe83   :  { %8379 = vmatpush3.bf16.msra.mxu0 %v8978_v62  ;;  %6033 = vmatpush1.bf16.msra.mxu1 %v8979_v1 }
 0xe84   :  { %8380 = vmatprep.subr.bf16.mxu0 %v9551_v31  ;;  %6034 = vmatprep.subr.bf16.mxu1 %v8985_v35 }
 0xe87   :  { %8381 = vmatpush3.bf16.msra.mxu0 %v8982_v63  ;;  %6035 = vmatpush1.bf16.msra.mxu1 %v8983_v14  ;;  %v9006_v63 = vld [vmem:[#allocation10 + $0x8] ss:$16 sps:$4 sm:$0xff]  }
 0xe88   :  { %8382 = vmatprep.subr.bf16.mxu0 %v9551_v31  ;;  %6036 = vmatprep.subr.bf16.mxu1 %v8989_v4  ;;  %v9031_v14 = vld [vmem:[#allocation11 + $0x8] sm:$0xff]  }
 0xe89   :  { %v9014_v4 = vld [vmem:[#allocation10 + $0x4c] ss:$16 sps:$4 sm:$0xff]  }
 0xe8b   :  { %8383 = vmatpush3.bf16.msra.mxu0 %v8986_v10  ;;  %6037 = vmatpush1.bf16.msra.mxu1 %v8987_v9  ;;  %v9009_v10 = vld [vmem:[#allocation10 + $0x28] ss:$16 sps:$4 sm:$0xff]   ;;  %v9032_v9 = vld [vmem:[#allocation11 + $0x10] sm:$0xff]  }
 0xe8c   :  { %8384 = vmatprep.subr.bf16.mxu0 %v9551_v31  ;;  %6038 = vmatprep.subr.bf16.mxu1 %v8993_v13  ;;  %v9015_v13 = vld [vmem:[#allocation10 + $0x68] ss:$16 sps:$4 sm:$0xff]  }
 0xe8f   :  { %8385 = vmatpush3.bf16.msra.mxu0 %v8990_v8  ;;  %6039 = vmatpush1.bf16.msra.mxu1 %v8991_v11  ;;  %v9017_v8 = vld [vmem:[#allocation10 + $0x6c] ss:$16 sps:$4 sm:$0xff]  }
 0xe90   :  { %8386 = vmatprep.subr.bf16.mxu0 %v9551_v31  ;;  %6040 = vmatprep.subr.bf16.mxu1 %v8997_v28  ;;  %v9033_v11 = vld [vmem:[#allocation11 + $0x18] sm:$0xff]  }
 0xe91   :  { %v9020_v28 = vld [vmem:[#allocation10 + $0x8c] ss:$16 sps:$4 sm:$0xff]  }
 0xe93   :  { %8387 = vmatpush3.bf16.msra.mxu0 %v8994_v15  ;;  %6041 = vmatpush1.bf16.msra.mxu1 %v8995_v12  ;;  %v9023_v15 = vld [vmem:[#allocation10 + $0xac] ss:$16 sps:$4 sm:$0xff]   ;;  %v9021_v12 = vld [vmem:[#allocation10 + $0xa8] ss:$16 sps:$4 sm:$0xff]  }
 0xe94   :  { %8388 = vmatprep.subr.bf16.mxu0 %v9551_v31  ;;  %6042 = vmatprep.subr.bf16.mxu1 %v9001_v17  ;;  %v9026_v17 = vld [vmem:[#allocation10 + $0xcc] ss:$16 sps:$4 sm:$0xff]  }
 0xe97   :  { %8389 = vmatpush3.bf16.msra.mxu0 %v8998_v52  ;;  %6043 = vmatpush1.bf16.msra.mxu1 %v8999_v39  ;;  %v9024_v52 = vld [vmem:[#allocation10 + $0xc8] ss:$16 sps:$4 sm:$0xff]   ;;  %v9029_v39 = vld [vmem:[#allocation10 + $0xec] ss:$16 sps:$4 sm:$0xff]  }
 0xe98   :  { %8390 = vmatprep.subr.bf16.mxu0 %v9551_v31  ;;  %6044 = vmatprep.subr.bf16.mxu1 %v9005_v23  ;;  %v9027_v23 = vld [vmem:[#allocation10 + $0xe8] ss:$16 sps:$4 sm:$0xff]  }
 0xe9b   :  { %8391 = vmatpush3.bf16.msra.mxu0 %v9002_v26  ;;  %6045 = vmatpush1.bf16.msra.mxu1 %v9003_v29  ;;  %v9034_v26 = vld [vmem:[#allocation11 + $0x20] sm:$0xff]   ;;  %v9035_v29 = vld [vmem:[#allocation11 + $0x28] sm:$0xff]  }
 0xe9c   :  { %6071 = vmatprep.subr.bf16.mxu0 %v9008_v46  ;;  %8396 = vmatprep.subr.bf16.mxu1 %v9030_v61  ;;  %v9036_v46 = vld [vmem:[#allocation11 + $0x30] sm:$0xff]  }
 0xf50   :  { %v5658_v60 = vpop.f32.mrb[44].mxu1  ;;  %v8142_v19 = vpop.f32.mrb[60].mxu0 }
 0xf51   :  { %v5659_v37 = vadd.f32 %v5658_v60, %v9881_v48  ;;  %v5660_v33 = vpop.f32.mrb[45].mxu1  ;;  %v8143_v34 = vpop.f32.mrb[61].mxu0 }
 0xf52   :  { %v5661_v18 = vadd.f32 %v5660_v33, %v9885_v50  ;;  %v5662_v25 = vpop.f32.mrb[46].mxu1  ;;  %v8144_v40 = vadd.f32 %v8143_v34, %v8142_v19  ;;  %v8145_v41 = vpop.f32.mrb[62].mxu0 }
 0xf53   :  { %v5708_v24 = vadd.f32 %v5705_v38, %v5659_v37  ;;  %v5663_v55 = vpop.f32.mrb[47].mxu1  ;;  %v8146_v44 = vpop.f32.mrb[63].mxu0  ;;  %v9323_v38 = vld [vmem:[%s10356_s13] ss:$0 sm:$0xff]  ;;  %v7915_v25 = vld [vmem:[#allocation5] sm:$0xff]  }
 0xf54   :  { %v5715_v3 = vadd.f32 %v5706_v42, %v5661_v18  ;;  %v5700_v2 = vadd.f32 %v8144_v40, %v9895_v7 }
 0xf55   :  { %v7652_v36 = vmul.f32 -1.442695, %v5708_v24  ;;  %v7970_v24 = vld [vmem:[#allocation5 + $0x8] sm:$0xff]  }
 0xf56   :  { %v7653_v59 = vmul.f32 -1.442695, %v5715_v3 }
 0xf57   :  { %9268 = vpow2.f32 %v7652_v36 }
 0xf58   :  { %9270 = vpow2.f32 %v7653_v59 }
 0xf61   :  { %v9269_v16 = vpop.eup %9268 }
 0xf62   :  { %v5712_v21 = vadd.f32 1.0, %v9269_v16  ;;  %v9271_v22 = vpop.eup %9270  ;;  %v7971_v16 = vld [vmem:[#allocation5 + $0x10] sm:$0xff]  }
 0xf63   :  { %v5719_v53 = vadd.f32 1.0, %v9271_v22  ;;  %v7917_v22 = vunpack.c.h.bf16 %v7915_v25 }
 0xf64   :  { %9272 = vrcp.f32 %v5712_v21  ;;  %v7916_v21 = vunpack.c.l.bf16 %v7915_v25 }
 0xf65   :  { %9274 = vrcp.f32 %v5719_v53 }
 0xf6e   :  { %v9273_v54 = vpop.eup %9272 }
 0xf6f   :  { %v5722_v56 = vmul.f32 %v9273_v54, %v5707_v27  ;;  %v9275_v57 = vpop.eup %9274 }
 0xf70   :  { %v5725_v58 = vsub.f32 1.0, %v9275_v57  ;;  %v5727_v51 = vmul.f32 %v9275_v57, %v10125_v43  ;;  %v9012_v43 = vld [vmem:[#allocation10 + $0x48] ss:$16 sps:$4 sm:$0xff]   ;;  %v7921_v57 = vunpack.c.h.bf16 %v7970_v24 }
 0xf71   :  { %v5723_v5 = vadd.f32 %v5722_v56, %v5700_v2  ;;  %v7920_v56 = vunpack.c.l.bf16 %v7970_v24 }
 0xf73   :  { %9276 = vtanh.f32 %v5723_v5 }
 0xf7d   :  { %v9277_v30 = vpop.eup %9276 }
 0xf7e   :  { %v5726_v62 = vmul.f32 %v9277_v30, %v5725_v58  ;;  %v7924_v58 = vunpack.c.l.bf16 %v7971_v16 }
 0xf80   :  { %v10227_v1 = vadd.f32 %v5727_v51, %v5726_v62 }
 0xf82   :  { %v5729_v35 = vpack.c.bf16 %v10227_v1, %v10227_v1 }
 0xf84   :  { %8393 = vmatmul.mubr.bf16.vlgmr.msra.gmra.mrb[64].mxu0 %v5729_v35  ;;  %6063 = vmatmul.mubr.bf16.vlgmr.msra.gmra.mrb[48].mxu1 %v5729_v35 }
 0xf85   :  { %6072 = vmatpush1.bf16.msra.mxu0 %v9006_v63  ;;  %6103 = vmatprep.mubr.bf16.mxu0 %v9549_v0  ;;  %v9018_v0 = vld [vmem:[#allocation10 + $0x88] ss:$16 sps:$4 sm:$0xff]   ;;  %v7925_v63 = vunpack.c.h.bf16 %v7971_v16 }
 0xf86   :  { %6073 = vmatprep.subr.bf16.mxu0 %v9011_v20  ;;  %8397 = vmatpush3.bf16.msra.mxu1 %v9030_v61  ;;  %v9037_v61 = vld [vmem:[#allocation11 + $0x38] sm:$0xff]  }
 0xf87   :  { %8398 = vmatprep.subr.bf16.mxu1 %v9031_v14 }
 0xf89   :  { %6074 = vmatpush1.bf16.msra.mxu0 %v9009_v10 }
 0xf8a   :  { %6075 = vmatprep.subr.bf16.mxu0 %v9014_v4  ;;  %8399 = vmatpush3.bf16.msra.mxu1 %v9031_v14 }
 0xf8b   :  { %8400 = vmatprep.subr.bf16.mxu1 %v9032_v9 }
 0xf8d   :  { %6076 = vmatpush1.bf16.msra.mxu0 %v9012_v43 }
 0xf8e   :  { %6077 = vmatprep.subr.bf16.mxu0 %v9017_v8  ;;  %8401 = vmatpush3.bf16.msra.mxu1 %v9032_v9 }
 0xf8f   :  { %8402 = vmatprep.subr.bf16.mxu1 %v9033_v11 }
 0xf91   :  { %6078 = vmatpush1.bf16.msra.mxu0 %v9015_v13 }
 0xf92   :  { %6079 = vmatprep.subr.bf16.mxu0 %v9020_v28  ;;  %8403 = vmatpush3.bf16.msra.mxu1 %v9033_v11  ;;  %v7972_v11 = vld [vmem:[#allocation5 + $0x18] sm:$0xff]  }
 0xf93   :  { %8404 = vmatprep.subr.bf16.mxu1 %v9034_v26 }
 0xf95   :  { %6080 = vmatpush1.bf16.msra.mxu0 %v9018_v0  ;;  %v7929_v0 = vunpack.c.h.bf16 %v7972_v11 }
 0xf96   :  { %6081 = vmatprep.subr.bf16.mxu0 %v9023_v15  ;;  %8405 = vmatpush3.bf16.msra.mxu1 %v9034_v26 }
 0xf97   :  { %8406 = vmatprep.subr.bf16.mxu1 %v9035_v29 }
 0xf99   :  { %6082 = vmatpush1.bf16.msra.mxu0 %v9021_v12 }
 0xf9a   :  { %6083 = vmatprep.subr.bf16.mxu0 %v9026_v17  ;;  %8407 = vmatpush3.bf16.msra.mxu1 %v9035_v29 }
 0xf9b   :  { %8408 = vmatprep.subr.bf16.mxu1 %v9036_v46 }
 0xf9d   :  { %6084 = vmatpush1.bf16.msra.mxu0 %v9024_v52 }
 0xf9e   :  { %6085 = vmatprep.subr.bf16.mxu0 %v9029_v39  ;;  %8409 = vmatpush3.bf16.msra.mxu1 %v9036_v46 }
 0xf9f   :  { %8410 = vmatprep.subr.bf16.mxu1 %v9037_v61 }
 0xfa1   :  { %6086 = vmatpush1.bf16.msra.mxu0 %v9027_v23  ;;  %v7928_v23 = vunpack.c.l.bf16 %v7972_v11 }
 0xfa2   :  { %8411 = vmatpush3.bf16.msra.mxu1 %v9037_v61 }
 0xfa4   :  { %6104 = vmatmul.mubr.bf16.vlgmr.msra.gmra.mrb[68].mxu0 %v5729_v35 }
0x1057   :  { %v5828_v60 = vpop.f32.mrb[64].mxu0  ;;  %v6064_v19 = vpop.f32.mrb[48].mxu1 }
0x1058   :  { %v5829_v37 = vadd.f32 %v9323_v38, %v5828_v60  ;;  %v6121_v33 = vcombine.high %v6064_v19, %v6064_v19  ;;  %v6128_v34 = vrot.slane %v6064_v19, %v9779_v32  ;;  %v8394_v42 = vpop.f32.mrb[65].mxu0  ;;  %v10236_v18 = vpop.f32.mrb[49].mxu1 }
0x1059   :  { %v5831_v40 = vpop.f32.mrb[66].mxu0  ;;  %v6068_v41 = vpop.f32.mrb[50].mxu1 }
0x105a   :  { %5835 = vst [vmem:[#allocation16 + $0x18] sm:$0xff] %v5829_v37  ;;  %v6135_v55 = vrot.slane %v6121_v33, %v9779_v32  ;;  %v6136_v44 = vcombine.high %v6128_v34, %v6128_v34  ;;  %v6144_v3 = vrot.slane %v6128_v34, %v9779_v32  ;;  %v8395_v36 = vpop.f32.mrb[67].mxu0  ;;  %v6069_v59 = vpop.f32.mrb[51].mxu1 }
0x105c   :  { %v6137_v53 = vcombine.high %v6135_v55, %v6135_v55  ;;  %v6151_v27 = vrot.slane %v6135_v55, %v9779_v32  ;;  %v6158_v2 = vrot.slane %v6136_v44, %v9779_v32  ;;  %v6166_v54 = vcombine.high %v6144_v3, %v6144_v3  ;;  %v7694_v55 = vld [vmem:[%s10350_s7] ss:$0 sm:$0xff]  ;;  %s9554_s7 = smov [#allocation16]  }
0x105d   :  { %v6181_v5 = vrot.slane %v6144_v3, %v9787_v45 }
0x105e   :  { %v6165_v30 = vrot.slane %v6137_v53, %v9779_v32  ;;  %v6168_v62 = vcombine.high %v6158_v2, %v6158_v2  ;;  %v6185_v51 = vrot.slane %v6158_v2, %v9787_v45  ;;  %v6167_v35 = vcombine.high %v6151_v27, %v6151_v27 }
0x105f   :  { %v6189_v20 = vrot.slane %v6166_v54, %v9787_v45  ;;  %v6197_v14 = vrot.slane %v6151_v27, %v9787_v45  ;;  %v6218_v10 = vadd.f32 %v7916_v21, %v6181_v5  ;;  %v7707_v21 = vld [vmem:[%s10351_s8] ss:$0 sm:$0xff]  ;;  %s7219_s8 = sshll.u32 %s9554_s7, 4  ;;  %s7220_s8 = int_to_ptr.vmem [resolvable:$true] %s7219_s8 }
0x1060   :  { %v6169_v4 = vcombine.high %v6165_v30, %v6165_v30  ;;  %v6193_v9 = vrot.slane %v6168_v62, %v9787_v45  ;;  %v6219_v43 = vadd.f32 %v7917_v22, %v6185_v51  ;;  %v6201_v8 = vrot.slane %v6165_v30, %v9787_v45  ;;  %s9501_s11 = scalar_lea.vmem %s7220_s8, 640  ;;  %p9506_p9 = scmp.lt.s32.totalorder %s7220_s8, %s7220_s8 }
0x1061   :  { %v6220_v13 = vadd.f32 %v7920_v56, %v6189_v20  ;;  %v6226_v28 = vmax.f32 %v6218_v10, 0.0  ;;  %v6222_v32 = vadd.f32 %v7924_v58, %v6197_v14  ;;  %v6205_v26 = vrot.slane %v6167_v35, %v9787_v45  ;;  %p9502_p8 = scmp.ne.s32.totalorder %s7220_s8, %s9501_s11  ;;  %p9507_p10 = scmp.lt.s32.totalorder %s9501_s11, %s9501_s11 }
0x1062   :  { %v6227_v15 = vmax.f32 %v6219_v43, 0.0  ;;  %v6221_v12 = vadd.f32 %v7921_v57, %v6193_v9  ;;  %v6223_v17 = vadd.f32 %v7925_v63, %v6201_v8  ;;  %v6209_v52 = vrot.slane %v6169_v4, %v9787_v45 }
0x1063   :  { %v6228_v39 = vmax.f32 %v6220_v13, 0.0  ;;  %v6230_v61 = vmax.f32 %v6222_v32, 0.0  ;;  %v6224_v33 = vadd.f32 %v7928_v23, %v6205_v26  ;;  %v9046_v23 = vld [vmem:[#allocation13 + $0x34] ss:$12 sps:$4 sm:$0xff]   ;;  %v9044_v26 = vld [vmem:[#allocation13 + $0x30] ss:$12 sps:$4 sm:$0xff]   ;;  %p9508_p11 = por %p9507_p10, %p9506_p9 }
0x1064   :  { %v7782_v29 = vpack.c.bf16 %v6227_v15, %v6226_v28  ;;  %v6229_v46 = vmax.f32 %v6221_v12, 0.0  ;;  %v6231_v60 = vmax.f32 %v6223_v17, 0.0  ;;  %v6225_v37 = vadd.f32 %v7929_v0, %v6209_v52  ;;  %v9040_v12 = vld [vmem:[#allocation13 + $0x4] ss:$12 sps:$4 sm:$0xff]   ;;  %v9038_v17 = vld [vmem:[#allocation13] ss:$12 sps:$4 sm:$0xff]  }
0x1065   :  { %v6232_v42 = vmax.f32 %v6224_v33, 0.0  ;;  %7002 = vmatprep.subr.bf16.mxu0 %v9040_v12  ;;  %v9043_v52 = vld [vmem:[#allocation13 + $0x1c] ss:$12 sps:$4 sm:$0xff]   ;;  %p9509_p12 = pnand %p9508_p11, %p9502_p8 }
0x1066   :  { %8412 = vmatprep.mubr.bf16.mxu1 %v7782_v29  ;;  %v7783_v19 = vpack.c.bf16 %v6229_v46, %v6228_v39  ;;  %v7784_v38 = vpack.c.bf16 %v6231_v60, %v6230_v61  ;;  %v6233_v34 = vmax.f32 %v6225_v37, 0.0  ;;  %7003 = vmatpush1.bf16.msra.mxu0 %v9038_v17  ;;  %v9041_v39 = vld [vmem:[#allocation13 + $0x18] ss:$12 sps:$4 sm:$0xff]   ;;  %v9047_v46 = vld [vmem:[#allocation13 + $0x48] ss:$12 sps:$4 sm:$0xff]  }
0x1067   :  { %7004 = vmatprep.subr.bf16.mxu0 %v9043_v52  ;;  %v9049_v29 = vld [vmem:[#allocation13 + $0x4c] ss:$12 sps:$4 sm:$0xff]   ;;  %v9052_v61 = vld [vmem:[#allocation13 + $0x64] ss:$12 sps:$4 sm:$0xff]   ;;  %v9058_v37 = vld [vmem:[#allocation13 + $0x94] ss:$12 sps:$4 sm:$0xff]  }
0x1068   :  { %8413 = vmatmul.mubr.bf16.vlgmr.msra.gmra.mrb[52].mxu1 %v7783_v19  ;;  %v7785_v25 = vpack.c.bf16 %v6233_v34, %v6232_v42  ;;  %v9050_v60 = vld [vmem:[#allocation13 + $0x60] ss:$12 sps:$4 sm:$0xff]   ;;  %v9055_v19 = vld [vmem:[#allocation13 + $0x7c] ss:$12 sps:$4 sm:$0xff]  }
0x1069   :  { %8416 = vmatprep.mubr.bf16.mxu1 %v7784_v38  ;;  %v9053_v38 = vld [vmem:[#allocation13 + $0x78] ss:$12 sps:$4 sm:$0xff]   ;;  %v9056_v33 = vld [vmem:[#allocation13 + $0x90] ss:$12 sps:$4 sm:$0xff]   ;;  %v9059_v42 = vld [vmem:[#allocation13 + $0xa8] ss:$12 sps:$4 sm:$0xff]  }
0x106a   :  { %7005 = vmatpush1.bf16.msra.mxu0 %v9041_v39  ;;  %v9061_v34 = vld [vmem:[#allocation13 + $0xac] ss:$12 sps:$4 sm:$0xff]  }
0x106b   :  { %7006 = vmatprep.subr.bf16.mxu0 %v9046_v23 }
0x106e   :  { %7007 = vmatpush1.bf16.msra.mxu0 %v9044_v26 }
0x106f   :  { %7008 = vmatprep.subr.bf16.mxu0 %v9049_v29 }
0x1070   :  { %8417 = vmatmul.mubr.bf16.gmra.mrb[56].mxu1 %v7785_v25  ;;  %v9062_v25 = vld [vmem:[#allocation13 + $0xc0] ss:$12 sps:$4 sm:$0xff]  }
0x1072   :  { %7009 = vmatpush1.bf16.msra.mxu0 %v9047_v46 }
0x1073   :  { %7010 = vmatprep.subr.bf16.mxu0 %v9052_v61 }
0x1076   :  { %7011 = vmatpush1.bf16.msra.mxu0 %v9050_v60 }
0x1077   :  { %v10251_v40 = vpop.f32.mrb[68].mxu0  ;;  %7012 = vmatprep.subr.bf16.mxu0 %v9055_v19 }
0x1078   :  { %v10253_v41 = vpop.f32.mrb[69].mxu0 }
0x1079   :  { %v6109_v45 = vpop.f32.mrb[70].mxu0 }
0x107a   :  { %v6110_v24 = vpop.f32.mrb[71].mxu0  ;;  %7013 = vmatpush1.bf16.msra.mxu0 %v9053_v38  ;;  %v9064_v45 = vld [vmem:[#allocation13 + $0xc4] ss:$12 sps:$4 sm:$0xff]  }
0x107b   :  { %7014 = vmatprep.subr.bf16.mxu0 %v9058_v37  ;;  %v9067_v24 = vld [vmem:[#allocation13 + $0xdc] ss:$12 sps:$4 sm:$0xff]  }
0x107e   :  { %7015 = vmatpush1.bf16.msra.mxu0 %v9056_v33 }
0x107f   :  { %7016 = vmatprep.subr.bf16.mxu0 %v9061_v34 }
0x1082   :  { %7017 = vmatpush1.bf16.msra.mxu0 %v9059_v42 }
0x1083   :  { %7018 = vmatprep.subr.bf16.mxu0 %v9064_v45 }
0x1086   :  { %7019 = vmatpush1.bf16.msra.mxu0 %v9062_v25 }
0x1087   :  { %7020 = vmatprep.subr.bf16.mxu0 %v9067_v24 }
0x113b   :  { %v8414_v44 = vpop.f32.mrb[52].mxu1 }
0x113c   :  { %v6380_v3 = vadd.f32 %v8414_v44, %v7694_v55  ;;  %v6371_v36 = vpop.f32.mrb[53].mxu1  ;;  %v9070_v44 = vld [vmem:[#allocation13 + $0xf4] ss:$12 sps:$4 sm:$0xff]  }
0x113d   :  { %v6372_v59 = vadd.f32 %v7694_v55, %v6371_v36  ;;  %v8415_v16 = vpop.f32.mrb[54].mxu1  ;;  %v9084_v36 = vld [vmem:[#allocation13 + $0x8] ss:$12 sps:$4 sm:$0xff]  }
0x113e   :  { %v6404_v22 = vmax.f32 %v6380_v3, 0.0  ;;  %v6383_v53 = vadd.f32 %v8415_v16, %v7694_v55  ;;  %v6374_v27 = vpop.f32.mrb[55].mxu1  ;;  %v9083_v3 = vld [vmem:[#allocation13 + $0xc8] ss:$12 sps:$4 sm:$0xff]   ;;  %v9068_v16 = vld [vmem:[#allocation13 + $0xf0] ss:$12 sps:$4 sm:$0xff]  }
0x113f   :  { %v6375_v2 = vadd.f32 %v7694_v55, %v6374_v27  ;;  %v6402_v54 = vmax.f32 %v6372_v59, 0.0  ;;  %8169 = vmatprep.subr.bf16.mxu1 %v9083_v3  ;;  %v9088_v59 = vld [vmem:[#allocation13 + $0xe0] ss:$12 sps:$4 sm:$0xff]   ;;  %v9076_v27 = vld [vmem:[#allocation13 + $0x124] ss:$12 sps:$4 sm:$0xff]  }
0x1140   :  { %v6405_v56 = vmax.f32 %v6383_v53, 0.0  ;;  %v6419_v5 = vmul.f32 %v7707_v21, %v6404_v22  ;;  %8170 = vmatpush3.bf16.msra.mxu1 %v9084_v36  ;;  %v9073_v22 = vld [vmem:[#allocation13 + $0x10c] ss:$12 sps:$4 sm:$0xff]   ;;  %v9071_v53 = vld [vmem:[#allocation13 + $0x108] ss:$12 sps:$4 sm:$0xff]  }
0x1141   :  { %v6403_v57 = vmax.f32 %v6375_v2, 0.0  ;;  %v6417_v51 = vmul.f32 %v7707_v21, %v6402_v54  ;;  %8171 = vmatprep.subr.bf16.mxu1 %v9088_v59  ;;  %v9074_v2 = vld [vmem:[#allocation13 + $0x120] ss:$12 sps:$4 sm:$0xff]   ;;  %v9079_v54 = vld [vmem:[#allocation13 + $0x13c] ss:$12 sps:$4 sm:$0xff]  }
0x1142   :  { %6429 = vadd.xlane.f32.xlu1 %v6419_v5  ;;  %v6420_v58 = vmul.f32 %v7707_v21, %v6405_v56  ;;  %v9077_v56 = vld [vmem:[#allocation13 + $0x138] ss:$12 sps:$4 sm:$0xff]   ;;  %v9082_v5 = vld [vmem:[#allocation13 + $0x154] ss:$12 sps:$4 sm:$0xff]  }
0x1143   :  { %v8418_v30 = vpop.f32.mrb[56].mxu1  ;;  %v6418_v10 = vmul.f32 %v7707_v21, %v6403_v57  ;;  %v9080_v57 = vld [vmem:[#allocation13 + $0x150] ss:$12 sps:$4 sm:$0xff]  }
0x1144   :  { %6431 = vadd.xlane.f32.xlu0 %v6420_v58  ;;  %v6387_v62 = vpop.f32.mrb[57].mxu1  ;;  %v6396_v63 = vadd.f32 %v8418_v30, %v7694_v55  ;;  %v9087_v58 = vld [vmem:[#allocation13 + $0x16c] ss:$12 sps:$4 sm:$0xff]   ;;  %v9085_v30 = vld [vmem:[#allocation13 + $0x168] ss:$12 sps:$4 sm:$0xff]  }
0x1145   :  { %v6388_v35 = vadd.f32 %v7694_v55, %v6387_v62  ;;  %v8419_v20 = vpop.f32.mrb[58].mxu1  ;;  %v9090_v62 = vld [vmem:[#allocation13 + $0xf8] ss:$12 sps:$4 sm:$0xff]  }
0x1146   :  { %v6390_v14 = vpop.f32.mrb[59].mxu1  ;;  %6425 = vadd.xlane.f32.xlu1 %v6417_v51  ;;  %v6399_v9 = vadd.f32 %v8419_v20, %v7694_v55  ;;  %v6408_v8 = vmax.f32 %v6396_v63, 0.0  ;;  %v9091_v51 = vld [vmem:[#allocation13 + $0x38] ss:$12 sps:$4 sm:$0xff]   ;;  %v9092_v63 = vld [vmem:[#allocation13 + $0x110] ss:$12 sps:$4 sm:$0xff]  }
0x1147   :  { %v6406_v4 = vmax.f32 %v6388_v35, 0.0  ;;  %v6391_v43 = vadd.f32 %v7694_v55, %v6390_v14  ;;  %v9065_v55 = vld [vmem:[#allocation13 + $0xd8] ss:$12 sps:$4 sm:$0xff]   ;;  %v9093_v35 = vld [vmem:[#allocation13 + $0x50] ss:$12 sps:$4 sm:$0xff]  }
0x1148   :  { %6427 = vadd.xlane.f32.xlu0 %v6418_v10  ;;  %v6409_v28 = vmax.f32 %v6399_v9, 0.0  ;;  %v6423_v0 = vmul.f32 %v7707_v21, %v6408_v8  ;;  %7021 = vmatpush1.bf16.msra.mxu0 %v9065_v55  ;;  %v9094_v20 = vld [vmem:[#allocation13 + $0x128] ss:$12 sps:$4 sm:$0xff]   ;;  %v9096_v10 = vld [vmem:[#allocation13 + $0x140] ss:$12 sps:$4 sm:$0xff]  }
0x1149   :  { %v6407_v11 = vmax.f32 %v6391_v43, 0.0  ;;  %v6421_v13 = vmul.f32 %v7707_v21, %v6406_v4  ;;  %7022 = vmatprep.subr.bf16.mxu0 %v9070_v44  ;;  %v9095_v14 = vld [vmem:[#allocation13 + $0x68] ss:$12 sps:$4 sm:$0xff]   ;;  %v9097_v4 = vld [vmem:[#allocation13 + $0x80] ss:$12 sps:$4 sm:$0xff]  }
0x114a   :  { %v6424_v15 = vmul.f32 %v7707_v21, %v6409_v28  ;;  %v9098_v9 = vld [vmem:[#allocation13 + $0x158] ss:$12 sps:$4 sm:$0xff]   ;;  %v9100_v8 = vld [vmem:[#allocation13 + $0x170] ss:$12 sps:$4 sm:$0xff]  }
0x114b   :  { %6433 = vadd.xlane.f32.xlu1 %v6421_v13  ;;  %v6422_v32 = vmul.f32 %v7707_v21, %v6407_v11  ;;  %v9089_v21 = vld [vmem:[#allocation13 + $0x20] ss:$12 sps:$4 sm:$0xff]   ;;  %v9099_v43 = vld [vmem:[#allocation13 + $0x98] ss:$12 sps:$4 sm:$0xff]   ;;  %v9101_v11 = vld [vmem:[#allocation13 + $0xb0] ss:$12 sps:$4 sm:$0xff]  }
0x114c   :  { %7023 = vmatpush1.bf16.msra.mxu0 %v9068_v16  ;;  %8172 = vmatpush3.bf16.msra.mxu1 %v9089_v21 }
0x114d   :  { %6435 = vadd.xlane.f32.xlu0 %v6422_v32  ;;  %7024 = vmatprep.subr.bf16.mxu0 %v9073_v22 }
0x114e   :  { %8173 = vmatprep.subr.bf16.mxu1 %v9090_v62 }
0x114f   :  { %6437 = vadd.xlane.f32.xlu1 %v6423_v0 }
0x1150   :  { %7025 = vmatpush1.bf16.msra.mxu0 %v9071_v53  ;;  %8174 = vmatpush3.bf16.msra.mxu1 %v9091_v51 }
0x1151   :  { %6439 = vadd.xlane.f32.xlu0 %v6424_v15  ;;  %7026 = vmatprep.subr.bf16.mxu0 %v9076_v27 }
0x1152   :  { %8175 = vmatprep.subr.bf16.mxu1 %v9092_v63 }
0x1154   :  { %7027 = vmatpush1.bf16.msra.mxu0 %v9074_v2  ;;  %8176 = vmatpush3.bf16.msra.mxu1 %v9093_v35 }
0x1155   :  { %7028 = vmatprep.subr.bf16.mxu0 %v9079_v54  ;;  %8177 = vmatprep.subr.bf16.mxu1 %v9094_v20 }
0x1158   :  { %7029 = vmatpush1.bf16.msra.mxu0 %v9077_v56  ;;  %8178 = vmatpush3.bf16.msra.mxu1 %v9095_v14 }
0x1159   :  { %7030 = vmatprep.subr.bf16.mxu0 %v9082_v5  ;;  %8179 = vmatprep.subr.bf16.mxu1 %v9096_v10 }
0x115c   :  { %7031 = vmatpush1.bf16.msra.mxu0 %v9080_v57  ;;  %8180 = vmatpush3.bf16.msra.mxu1 %v9097_v4 }
0x115d   :  { %7032 = vmatprep.subr.bf16.mxu0 %v9087_v58  ;;  %8181 = vmatprep.subr.bf16.mxu1 %v9098_v9 }
0x1160   :  { %7033 = vmatpush1.bf16.msra.mxu0 %v9085_v30  ;;  %8182 = vmatpush3.bf16.msra.mxu1 %v9099_v43 }
0x1161   :  { %8183 = vmatprep.subr.bf16.mxu1 %v9100_v8 }
0x1164   :  { %8184 = vmatpush3.bf16.msra.mxu1 %v9101_v11 }
0x1165   :  { %8420 = vmatprep.subr.bf16.mxu1 %v9551_v31 }
0x11cf   :  { %v6430_v13 = vpop.xlane.xlu1 %6429 }
0x11d0   :  { %v6453_v28 = vrot.slane %v6430_v13, 4 }
0x11d1   :  { %v6432_v32 = vpop.xlane.xlu0 %6431 }
0x11d2   :  { %v6454_v0 = vmax.f32 %v6430_v13, %v6453_v28  ;;  %v6459_v15 = vrot.slane %v6432_v32, 4 }
0x11d3   :  { %v6426_v12 = vpop.xlane.xlu1 %6425 }
0x11d4   :  { %v6455_v17 = vrot.slane %v6454_v0, 2  ;;  %v6460_v52 = vmax.f32 %v6432_v32, %v6459_v15  ;;  %v6441_v39 = vrot.slane %v6426_v12, 4 }
0x11d5   :  { %v6428_v23 = vpop.xlane.xlu0 %6427 }
0x11d6   :  { %v6456_v26 = vmax.f32 %v6454_v0, %v6455_v17  ;;  %v6461_v29 = vrot.slane %v6460_v52, 2  ;;  %v6442_v46 = vmax.f32 %v6426_v12, %v6441_v39  ;;  %v6447_v61 = vrot.slane %v6428_v23, 4 }
0x11d8   :  { %v6457_v60 = vrot.slane %v6456_v26, 1  ;;  %v6462_v19 = vmax.f32 %v6460_v52, %v6461_v29  ;;  %v6443_v38 = vrot.slane %v6442_v46, 2  ;;  %v6448_v37 = vmax.f32 %v6428_v23, %v6447_v61  ;;  %v6434_v33 = vpop.xlane.xlu1 %6433 }
0x11d9   :  { %v6465_v34 = vrot.slane %v6434_v33, 4 }
0x11da   :  { %v6458_v42 = vmax.f32 %v6456_v26, %v6457_v60  ;;  %v6463_v25 = vrot.slane %v6462_v19, 1  ;;  %v6444_v45 = vmax.f32 %v6442_v46, %v6443_v38  ;;  %v6449_v24 = vrot.slane %v6448_v37, 2  ;;  %v6436_v55 = vpop.xlane.xlu0 %6435 }
0x11db   :  { %v6466_v44 = vmax.f32 %v6434_v33, %v6465_v34  ;;  %v6471_v3 = vrot.slane %v6436_v55, 4 }
0x11dc   :  { %v6491_v36 = vsub.f32 %v6430_v13, %v6458_v42  ;;  %v6464_v59 = vmax.f32 %v6462_v19, %v6463_v25  ;;  %v6445_v16 = vrot.slane %v6444_v45, 1  ;;  %v6450_v21 = vmax.f32 %v6448_v37, %v6449_v24  ;;  %v6438_v22 = vpop.xlane.xlu1 %6437 }
0x11dd   :  { %v6467_v53 = vrot.slane %v6466_v44, 2  ;;  %v6472_v27 = vmax.f32 %v6436_v55, %v6471_v3  ;;  %v6477_v2 = vrot.slane %v6438_v22, 4 }
0x11de   :  { %v6501_v54 = vmul.f32 1.442695, %v6491_v36  ;;  %v6492_v56 = vsub.f32 %v6432_v32, %v6464_v59  ;;  %v6446_v5 = vmax.f32 %v6444_v45, %v6445_v16  ;;  %v6451_v57 = vrot.slane %v6450_v21, 1  ;;  %v6440_v58 = vpop.xlane.xlu0 %6439 }
0x11df   :  { %v6468_v30 = vmax.f32 %v6466_v44, %v6467_v53  ;;  %v6473_v62 = vrot.slane %v6472_v27, 2  ;;  %v6478_v51 = vmax.f32 %v6438_v22, %v6477_v2  ;;  %v6483_v63 = vrot.slane %v6440_v58, 4 }
0x11e0   :  { %9278 = vpow2.f32 %v6501_v54  ;;  %v6503_v35 = vmul.f32 1.442695, %v6492_v56  ;;  %v6489_v20 = vsub.f32 %v6426_v12, %v6446_v5  ;;  %v6452_v14 = vmax.f32 %v6450_v21, %v6451_v57 }
0x11e1   :  { %v6469_v10 = vrot.slane %v6468_v30, 1  ;;  %v6474_v4 = vmax.f32 %v6472_v27, %v6473_v62  ;;  %v6479_v9 = vrot.slane %v6478_v51, 2  ;;  %v6484_v43 = vmax.f32 %v6440_v58, %v6483_v63 }
0x11e2   :  { %9280 = vpow2.f32 %v6503_v35  ;;  %v6497_v8 = vmul.f32 1.442695, %v6489_v20  ;;  %v6490_v11 = vsub.f32 %v6428_v23, %v6452_v14 }
0x11e3   :  { %v6470_v13 = vmax.f32 %v6468_v30, %v6469_v10  ;;  %v6475_v28 = vrot.slane %v6474_v4, 1  ;;  %v6480_v32 = vmax.f32 %v6478_v51, %v6479_v9  ;;  %v6485_v0 = vrot.slane %v6484_v43, 2 }
0x11e4   :  { %9282 = vpow2.f32 %v6497_v8  ;;  %v6499_v15 = vmul.f32 1.442695, %v6490_v11 }
0x11e5   :  { %v6493_v17 = vsub.f32 %v6434_v33, %v6470_v13  ;;  %v6476_v52 = vmax.f32 %v6474_v4, %v6475_v28  ;;  %v6481_v39 = vrot.slane %v6480_v32, 1  ;;  %v6486_v26 = vmax.f32 %v6484_v43, %v6485_v0 }
0x11e6   :  { %9284 = vpow2.f32 %v6499_v15 }
0x11e7   :  { %v6505_v12 = vmul.f32 1.442695, %v6493_v17  ;;  %v6494_v29 = vsub.f32 %v6436_v55, %v6476_v52  ;;  %v6482_v46 = vmax.f32 %v6480_v32, %v6481_v39  ;;  %v6487_v61 = vrot.slane %v6486_v26, 1 }
0x11e9   :  { %9286 = vpow2.f32 %v6505_v12  ;;  %v6507_v60 = vmul.f32 1.442695, %v6494_v29  ;;  %v6495_v19 = vsub.f32 %v6438_v22, %v6482_v46  ;;  %v6488_v38 = vmax.f32 %v6486_v26, %v6487_v61  ;;  %v7973_v61 = vld [vmem:[#allocation7 + $0x8] sm:$0xff]  }
0x11ea   :  { %v10262_v23 = vpop.eup %9278 }
0x11eb   :  { %v6525_v37 = vrot.slane %v10262_v23, 4  ;;  %9288 = vpow2.f32 %v6507_v60  ;;  %v6509_v34 = vmul.f32 1.442695, %v6495_v19  ;;  %v6496_v42 = vsub.f32 %v6440_v58, %v6488_v38 }
0x11ec   :  { %v10265_v33 = vpop.eup %9280 }
0x11ed   :  { %v6526_v25 = vadd.f32 %v10262_v23, %v6525_v37  ;;  %v6531_v45 = vrot.slane %v10265_v33, 4  ;;  %9290 = vpow2.f32 %v6509_v34  ;;  %v6511_v24 = vmul.f32 1.442695, %v6496_v42 }
0x11ee   :  { %v10269_v55 = vpop.eup %9282  ;;  %v7936_v34 = vunpack.c.l.bf16 %v7973_v61 }
0x11ef   :  { %v6527_v44 = vrot.slane %v6526_v25, 2  ;;  %v6532_v3 = vadd.f32 %v10265_v33, %v6531_v45  ;;  %v6513_v36 = vrot.slane %v10269_v55, 4  ;;  %9292 = vpow2.f32 %v6511_v24  ;;  %v7931_v24 = vld [vmem:[#allocation7] sm:$0xff]  }
0x11f0   :  { %v10273_v59 = vpop.eup %9284 }
0x11f1   :  { %v6528_v16 = vadd.f32 %v6527_v44, %v6526_v25  ;;  %v6533_v21 = vrot.slane %v6532_v3, 2  ;;  %v6514_v22 = vadd.f32 %v10269_v55, %v6513_v36  ;;  %v6519_v53 = vrot.slane %v10273_v59, 4 }
0x11f3   :  { %v10277_v27 = vpop.eup %9286  ;;  %v6529_v2 = vrot.slane %v6528_v16, 1  ;;  %v6534_v54 = vadd.f32 %v6533_v21, %v6532_v3  ;;  %v6515_v56 = vrot.slane %v6514_v22, 2  ;;  %v6520_v5 = vadd.f32 %v10273_v59, %v6519_v53 }
0x11f4   :  { %v6537_v57 = vrot.slane %v10277_v27, 4  ;;  %v7937_v3 = vunpack.c.h.bf16 %v7973_v61  ;;  %v7932_v53 = vunpack.c.l.bf16 %v7931_v24 }
0x11f5   :  { %v10281_v58 = vpop.eup %9288  ;;  %v6530_v30 = vadd.f32 %v6529_v2, %v6528_v16  ;;  %v6535_v62 = vrot.slane %v6534_v54, 1  ;;  %v6516_v51 = vadd.f32 %v6515_v56, %v6514_v22  ;;  %v6521_v63 = vrot.slane %v6520_v5, 2 }
0x11f6   :  { %v6538_v35 = vadd.f32 %v10277_v27, %v6537_v57  ;;  %v6543_v20 = vrot.slane %v10281_v58, 4  ;;  %v7933_v57 = vunpack.c.h.bf16 %v7931_v24 }
0x11f7   :  { %v10285_v14 = vpop.eup %9290  ;;  %9294 = vrcp.f32 %v6530_v30  ;;  %v6536_v10 = vadd.f32 %v6535_v62, %v6534_v54  ;;  %v6517_v4 = vrot.slane %v6516_v51, 1  ;;  %v6522_v9 = vadd.f32 %v6521_v63, %v6520_v5  ;;  %v7974_v62 = vld [vmem:[#allocation7 + $0x10] sm:$0xff]  }
0x11f8   :  { %v6539_v43 = vrot.slane %v6538_v35, 2  ;;  %v6544_v8 = vadd.f32 %v10281_v58, %v6543_v20  ;;  %v6549_v11 = vrot.slane %v10285_v14, 4 }
0x11f9   :  { %v10289_v13 = vpop.eup %9292  ;;  %9296 = vrcp.f32 %v6536_v10  ;;  %v6518_v28 = vadd.f32 %v6517_v4, %v6516_v51  ;;  %v6523_v32 = vrot.slane %v6522_v9, 1 }
0x11fa   :  { %v6540_v0 = vadd.f32 %v6539_v43, %v6538_v35  ;;  %v6545_v15 = vrot.slane %v6544_v8, 2  ;;  %v6550_v17 = vadd.f32 %v10285_v14, %v6549_v11  ;;  %v6555_v52 = vrot.slane %v10289_v13, 4 }
0x11fb   :  { %9298 = vrcp.f32 %v6518_v28  ;;  %v6524_v39 = vadd.f32 %v6523_v32, %v6522_v9  ;;  %v7940_v9 = vunpack.c.l.bf16 %v7974_v62 }
0x11fc   :  { %v6541_v26 = vrot.slane %v6540_v0, 1  ;;  %v6546_v12 = vadd.f32 %v6545_v15, %v6544_v8  ;;  %v6551_v29 = vrot.slane %v6550_v17, 2  ;;  %v6556_v46 = vadd.f32 %v10289_v13, %v6555_v52  ;;  %v7975_v8 = vld [vmem:[#allocation7 + $0x18] sm:$0xff]  }
0x11fd   :  { %9300 = vrcp.f32 %v6524_v39 }
0x11fe   :  { %v6542_v60 = vadd.f32 %v6541_v26, %v6540_v0  ;;  %v6547_v19 = vrot.slane %v6546_v12, 1  ;;  %v6552_v38 = vadd.f32 %v6551_v29, %v6550_v17  ;;  %v6557_v37 = vrot.slane %v6556_v46, 2 }
0x1200   :  { %9302 = vrcp.f32 %v6542_v60  ;;  %v6548_v42 = vadd.f32 %v6547_v19, %v6546_v12  ;;  %v6553_v25 = vrot.slane %v6552_v38, 1  ;;  %v6558_v45 = vadd.f32 %v6557_v37, %v6556_v46 }
0x1201   :  { %v9295_v44 = vpop.eup %9294  ;;  %v7944_v12 = vunpack.c.l.bf16 %v7975_v8  ;;  %v7945_v37 = vunpack.c.h.bf16 %v7975_v8 }
0x1202   :  { %v6554_v36 = vadd.f32 %v6553_v25, %v6552_v38  ;;  %v6559_v16 = vrot.slane %v6558_v45, 1  ;;  %v6566_v21 = vmul.f32 %v9295_v44, %v10262_v23  ;;  %9304 = vrcp.f32 %v6548_v42 }
0x1203   :  { %v9297_v22 = vpop.eup %9296 }
0x1204   :  { %v6560_v2 = vadd.f32 %v6559_v16, %v6558_v45  ;;  %v6568_v54 = vmul.f32 %v9297_v22, %v10265_v33  ;;  %9306 = vrcp.f32 %v6554_v36  ;;  %v6595_v56 = vmul.f32 %v7936_v34, %v6566_v21 }
0x1205   :  { %v9299_v5 = vpop.eup %9298 }
0x1206   :  { %v6562_v30 = vmul.f32 %v9299_v5, %v10269_v55  ;;  %9308 = vrcp.f32 %v6560_v2  ;;  %v6596_v51 = vmul.f32 %v7937_v3, %v6568_v54  ;;  %v6613_v63 = vrot.slane %v6595_v56, 4 }
0x1207   :  { %v9301_v35 = vpop.eup %9300  ;;  %v7941_v55 = vunpack.c.h.bf16 %v7974_v62 }
0x1208   :  { %v6564_v20 = vmul.f32 %v9301_v35, %v10273_v59  ;;  %v6593_v23 = vmul.f32 %v7932_v53, %v6562_v30  ;;  %v6614_v10 = vadd.f32 %v6613_v63, %v6595_v56  ;;  %v6619_v4 = vrot.slane %v6596_v51, 4 }
0x120a   :  { %v9303_v43 = vpop.eup %9302  ;;  %v6594_v33 = vmul.f32 %v7933_v57, %v6564_v20  ;;  %v6601_v11 = vrot.slane %v6593_v23, 4  ;;  %v6615_v28 = vrot.slane %v6614_v10, 2  ;;  %v6620_v32 = vadd.f32 %v6619_v4, %v6596_v51 }
0x120b   :  { %v6570_v0 = vmul.f32 %v9303_v43, %v10277_v27 }
0x120c   :  { %v9305_v15 = vpop.eup %9304  ;;  %v6602_v17 = vadd.f32 %v6601_v11, %v6593_v23  ;;  %v6607_v52 = vrot.slane %v6594_v33, 4  ;;  %v6616_v39 = vadd.f32 %v6615_v28, %v6614_v10  ;;  %v6621_v26 = vrot.slane %v6620_v32, 2 }
0x120d   :  { %v6572_v59 = vmul.f32 %v9305_v15, %v10281_v58  ;;  %v6597_v29 = vmul.f32 %v7940_v9, %v6570_v0 }
0x120e   :  { %v9307_v46 = vpop.eup %9306  ;;  %v6603_v61 = vrot.slane %v6602_v17, 2  ;;  %v6608_v60 = vadd.f32 %v6607_v52, %v6594_v33  ;;  %v6622_v19 = vadd.f32 %v6621_v26, %v6620_v32  ;;  %v6617_v24 = vrot.slane %v6616_v39, 1 }
0x120f   :  { %v6574_v38 = vmul.f32 %v9307_v46, %v10285_v14  ;;  %v6598_v34 = vmul.f32 %v7941_v55, %v6572_v59  ;;  %v6625_v42 = vrot.slane %v6597_v29, 4 }
0x1210   :  { %v9309_v27 = vpop.eup %9308  ;;  %v6604_v25 = vadd.f32 %v6603_v61, %v6602_v17  ;;  %v6609_v45 = vrot.slane %v6608_v60, 2  ;;  %v6623_v44 = vrot.slane %v6622_v19, 1  ;;  %v6618_v57 = vadd.f32 %v6617_v24, %v6616_v39 }
0x1211   :  { %v6576_v3 = vmul.f32 %v9309_v27, %v10289_v13  ;;  %v6599_v36 = vmul.f32 %v7944_v12, %v6574_v38  ;;  %v6626_v58 = vadd.f32 %v6625_v42, %v6597_v29  ;;  %v6631_v16 = vrot.slane %v6598_v34, 4 }
0x1212   :  { %v6605_v21 = vrot.slane %v6604_v25, 1  ;;  %v6610_v22 = vadd.f32 %v6609_v45, %v6608_v60  ;;  %v6624_v30 = vadd.f32 %v6623_v44, %v6622_v19  ;;  %v6651_v8 = vpack.c.bf16 %v6618_v57, %v6618_v57  ;;  %v9109_v57 = vld [vmem:[#allocation14 + $0x38] sm:$0xff]  }
0x1213   :  { %v6600_v53 = vmul.f32 %v7945_v37, %v6576_v3  ;;  %v6627_v2 = vrot.slane %v6626_v58, 2  ;;  %v6632_v54 = vadd.f32 %v6631_v16, %v6598_v34  ;;  %v6637_v56 = vrot.slane %v6599_v36, 4 }
0x1214   :  { %v6606_v14 = vadd.f32 %v6605_v21, %v6604_v25  ;;  %v6611_v5 = vrot.slane %v6610_v22, 1  ;;  %v6652_v33 = vpack.c.bf16 %v6624_v30, %v6624_v30  ;;  %v6667_v59 = vunpack.c.l.b16 %v6651_v8  ;;  %v5837_v21 = vld [vmem:[#allocation2 + $0x10] sm:$0xf] }
0x1215   :  { %v6628_v62 = vadd.f32 %v6627_v2, %v6626_v58  ;;  %v6633_v51 = vrot.slane %v6632_v54, 2  ;;  %v6638_v63 = vadd.f32 %v6637_v56, %v6599_v36  ;;  %v6643_v35 = vrot.slane %v6600_v53, 4  ;;  %v9104_v2 = vld [vmem:[#allocation14 + $0x10] sm:$0xff]   ;;  %v9106_v56 = vld [vmem:[#allocation14 + $0x20] sm:$0xff]  }
0x1216   :  { %v6612_v20 = vadd.f32 %v6611_v5, %v6610_v22  ;;  %v6649_v23 = vpack.c.bf16 %v6606_v14, %v6606_v14  ;;  %v6668_v12 = vunpack.c.l.b16 %v6652_v33  ;;  %v9102_v22 = vld [vmem:[#allocation14] sm:$0xff]   ;;  %v9107_v14 = vld [vmem:[#allocation14 + $0x28] sm:$0xff]   ;;  %v9108_v5 = vld [vmem:[#allocation14 + $0x30] sm:$0xff]  }
0x1217   :  { %v6629_v13 = vrot.slane %v6628_v62, 1  ;;  %v6634_v10 = vadd.f32 %v6633_v51, %v6632_v54  ;;  %v6639_v4 = vrot.slane %v6638_v63, 2  ;;  %v6644_v9 = vadd.f32 %v6643_v35, %v6600_v53  ;;  %v9103_v53 = vld [vmem:[#allocation14 + $0x8] sm:$0xff]   ;;  %v9105_v54 = vld [vmem:[#allocation14 + $0x18] sm:$0xff]  }
0x1218   :  { %v6650_v43 = vpack.c.bf16 %v6612_v20, %v6612_v20  ;;  %v6665_v55 = vunpack.c.l.b16 %v6649_v23  ;;  %v7083_v51 = vadd.f32 %v10236_v18, %v9878_v47  ;;  %v7084_v23 = vadd.f32 %v10251_v40, %v9883_v49 }
0x1219   :  { %v6630_v11 = vadd.f32 %v6629_v13, %v6628_v62  ;;  %v6635_v28 = vrot.slane %v6634_v10, 1  ;;  %v6640_v32 = vadd.f32 %v6639_v4, %v6638_v63  ;;  %v6645_v0 = vrot.slane %v6644_v9, 2 }
0x121a   :  { %v6666_v15 = vunpack.c.l.b16 %v6650_v43  ;;  %v7085_v49 = vadd.f32 %v10253_v41, %v9893_v6  ;;  %v9324_v6 = vld [vmem:[%s10356_s13] ss:$0 sm:$0xff] }
0x121b   :  { %v6636_v17 = vadd.f32 %v6635_v28, %v6634_v10  ;;  %v6641_v52 = vrot.slane %v6640_v32, 1  ;;  %v6646_v39 = vadd.f32 %v6645_v0, %v6644_v9  ;;  %v6653_v26 = vpack.c.bf16 %v6630_v11, %v6630_v11 }
0x121c   :  { %v6673_v29 = vsel %vm1045_vm0, %v6666_v15, %v6665_v55 }
0x121d   :  { %v6642_v46 = vadd.f32 %v6641_v52, %v6640_v32  ;;  %v6647_v61 = vrot.slane %v6646_v39, 1  ;;  %v6654_v60 = vpack.c.bf16 %v6636_v17, %v6636_v17  ;;  %v6669_v19 = vunpack.c.l.b16 %v6653_v26 }
0x121e   :  { %v6674_v38 = vsel %vm1047_vm1, %v6667_v59, %v6673_v29 }
0x121f   :  { %v6648_v37 = vadd.f32 %v6647_v61, %v6646_v39  ;;  %v6655_v34 = vpack.c.bf16 %v6642_v46, %v6642_v46  ;;  %v6670_v42 = vunpack.c.l.b16 %v6654_v60  ;;  %v6675_v27 = vsel %vm1049_vm2, %v6668_v12, %v6674_v38 }
0x1220   :  { %v6676_v25 = vsel %vm1051_vm3, %v6669_v19, %v6675_v27 }
0x1221   :  { %v6656_v45 = vpack.c.bf16 %v6648_v37, %v6648_v37  ;;  %v6671_v24 = vunpack.c.l.b16 %v6655_v34  ;;  %v6677_v44 = vsel %vm1053_vm4, %v6670_v42, %v6676_v25 }
0x1223   :  { %v6672_v3 = vunpack.c.l.b16 %v6656_v45  ;;  %v6678_v36 = vsel %vm1055_vm5, %v6671_v24, %v6677_v44 }
0x1225   :  { %v6679_v58 = vsel %vm1057_vm6, %v6672_v3, %v6678_v36 }
0x1226   :  { %v6680_v16 = vpack.c.b16 %v6679_v58, %v6679_v58 }
0x1228   :  { %7034 = vmatprep.mubr.bf16.mxu0 %v6680_v16  ;;  %7075 = vmatprep.mubr.bf16.mxu1 %v6680_v16 }
0x1229   :  { %7035 = vmatmul.mubr.bf16.vlgmr.msra.gmra.mrb[72].mxu0 %v5837_v21  ;;  %7076 = vmatmul.mubr.bf16.vlgmr.msra.gmra.mrb[60].mxu1 %v5837_v21 }
0x122a   :  { %8436 = vmatprep.mubr.msk.bf16.mxu1 %vm9552_vm7, %v9551_v31  ;;  %8421 = vmatpush3.bf16.msra.mxu1 %v9102_v22 }
0x122b   :  { %8422 = vmatprep.subr.bf16.mxu1 %v9551_v31 }
0x122e   :  { %8423 = vmatpush3.bf16.msra.mxu1 %v9103_v53 }
0x122f   :  { %8424 = vmatprep.subr.bf16.mxu1 %v9551_v31 }
0x1232   :  { %8425 = vmatpush3.bf16.msra.mxu1 %v9104_v2 }
0x1233   :  { %8426 = vmatprep.subr.bf16.mxu1 %v9551_v31 }
0x1236   :  { %8427 = vmatpush3.bf16.msra.mxu1 %v9105_v54 }
0x1237   :  { %8428 = vmatprep.subr.bf16.mxu1 %v9551_v31 }
0x123a   :  { %8429 = vmatpush3.bf16.msra.mxu1 %v9106_v56 }
0x123b   :  { %8430 = vmatprep.subr.bf16.mxu1 %v9551_v31 }
0x123e   :  { %8431 = vmatpush3.bf16.msra.mxu1 %v9107_v14 }
0x123f   :  { %8432 = vmatprep.subr.bf16.mxu1 %v9551_v31 }
0x1242   :  { %8433 = vmatpush3.bf16.msra.mxu1 %v9108_v5 }
0x1243   :  { %8434 = vmatprep.subr.bf16.mxu1 %v9551_v31 }
0x1246   :  { %8435 = vmatpush3.bf16.msra.mxu1 %v9109_v57 }
0x12fc   :  { %v7036_v30 = vpop.f32.mrb[72].mxu0  ;;  %v8185_v62 = vpop.f32.mrb[60].mxu1 }
0x12fd   :  { %v7037_v63 = vadd.f32 %v7036_v30, %v9881_v48  ;;  %v7038_v35 = vpop.f32.mrb[73].mxu0  ;;  %v8186_v20 = vpop.f32.mrb[61].mxu1 }
0x12fe   :  { %v7039_v13 = vadd.f32 %v7038_v35, %v9885_v50  ;;  %v7040_v10 = vpop.f32.mrb[74].mxu0  ;;  %v8187_v4 = vadd.f32 %v8186_v20, %v8185_v62  ;;  %v8188_v9 = vpop.f32.mrb[62].mxu1 }
0x12ff   :  { %v7086_v43 = vadd.f32 %v7083_v51, %v7037_v63  ;;  %v7041_v31 = vpop.f32.mrb[75].mxu0  ;;  %v8189_v8 = vpop.f32.mrb[63].mxu1 }
0x1300   :  { %v7093_v33 = vadd.f32 %v7084_v23, %v7039_v13  ;;  %v7078_v50 = vadd.f32 %v8187_v4, %v9895_v7 }
0x1301   :  { %v7756_v11 = vmul.f32 -1.442695, %v7086_v43 }
0x1302   :  { %v7757_v28 = vmul.f32 -1.442695, %v7093_v33 }
0x1303   :  { %9310 = vpow2.f32 %v7756_v11 }
0x1304   :  { %9312 = vpow2.f32 %v7757_v28 }
0x130d   :  { %v9311_v47 = vpop.eup %9310 }
0x130e   :  { %v7090_v48 = vadd.f32 1.0, %v9311_v47  ;;  %v9313_v18 = vpop.eup %9312 }
0x130f   :  { %v7097_v32 = vadd.f32 1.0, %v9313_v18 }
0x1310   :  { %9314 = vrcp.f32 %v7090_v48 }
0x1311   :  { %9316 = vrcp.f32 %v7097_v32 }
0x131a   :  { %v9315_v40 = vpop.eup %9314 }
0x131b   :  { %v7100_v0 = vmul.f32 %v9315_v40, %v7085_v49  ;;  %v9317_v15 = vpop.eup %9316 }
0x131c   :  { %v7103_v17 = vsub.f32 1.0, %v9317_v15  ;;  %v7105_v26 = vmul.f32 %v9317_v15, %v10227_v1 }
0x131d   :  { %v7101_v55 = vadd.f32 %v7100_v0, %v7078_v50 }
0x131f   :  { %9318 = vtanh.f32 %v7101_v55 }
0x1329   :  { %v9319_v52 = vpop.eup %9318 }
0x132a   :  { %v7104_v39 = vmul.f32 %v9319_v52, %v7103_v17 }
0x132c   :  { %v7106_v59 = vadd.f32 %v7105_v26, %v7104_v39 }
0x132e   :  { %v7107_v12 = vpack.c.bf16 %v7106_v59, %v7106_v59 }
0x1330   :  { %8437 = vmatmul.mubr.bf16.vlgmr.msra.gmra.mrb[64].mxu1 %v7107_v12 }
0x1403   :  { %v7206_v29 = vpop.f32.mrb[64].mxu1 }
0x1404   :  { %v7207_v7 = vadd.f32 %v9324_v6, %v7206_v29  ;;  %v8438_v41 = vpop.f32.mrb[65].mxu1 }
0x1405   :  { %v7209_v46 = vpop.f32.mrb[66].mxu1 }
0x1406   :  { %7213 = vst [vmem:[#allocation16 + $0x20] sm:$0xff] %v7207_v7  ;;  %v8439_v61 = vpop.f32.mrb[67].mxu1 }
0x1407   :  { %9512 = shalt.err (!%p9509_p12)
}
0x1408   :  { %s9513_s21 = scalar_lea.hbm %s10357_s14, 640 }
0x1409   :  { %p9514_p13 = scmp.ne.s32.totalorder %s10357_s14, %s9513_s21  ;;  %p9517_p0 = scmp.lt.u32.totalorder %s9513_s21, %s10357_s14 }
0x140b   :  { %p9519_p1 = pnand %p9517_p0, %p9514_p13 }
0x140d   :  { %9522 = shalt.err (!%p9519_p1)
}
0x140e   :  { %s9555_s20 = smov 128   ;;  %s9556_s1 = smov 8  }
0x140f   :  { %7225 = dma.vmem_to_hbm [thread:$0]  %s7220_s8, 640, %s10357_s14, [#allocation4], %s9555_s20, %s9555_s20, %s9556_s1  }
0x1410   :  { %9533 = dma.done.wait [#allocation4], 640  }
0x1411   :  { %9534 = vsyncadd [#allocation4], 4294966656 }
0x1412   :  { %7229 = vsyncpa [#allocation3], 1 }
0x1413   :  { %7230 = vsyncpa [#allocation6], 1 }
0x1414   :  { %7231 = vsyncpa [#allocation9], 1 }
0x1415   :  { %7232 = vsyncpa [#allocation12], 1 }
0x1416   :  { %7233 = vsyncpa [#allocation15], 1 }
0x1417   :  { %7234 = vsyncpa [#allocation4], 1 }

</bundles_post_ra>
